<compile_context>
chip_gen: v6e
topology: v6e:2x2x1
jax: 0.10.0
libtpu: 0.0.40
codegen_flags: <defaults>
</compile_context>

<pallas_src>
import math
import functools

import jax
import jax.numpy as jnp
from jax import lax
from jax.experimental import pallas as pl

LOG_HALF = math.log(0.5)          # fixed t2_hat (fix_t=True in the module)
LOG_2PI = math.log(2.0 * math.pi)
F32 = jnp.float32


def _softplus(x):
    return jnp.maximum(x, 0.0) + jnp.log1p(jnp.exp(-jnp.abs(x)))


# ---------------------------------------------------------------------------
# Launch 1: fused encoder kernel, both modalities.
# enc_config == 'nu':  param1 = nu1,  param2 = -softplus(raw)
# ---------------------------------------------------------------------------
def _encoder2_kernel(x1_ref, w1a_ref, b1a_ref, wma_ref, bma_ref, wla_ref, bla_ref,
                     x2_ref, w1b_ref, b1b_ref, wmb_ref, bmb_ref, wlb_ref, blb_ref,
                     nu1a_ref, nu2a_ref, nu1b_ref, nu2b_ref):
    h1 = jnp.maximum(
        jnp.dot(x1_ref[...], w1a_ref[...], preferred_element_type=F32) + b1a_ref[...],
        0.0)
    nu1a_ref[...] = jnp.dot(h1, wma_ref[...], preferred_element_type=F32) + bma_ref[...]
    raw1 = jnp.dot(h1, wla_ref[...], preferred_element_type=F32) + bla_ref[...]
    nu2a_ref[...] = -_softplus(raw1)

    h2 = jnp.maximum(
        jnp.dot(x2_ref[...], w1b_ref[...], preferred_element_type=F32) + b1b_ref[...],
        0.0)
    nu1b_ref[...] = jnp.dot(h2, wmb_ref[...], preferred_element_type=F32) + bmb_ref[...]
    raw2 = jnp.dot(h2, wlb_ref[...], preferred_element_type=F32) + blb_ref[...]
    nu2b_ref[...] = -_softplus(raw2)


def encode2_pallas(x1, enc1, x2, enc2):
    B = x1.shape[0]
    d1 = enc1['wm'].shape[1]
    d2 = enc2['wm'].shape[1]
    return pl.pallas_call(
        _encoder2_kernel,
        out_shape=(jax.ShapeDtypeStruct((B, d1), F32),
                   jax.ShapeDtypeStruct((B, d1), F32),
                   jax.ShapeDtypeStruct((B, d2), F32),
                   jax.ShapeDtypeStruct((B, d2), F32)),
    )(x1, enc1['w1'], enc1['b1'], enc1['wm'], enc1['bm'], enc1['wl'], enc1['bl'],
      x2, enc2['w1'], enc2['b1'], enc2['wm'], enc2['bm'], enc2['wl'], enc2['bl'])


# ---------------------------------------------------------------------------
# Launch 2: fused Gibbs sampler + KL estimator.
#
# State is (2B, d): rows [:B] = posterior chain (encoder nus in the bias),
# rows [B:] = prior chain (bias = t2 only).  One fused coupling matmul per
# conditional:
#   z1 | z2:  [z2 | z2^2] @ Ma + bias_a = [lam1 | lam2],  Ma = G.T  (2*d2, 2*d1)
#   z2 | z1:  [z1 | z1^2] @ Mb + bias_b = [lam1 | lam2],  Mb = G    (2*d1, 2*d2)
# with  var = -1/(2 lam2),  mean = lam1 * var,  z = mean + sqrt(var) * eps.
# ---------------------------------------------------------------------------
def _gibbs_kl_kernel(ma_ref, mb_ref, bias_a_ref, bias_b_ref,
                     z1_init_ref, z2_init_ref, eps1_ref, eps2_ref,
                     nu1a_ref, nu2a_ref, nu1b_ref, nu2b_ref,
                     zq1_ref, zq2_ref, kl_ref, *, n_iter, B, d1, d2):
    Ma = ma_ref[...]           # (2*d2, 2*d1), pre-transposed in the wrapper
    Mb = mb_ref[...]           # (2*d1, 2*d2)
    bias_a = bias_a_ref[...]   # (2B, 2*d1) = [nu1 | t2 + nu2] (zeros for prior rows)
    bias_b = bias_b_ref[...]   # (2B, 2*d2)

    z1 = z1_init_ref[...]      # (2B, d1)
    z2 = z2_init_ref[...]      # (2B, d2)
    s1 = jnp.zeros_like(z1)
    s1q = jnp.zeros_like(z1)
    s2 = jnp.zeros_like(z2)
    s2q = jnp.zeros_like(z2)

    # Fully-unrolled Gibbs loop (static trip count n_iter=15): no grid-step
    # overhead, static eps loads and static output stores.
    for it in range(n_iter):
        # ---- sample z1 | z2 : single fused (2B, 2d2) @ (2d2, 2d1) matmul ----
        tz2 = jnp.concatenate([z2, z2 * z2], axis=-1)
        lam = bias_a + jnp.dot(tz2, Ma, preferred_element_type=F32)
        lam2 = jnp.minimum(lam[:, d1:], -1e-6)   # G construction guarantees <0; guard
        std1 = lax.rsqrt(-2.0 * lam2)            # EUP; std = sqrt(var), var = std^2
        var1 = std1 * std1
        z1 = lam[:, :d1] * var1 + std1 * eps1_ref[it]

        # ---- sample z2 | z1 ----
        tz1 = jnp.concatenate([z1, z1 * z1], axis=-1)
        lamb = bias_b + jnp.dot(tz1, Mb, preferred_element_type=F32)
        lam2b = jnp.minimum(lamb[:, d2:], -1e-6)
        std2 = lax.rsqrt(-2.0 * lam2b)
        var2 = std2 * std2
        z2 = lamb[:, :d2] * var2 + std2 * eps2_ref[it]

        # posterior-chain samples out; KL sufficient statistics accumulated
        zq1_ref[it] = z1[:B]
        zq2_ref[it] = z2[:B]
        s1 = s1 + z1
        s1q = s1q + z1 * z1
        s2 = s2 + z2
        s2q = s2q + z2 * z2

    # KL ("derivative" estimator):
    #   mean_batch sum_dim  nu1*(E_q[z]-E_p[z]) + nu2*(E_q[z^2]-E_p[z^2])
    inv_n = 1.0 / n_iter
    d_t1_a = (s1[:B] - s1[B:]) * inv_n
    d_t2_a = (s1q[:B] - s1q[B:]) * inv_n
    d_t1_b = (s2[:B] - s2[B:]) * inv_n
    d_t2_b = (s2q[:B] - s2q[B:]) * inv_n
    per_batch = (jnp.sum(nu1a_ref[...] * d_t1_a + nu2a_ref[...] * d_t2_a,
                         axis=-1, keepdims=True)
                 + jnp.sum(nu1b_ref[...] * d_t1_b + nu2b_ref[...] * d_t2_b,
                           axis=-1, keepdims=True))             # (B, 1)
    kl_ref[...] = jnp.sum(per_batch, axis=0, keepdims=True) * (1.0 / B)   # 'mean'


def gibbs_kl_pallas(Ma, Mb, bias_a, bias_b, z1_init, z2_init, eps1, eps2,
                    nu1a, nu2a, nu1b, nu2b, n_iter):
    B, d1 = nu1a.shape
    d2 = nu1b.shape[1]
    return pl.pallas_call(
        functools.partial(_gibbs_kl_kernel, n_iter=n_iter, B=B, d1=d1, d2=d2),
        out_shape=(jax.ShapeDtypeStruct((n_iter, B, d1), F32),
                   jax.ShapeDtypeStruct((n_iter, B, d2), F32),
                   jax.ShapeDtypeStruct((1, 1), F32)),
    )(Ma, Mb, bias_a, bias_b, z1_init, z2_init, eps1, eps2,
      nu1a, nu2a, nu1b, nu2b)


# ---------------------------------------------------------------------------
# Launch 3: fused decoder kernel, both modalities.
# z_flat: (n_iter*B, d) iteration-major (flattened in the wrapper).
# Outputs: last-iteration loc (B, D) and the scalar NLL sum per modality.
# Normal(loc, 1):  -log_prob(x).sum(data dims) = 0.5*||x-loc||^2 + 0.5*D*log(2pi)
# ---------------------------------------------------------------------------
def _decoder2_kernel(z1_ref, w1_ref, b1_ref, x1_ref,
                     z2_ref, w2_ref, b2_ref, x2_ref,
                     loc1_ref, nll1_ref, loc2_ref, nll2_ref, *, B):
    N = z1_ref.shape[0]

    loc1 = jnp.dot(z1_ref[...], w1_ref[...], preferred_element_type=F32) + b1_ref[...]
    D1 = loc1.shape[1]
    diff1 = x1_ref[...] - loc1
    nll1 = 0.5 * jnp.sum(diff1 * diff1, axis=-1, keepdims=True) + 0.5 * D1 * LOG_2PI
    loc1_ref[...] = loc1[N - B:, :]                  # last Gibbs iteration only
    nll1_ref[...] = jnp.sum(nll1, axis=0, keepdims=True)

    loc2 = jnp.dot(z2_ref[...], w2_ref[...], preferred_element_type=F32) + b2_ref[...]
    D2 = loc2.shape[1]
    diff2 = x2_ref[...] - loc2
    nll2 = 0.5 * jnp.sum(diff2 * diff2, axis=-1, keepdims=True) + 0.5 * D2 * LOG_2PI
    loc2_ref[...] = loc2[N - B:, :]
    nll2_ref[...] = jnp.sum(nll2, axis=0, keepdims=True)


def decode2_pallas(z1_flat, dec1, x1_rep, z2_flat, dec2, x2_rep, B):
    D1 = dec1['w'].shape[1]
    D2 = dec2['w'].shape[1]
    return pl.pallas_call(
        functools.partial(_decoder2_kernel, B=B),
        out_shape=(jax.ShapeDtypeStruct((B, D1), F32),
                   jax.ShapeDtypeStruct((1, 1), F32),
                   jax.ShapeDtypeStruct((B, D2), F32),
                   jax.ShapeDtypeStruct((1, 1), F32)),
    )(z1_flat, dec1['w'], dec1['b'], x1_rep, z2_flat, dec2['w'], dec2['b'], x2_rep)


# ---------------------------------------------------------------------------
# Full POISEVAE forward (glue in jitted jnp, hot paths in the 3 kernels above)
# ---------------------------------------------------------------------------
@functools.partial(jax.jit, static_argnames=('n_gibbs_iter', 'kl_weight'))
def poisevae_forward(params, x, key, n_gibbs_iter=15, kl_weight=1.0):
    x1, x2 = x
    B = x1.shape[0]
    d1, d2 = params['g11'].shape

    # ----- Launch 1: encode (enc_config='nu') -----
    nu1_1, nu2_1, nu1_2, nu2_2 = encode2_pallas(x1, params['enc1'], x2, params['enc2'])

    # ----- get_G and fused coupling matrices (tiny elementwise; plain jnp) -----
    g22_hat = params['g22_hat']
    g22 = -jnp.exp(g22_hat)
    scale = jnp.exp(0.5 * g22_hat + 0.5 * LOG_HALF)        # t2_hat = log(0.5)
    g12 = (2.0 / math.sqrt(d1)) * scale * jnp.tanh(params['g12_hat']) * 0.99
    g21 = (2.0 / math.sqrt(d2)) * scale * jnp.tanh(params['g21_hat']) * 0.99
    g11 = params['g11']
    G = jnp.concatenate([jnp.concatenate([g11, g12], axis=1),
                         jnp.concatenate([g21, g22], axis=1)], axis=0)   # (2d1, 2d2)
    Ma = G.T    # (2d2, 2d1): [z2|z2^2] @ Ma -> [lam1|lam2] of z1|z2
    Mb = G      # (2d1, 2d2): [z1|z1^2] @ Mb -> [lam1|lam2] of z2|z1

    # get_t (fix_t=True): t1 = 0, t2 = -exp(log 0.5) = -0.5
    t2a = -math.exp(LOG_HALF)
    t2b = -math.exp(LOG_HALF)

    # Biases: rows [:B] posterior (encoder nus), rows [B:] prior (nu = 0)
    zeros1 = jnp.zeros((B, d1), F32)
    zeros2 = jnp.zeros((B, d2), F32)
    nu1a_full = jnp.concatenate([nu1_1, zeros1], axis=0)
    nu2a_full = jnp.concatenate([nu2_1, zeros1], axis=0)
    nu1b_full = jnp.concatenate([nu1_2, zeros2], axis=0)
    nu2b_full = jnp.concatenate([nu2_2, zeros2], axis=0)
    bias_a = jnp.concatenate([nu1a_full, nu2a_full + t2a], axis=1)   # (2B, 2d1)
    bias_b = jnp.concatenate([nu1b_full, nu2b_full + t2b], axis=1)   # (2B, 2d2)

    # Gibbs noise / init (replaces torch.randn inside GibbsSampler)
    ks = jax.random.split(key, 4)
    eps1 = jax.random.normal(ks[0], (n_gibbs_iter, 2 * B, d1), F32)
    eps2 = jax.random.normal(ks[1], (n_gibbs_iter, 2 * B, d2), F32)
    z1_init = jax.random.normal(ks[2], (2 * B, d1), F32)
    z2_init = jax.random.normal(ks[3], (2 * B, d2), F32)

    # ----- Launch 2: Gibbs (prior + posterior chains) + KL -----
    zq1, zq2, kl11 = gibbs_kl_pallas(Ma, Mb, bias_a, bias_b, z1_init, z2_init,
                                     eps1, eps2, nu1_1, nu2_1, nu1_2, nu2_2,
                                     n_gibbs_iter)
    kl = kl11[0, 0]

    # ----- Launch 3: decode + Normal(loc, 1) negative log-likelihood -----
    N = n_gibbs_iter * B
    zq1_flat = zq1.reshape(N, d1)                    # wrapper-side reshape (free)
    zq2_flat = zq2.reshape(N, d2)
    x1_rep = jnp.broadcast_to(x1[None], (n_gibbs_iter, B, x1.shape[1])).reshape(N, -1)
    x2_rep = jnp.broadcast_to(x2[None], (n_gibbs_iter, B, x2.shape[1])).reshape(N, -1)
    loc1_last, nll1_sum, loc2_last, nll2_sum = decode2_pallas(
        zq1_flat, params['dec1'], x1_rep, zq2_flat, params['dec2'], x2_rep, B)

    rec1 = nll1_sum[0, 0]                            # negative_loglike.sum()
    rec2 = nll2_sum[0, 0]
    dec_rec_loss = (rec1 + rec2) / N                 # reduction='mean' over (B, n_samples)
    total_loss = kl_weight * kl + dec_rec_loss

    return {
        'z': [jnp.transpose(zq1, (1, 0, 2)), jnp.transpose(zq2, (1, 0, 2))],
        'x_rec': [loc1_last, loc2_last],             # == likelihood.loc[:, -1]
        'param1': [nu1_1, nu1_2],
        'param2': [nu2_1, nu2_2],
        'total_loss': total_loss,
        'rec_losses': [rec1, rec2],
        'KL_loss': kl,
    }


# ---------------------------------------------------------------------------
# Deterministic parameter initialization (shapes follow POISEVAE.__init__)
# ---------------------------------------------------------------------------
def init_params(key, D1, D2, H, d1, d2):
    def linear(k, fin, fout):
        kw, kb = jax.random.split(k)
        w = jax.random.normal(kw, (fin, fout), F32) / math.sqrt(fin)
        b = jax.random.normal(kb, (1, fout), F32) * 0.01
        return w, b

    def make_enc(k, Din, dlat):
        k1, k2, k3 = jax.random.split(k, 3)
        w1, b1 = linear(k1, Din, H)
        wm, bm = linear(k2, H, dlat)
        wl, bl = linear(k3, H, dlat)
        return dict(w1=w1, b1=b1, wm=wm, bm=bm, wl=wl, bl=bl)

    def make_dec(k, dlat, Dout):
        w, b = linear(k, dlat, Dout)
        return dict(w=w, b=b)

    ks = jax.random.split(key, 8)
    return {
        'enc1': make_enc(ks[0], D1, d1),
        'enc2': make_enc(ks[1], D2, d2),
        'dec1': make_dec(ks[2], d1, D1),
        'dec2': make_dec(ks[3], d2, D2),
        # interaction parameters (torch.randn(*latent_dims_flatten))
        'g11': jax.random.normal(ks[4], (d1, d2), F32),
        'g22_hat': jax.random.normal(ks[5], (d1, d2), F32),
        'g12_hat': jax.random.normal(ks[6], (d1, d2), F32),
        'g21_hat': jax.random.normal(ks[7], (d1, d2), F32),
    }


if __name__ == "__main__":
    B, D1, D2, H, d1, d2 = 8, 64, 32, 32, 16, 16
    n_gibbs_iter = 15

    key = jax.random.PRNGKey(0)
    kp, kx, ksamp = jax.random.split(key, 3)
    params = init_params(kp, D1, D2, H, d1, d2)

    kx1, kx2 = jax.random.split(kx)
    x1 = jax.random.normal(kx1, (B, D1), F32)
    x2 = jax.random.normal(kx2, (B, D2), F32)

    results = poisevae_forward(params, [x1, x2], ksamp,
                               n_gibbs_iter=n_gibbs_iter, kl_weight=1.0)
    jax.block_until_ready(results['total_loss'])

    assert results['z'][0].shape == (B, n_gibbs_iter, d1)
    assert results['z'][1].shape == (B, n_gibbs_iter, d2)
    assert results['x_rec'][0].shape == (B, D1)
    assert results['x_rec'][1].shape == (B, D2)
    assert bool(jnp.isfinite(results['total_loss']))
    assert bool(jnp.isfinite(results['KL_loss']))

    print("KERNEL_OK")
</pallas_src>

<mosaic_0001>
module attributes {stable_mosaic.version = 11 : i64} {
  func.func @_encoder2_kernel(%arg0: memref<8x64xf32, #tpu.memory_space<vmem>>, %arg1: memref<64x32xf32, #tpu.memory_space<vmem>>, %arg2: memref<1x32xf32, #tpu.memory_space<vmem>>, %arg3: memref<32x16xf32, #tpu.memory_space<vmem>>, %arg4: memref<1x16xf32, #tpu.memory_space<vmem>>, %arg5: memref<32x16xf32, #tpu.memory_space<vmem>>, %arg6: memref<1x16xf32, #tpu.memory_space<vmem>>, %arg7: memref<8x32xf32, #tpu.memory_space<vmem>>, %arg8: memref<32x32xf32, #tpu.memory_space<vmem>>, %arg9: memref<1x32xf32, #tpu.memory_space<vmem>>, %arg10: memref<32x16xf32, #tpu.memory_space<vmem>>, %arg11: memref<1x16xf32, #tpu.memory_space<vmem>>, %arg12: memref<32x16xf32, #tpu.memory_space<vmem>>, %arg13: memref<1x16xf32, #tpu.memory_space<vmem>>, %arg14: memref<8x16xf32, #tpu.memory_space<vmem>>, %arg15: memref<8x16xf32, #tpu.memory_space<vmem>>, %arg16: memref<8x16xf32, #tpu.memory_space<vmem>>, %arg17: memref<8x16xf32, #tpu.memory_space<vmem>>) attributes {dimension_semantics = [], scalar_prefetch = 0 : i64, scratch_operands = 0 : i64, tpu.core_type = #tpu.core_type<tc>} {
    %c0 = arith.constant 0 : index
    %c0_0 = arith.constant 0 : index
    %0 = vector.load %arg0[%c0, %c0_0] : memref<8x64xf32, #tpu.memory_space<vmem>>, vector<8x64xf32>
    %c0_1 = arith.constant 0 : index
    %c0_2 = arith.constant 0 : index
    %1 = vector.load %arg1[%c0_1, %c0_2] : memref<64x32xf32, #tpu.memory_space<vmem>>, vector<64x32xf32>
    %cst = arith.constant dense<0.000000e+00> : vector<8x32xf32>
    %2 = tpu.matmul %0, %1, %cst {dimension_numbers = #tpu.dot_dimension_numbers<[1], [0], [0], [1], [0, 0, 1, 1], [], []>} : vector<8x64xf32>, vector<64x32xf32>, vector<8x32xf32> -> vector<8x32xf32>
    %c0_3 = arith.constant 0 : index
    %c0_4 = arith.constant 0 : index
    %3 = vector.load %arg2[%c0_3, %c0_4] : memref<1x32xf32, #tpu.memory_space<vmem>>, vector<1x32xf32>
    %4 = vector.broadcast %3 : vector<1x32xf32> to vector<8x32xf32>
    %5 = arith.addf %2, %4 : vector<8x32xf32>
    %cst_5 = arith.constant 0.000000e+00 : f32
    %6 = vector.broadcast %cst_5 : f32 to vector<8x32xf32>
    %7 = arith.maximumf %5, %6 : vector<8x32xf32>
    %c0_6 = arith.constant 0 : index
    %c0_7 = arith.constant 0 : index
    %8 = vector.load %arg3[%c0_6, %c0_7] : memref<32x16xf32, #tpu.memory_space<vmem>>, vector<32x16xf32>
    %cst_8 = arith.constant dense<0.000000e+00> : vector<8x16xf32>
    %9 = tpu.matmul %7, %8, %cst_8 {dimension_numbers = #tpu.dot_dimension_numbers<[1], [0], [0], [1], [0, 0, 1, 1], [], []>} : vector<8x32xf32>, vector<32x16xf32>, vector<8x16xf32> -> vector<8x16xf32>
    %c0_9 = arith.constant 0 : index
    %c0_10 = arith.constant 0 : index
    %10 = vector.load %arg4[%c0_9, %c0_10] : memref<1x16xf32, #tpu.memory_space<vmem>>, vector<1x16xf32>
    %11 = vector.broadcast %10 : vector<1x16xf32> to vector<8x16xf32>
    %12 = arith.addf %9, %11 : vector<8x16xf32>
    %c0_11 = arith.constant 0 : index
    %c0_12 = arith.constant 0 : index
    %13 = vector.load %arg14[%c0_11, %c0_12] : memref<8x16xf32, #tpu.memory_space<vmem>>, vector<8x16xf32>
    tpu.vector_store %arg14[%c0_11, %c0_12], %12 {strides = array<i32>} : memref<8x16xf32, #tpu.memory_space<vmem>>, vector<8x16xf32>,
    %c0_13 = arith.constant 0 : index
    %c0_14 = arith.constant 0 : index
    %14 = vector.load %arg5[%c0_13, %c0_14] : memref<32x16xf32, #tpu.memory_space<vmem>>, vector<32x16xf32>
    %cst_15 = arith.constant dense<0.000000e+00> : vector<8x16xf32>
    %15 = tpu.matmul %7, %14, %cst_15 {dimension_numbers = #tpu.dot_dimension_numbers<[1], [0], [0], [1], [0, 0, 1, 1], [], []>} : vector<8x32xf32>, vector<32x16xf32>, vector<8x16xf32> -> vector<8x16xf32>
    %c0_16 = arith.constant 0 : index
    %c0_17 = arith.constant 0 : index
    %16 = vector.load %arg6[%c0_16, %c0_17] : memref<1x16xf32, #tpu.memory_space<vmem>>, vector<1x16xf32>
    %17 = vector.broadcast %16 : vector<1x16xf32> to vector<8x16xf32>
    %18 = arith.addf %15, %17 : vector<8x16xf32>
    %cst_18 = arith.constant 0.000000e+00 : f32
    %19 = vector.broadcast %cst_18 : f32 to vector<8x16xf32>
    %20 = arith.maximumf %18, %19 : vector<8x16xf32>
    %21 = math.absf %18 : vector<8x16xf32>
    %cst_19 = arith.constant 0.000000e+00 : f32
    %22 = vector.broadcast %cst_19 : f32 to vector<8x16xf32>
    %23 = arith.subf %22, %21 : vector<8x16xf32>
    %24 = math.exp %23 : vector<8x16xf32>
    %25 = math.log1p %24 : vector<8x16xf32>
    %26 = arith.addf %20, %25 : vector<8x16xf32>
    %cst_20 = arith.constant 0.000000e+00 : f32
    %27 = vector.broadcast %cst_20 : f32 to vector<8x16xf32>
    %28 = arith.subf %27, %26 : vector<8x16xf32>
    %c0_21 = arith.constant 0 : index
    %c0_22 = arith.constant 0 : index
    %29 = vector.load %arg15[%c0_21, %c0_22] : memref<8x16xf32, #tpu.memory_space<vmem>>, vector<8x16xf32>
    tpu.vector_store %arg15[%c0_21, %c0_22], %28 {strides = array<i32>} : memref<8x16xf32, #tpu.memory_space<vmem>>, vector<8x16xf32>,
    %c0_23 = arith.constant 0 : index
    %c0_24 = arith.constant 0 : index
    %30 = vector.load %arg7[%c0_23, %c0_24] : memref<8x32xf32, #tpu.memory_space<vmem>>, vector<8x32xf32>
    %c0_25 = arith.constant 0 : index
    %c0_26 = arith.constant 0 : index
    %31 = vector.load %arg8[%c0_25, %c0_26] : memref<32x32xf32, #tpu.memory_space<vmem>>, vector<32x32xf32>
    %cst_27 = arith.constant dense<0.000000e+00> : vector<8x32xf32>
    %32 = tpu.matmul %30, %31, %cst_27 {dimension_numbers = #tpu.dot_dimension_numbers<[1], [0], [0], [1], [0, 0, 1, 1], [], []>} : vector<8x32xf32>, vector<32x32xf32>, vector<8x32xf32> -> vector<8x32xf32>
    %c0_28 = arith.constant 0 : index
    %c0_29 = arith.constant 0 : index
    %33 = vector.load %arg9[%c0_28, %c0_29] : memref<1x32xf32, #tpu.memory_space<vmem>>, vector<1x32xf32>
    %34 = vector.broadcast %33 : vector<1x32xf32> to vector<8x32xf32>
    %35 = arith.addf %32, %34 : vector<8x32xf32>
    %cst_30 = arith.constant 0.000000e+00 : f32
    %36 = vector.broadcast %cst_30 : f32 to vector<8x32xf32>
    %37 = arith.maximumf %35, %36 : vector<8x32xf32>
    %c0_31 = arith.constant 0 : index
    %c0_32 = arith.constant 0 : index
    %38 = vector.load %arg10[%c0_31, %c0_32] : memref<32x16xf32, #tpu.memory_space<vmem>>, vector<32x16xf32>
    %cst_33 = arith.constant dense<0.000000e+00> : vector<8x16xf32>
    %39 = tpu.matmul %37, %38, %cst_33 {dimension_numbers = #tpu.dot_dimension_numbers<[1], [0], [0], [1], [0, 0, 1, 1], [], []>} : vector<8x32xf32>, vector<32x16xf32>, vector<8x16xf32> -> vector<8x16xf32>
    %c0_34 = arith.constant 0 : index
    %c0_35 = arith.constant 0 : index
    %40 = vector.load %arg11[%c0_34, %c0_35] : memref<1x16xf32, #tpu.memory_space<vmem>>, vector<1x16xf32>
    %41 = vector.broadcast %40 : vector<1x16xf32> to vector<8x16xf32>
    %42 = arith.addf %39, %41 : vector<8x16xf32>
    %c0_36 = arith.constant 0 : index
    %c0_37 = arith.constant 0 : index
    %43 = vector.load %arg16[%c0_36, %c0_37] : memref<8x16xf32, #tpu.memory_space<vmem>>, vector<8x16xf32>
    tpu.vector_store %arg16[%c0_36, %c0_37], %42 {strides = array<i32>} : memref<8x16xf32, #tpu.memory_space<vmem>>, vector<8x16xf32>,
    %c0_38 = arith.constant 0 : index
    %c0_39 = arith.constant 0 : index
    %44 = vector.load %arg12[%c0_38, %c0_39] : memref<32x16xf32, #tpu.memory_space<vmem>>, vector<32x16xf32>
    %cst_40 = arith.constant dense<0.000000e+00> : vector<8x16xf32>
    %45 = tpu.matmul %37, %44, %cst_40 {dimension_numbers = #tpu.dot_dimension_numbers<[1], [0], [0], [1], [0, 0, 1, 1], [], []>} : vector<8x32xf32>, vector<32x16xf32>, vector<8x16xf32> -> vector<8x16xf32>
    %c0_41 = arith.constant 0 : index
    %c0_42 = arith.constant 0 : index
    %46 = vector.load %arg13[%c0_41, %c0_42] : memref<1x16xf32, #tpu.memory_space<vmem>>, vector<1x16xf32>
    %47 = vector.broadcast %46 : vector<1x16xf32> to vector<8x16xf32>
    %48 = arith.addf %45, %47 : vector<8x16xf32>
    %cst_43 = arith.constant 0.000000e+00 : f32
    %49 = vector.broadcast %cst_43 : f32 to vector<8x16xf32>
    %50 = arith.maximumf %48, %49 : vector<8x16xf32>
    %51 = math.absf %48 : vector<8x16xf32>
    %cst_44 = arith.constant 0.000000e+00 : f32
    %52 = vector.broadcast %cst_44 : f32 to vector<8x16xf32>
    %53 = arith.subf %52, %51 : vector<8x16xf32>
    %54 = math.exp %53 : vector<8x16xf32>
    %55 = math.log1p %54 : vector<8x16xf32>
    %56 = arith.addf %50, %55 : vector<8x16xf32>
    %cst_45 = arith.constant 0.000000e+00 : f32
    %57 = vector.broadcast %cst_45 : f32 to vector<8x16xf32>
    %58 = arith.subf %57, %56 : vector<8x16xf32>
    %c0_46 = arith.constant 0 : index
    %c0_47 = arith.constant 0 : index
    %59 = vector.load %arg17[%c0_46, %c0_47] : memref<8x16xf32, #tpu.memory_space<vmem>>, vector<8x16xf32>
    tpu.vector_store %arg17[%c0_46, %c0_47], %58 {strides = array<i32>} : memref<8x16xf32, #tpu.memory_space<vmem>>, vector<8x16xf32>,
    return
  }
}

module attributes {stable_mosaic.version = 11 : i64} {
  func.func @_gibbs_kl_kernel(%arg0: memref<32x32xf32, #tpu.memory_space<vmem>>, %arg1: memref<32x32xf32, #tpu.memory_space<vmem>>, %arg2: memref<16x32xf32, #tpu.memory_space<vmem>>, %arg3: memref<16x32xf32, #tpu.memory_space<vmem>>, %arg4: memref<16x16xf32, #tpu.memory_space<vmem>>, %arg5: memref<16x16xf32, #tpu.memory_space<vmem>>, %arg6: memref<15x16x16xf32, #tpu.memory_space<vmem>>, %arg7: memref<15x16x16xf32, #tpu.memory_space<vmem>>, %arg8: memref<8x16xf32, #tpu.memory_space<vmem>>, %arg9: memref<8x16xf32, #tpu.memory_space<vmem>>, %arg10: memref<8x16xf32, #tpu.memory_space<vmem>>, %arg11: memref<8x16xf32, #tpu.memory_space<vmem>>, %arg12: memref<15x8x16xf32, #tpu.memory_space<vmem>>, %arg13: memref<15x8x16xf32, #tpu.memory_space<vmem>>, %arg14: memref<1x1xf32, #tpu.memory_space<vmem>>) attributes {dimension_semantics = [], scalar_prefetch = 0 : i64, scratch_operands = 0 : i64, tpu.core_type = #tpu.core_type<tc>} {
    %c0 = arith.constant 0 : index
    %c0_0 = arith.constant 0 : index
    %0 = vector.load %arg0[%c0, %c0_0] : memref<32x32xf32, #tpu.memory_space<vmem>>, vector<32x32xf32>
    %c0_1 = arith.constant 0 : index
    %c0_2 = arith.constant 0 : index
    %1 = vector.load %arg1[%c0_1, %c0_2] : memref<32x32xf32, #tpu.memory_space<vmem>>, vector<32x32xf32>
    %c0_3 = arith.constant 0 : index
    %c0_4 = arith.constant 0 : index
    %2 = vector.load %arg2[%c0_3, %c0_4] : memref<16x32xf32, #tpu.memory_space<vmem>>, vector<16x32xf32>
    %c0_5 = arith.constant 0 : index
    %c0_6 = arith.constant 0 : index
    %3 = vector.load %arg3[%c0_5, %c0_6] : memref<16x32xf32, #tpu.memory_space<vmem>>, vector<16x32xf32>
    %c0_7 = arith.constant 0 : index
    %c0_8 = arith.constant 0 : index
    %4 = vector.load %arg5[%c0_7, %c0_8] : memref<16x16xf32, #tpu.memory_space<vmem>>, vector<16x16xf32>
    %cst = arith.constant 0.000000e+00 : f32
    %5 = vector.broadcast %cst : f32 to vector<16x16xf32>
    %cst_9 = arith.constant 0.000000e+00 : f32
    %6 = vector.broadcast %cst_9 : f32 to vector<16x16xf32>
    %cst_10 = arith.constant 0.000000e+00 : f32
    %7 = vector.broadcast %cst_10 : f32 to vector<16x16xf32>
    %cst_11 = arith.constant 0.000000e+00 : f32
    %8 = vector.broadcast %cst_11 : f32 to vector<16x16xf32>
    %9 = arith.mulf %4, %4 : vector<16x16xf32>
    %10 = tpu.concatenate %4, %9 in 1 : vector<16x16xf32>, vector<16x16xf32> -> vector<16x32xf32>
    %cst_12 = arith.constant dense<0.000000e+00> : vector<16x32xf32>
    %11 = tpu.matmul %10, %0, %cst_12 {dimension_numbers = #tpu.dot_dimension_numbers<[1], [0], [0], [1], [0, 0, 1, 1], [], []>} : vector<16x32xf32>, vector<32x32xf32>, vector<16x32xf32> -> vector<16x32xf32>
    %12 = arith.addf %2, %11 : vector<16x32xf32>
    %13 = vector.extract_strided_slice %12 {offsets = [0, 16], sizes = [16, 16], strides = [1, 1]} : vector<16x32xf32> to vector<16x16xf32>
    %cst_13 = arith.constant -9.99999997E-7 : f32
    %14 = vector.broadcast %cst_13 : f32 to vector<16x16xf32>
    %15 = arith.minimumf %13, %14 : vector<16x16xf32>
    %cst_14 = arith.constant -2.000000e+00 : f32
    %16 = vector.broadcast %cst_14 : f32 to vector<16x16xf32>
    %17 = arith.mulf %16, %15 : vector<16x16xf32>
    %18 = math.rsqrt %17 : vector<16x16xf32>
    %19 = arith.mulf %18, %18 : vector<16x16xf32>
    %20 = vector.extract_strided_slice %12 {offsets = [0, 0], sizes = [16, 16], strides = [1, 1]} : vector<16x32xf32> to vector<16x16xf32>
    %21 = arith.mulf %20, %19 : vector<16x16xf32>
    %c0_15 = arith.constant 0 : index
    %c0_16 = arith.constant 0 : index
    %c0_17 = arith.constant 0 : index
    %22 = vector.load %arg6[%c0_15, %c0_16, %c0_17] : memref<15x16x16xf32, #tpu.memory_space<vmem>>, vector<1x16x16xf32>
    %23 = vector.shape_cast %22 : vector<1x16x16xf32> to vector<16x16xf32>
    %24 = arith.mulf %18, %23 : vector<16x16xf32>
    %25 = arith.addf %21, %24 : vector<16x16xf32>
    %26 = arith.mulf %25, %25 : vector<16x16xf32>
    %27 = tpu.concatenate %25, %26 in 1 : vector<16x16xf32>, vector<16x16xf32> -> vector<16x32xf32>
    %cst_18 = arith.constant dense<0.000000e+00> : vector<16x32xf32>
    %28 = tpu.matmul %27, %1, %cst_18 {dimension_numbers = #tpu.dot_dimension_numbers<[1], [0], [0], [1], [0, 0, 1, 1], [], []>} : vector<16x32xf32>, vector<32x32xf32>, vector<16x32xf32> -> vector<16x32xf32>
    %29 = arith.addf %3, %28 : vector<16x32xf32>
    %30 = vector.extract_strided_slice %29 {offsets = [0, 16], sizes = [16, 16], strides = [1, 1]} : vector<16x32xf32> to vector<16x16xf32>
    %cst_19 = arith.constant -9.99999997E-7 : f32
    %31 = vector.broadcast %cst_19 : f32 to vector<16x16xf32>
    %32 = arith.minimumf %30, %31 : vector<16x16xf32>
    %cst_20 = arith.constant -2.000000e+00 : f32
    %33 = vector.broadcast %cst_20 : f32 to vector<16x16xf32>
    %34 = arith.mulf %33, %32 : vector<16x16xf32>
    %35 = math.rsqrt %34 : vector<16x16xf32>
    %36 = arith.mulf %35, %35 : vector<16x16xf32>
    %37 = vector.extract_strided_slice %29 {offsets = [0, 0], sizes = [16, 16], strides = [1, 1]} : vector<16x32xf32> to vector<16x16xf32>
    %38 = arith.mulf %37, %36 : vector<16x16xf32>
    %c0_21 = arith.constant 0 : index
    %c0_22 = arith.constant 0 : index
    %c0_23 = arith.constant 0 : index
    %39 = vector.load %arg7[%c0_21, %c0_22, %c0_23] : memref<15x16x16xf32, #tpu.memory_space<vmem>>, vector<1x16x16xf32>
    %40 = vector.shape_cast %39 : vector<1x16x16xf32> to vector<16x16xf32>
    %41 = arith.mulf %35, %40 : vector<16x16xf32>
    %42 = arith.addf %38, %41 : vector<16x16xf32>
    %43 = vector.extract_strided_slice %25 {offsets = [0, 0], sizes = [8, 16], strides = [1, 1]} : vector<16x16xf32> to vector<8x16xf32>
    %c0_24 = arith.constant 0 : index
    %c0_25 = arith.constant 0 : index
    %c0_26 = arith.constant 0 : index
    %44 = vector.load %arg12[%c0_24, %c0_25, %c0_26] : memref<15x8x16xf32, #tpu.memory_space<vmem>>, vector<1x8x16xf32>
    %45 = vector.shape_cast %44 : vector<1x8x16xf32> to vector<8x16xf32>
    %46 = vector.shape_cast %43 : vector<8x16xf32> to vector<1x8x16xf32>
    tpu.vector_store %arg12[%c0_24, %c0_25, %c0_26], %46 {strides = array<i32>} : memref<15x8x16xf32, #tpu.memory_space<vmem>>, vector<1x8x16xf32>,
    %47 = vector.extract_strided_slice %42 {offsets = [0, 0], sizes = [8, 16], strides = [1, 1]} : vector<16x16xf32> to vector<8x16xf32>
    %c0_27 = arith.constant 0 : index
    %c0_28 = arith.constant 0 : index
    %c0_29 = arith.constant 0 : index
    %48 = vector.load %arg13[%c0_27, %c0_28, %c0_29] : memref<15x8x16xf32, #tpu.memory_space<vmem>>, vector<1x8x16xf32>
    %49 = vector.shape_cast %48 : vector<1x8x16xf32> to vector<8x16xf32>
    %50 = vector.shape_cast %47 : vector<8x16xf32> to vector<1x8x16xf32>
    tpu.vector_store %arg13[%c0_27, %c0_28, %c0_29], %50 {strides = array<i32>} : memref<15x8x16xf32, #tpu.memory_space<vmem>>, vector<1x8x16xf32>,
    %51 = arith.addf %5, %25 : vector<16x16xf32>
    %52 = arith.mulf %25, %25 : vector<16x16xf32>
    %53 = arith.addf %6, %52 : vector<16x16xf32>
    %54 = arith.addf %7, %42 : vector<16x16xf32>
    %55 = arith.mulf %42, %42 : vector<16x16xf32>
    %56 = arith.addf %8, %55 : vector<16x16xf32>
    %57 = arith.mulf %42, %42 : vector<16x16xf32>
    %58 = tpu.concatenate %42, %57 in 1 : vector<16x16xf32>, vector<16x16xf32> -> vector<16x32xf32>
    %cst_30 = arith.constant dense<0.000000e+00> : vector<16x32xf32>
    %59 = tpu.matmul %58, %0, %cst_30 {dimension_numbers = #tpu.dot_dimension_numbers<[1], [0], [0], [1], [0, 0, 1, 1], [], []>} : vector<16x32xf32>, vector<32x32xf32>, vector<16x32xf32> -> vector<16x32xf32>
    %60 = arith.addf %2, %59 : vector<16x32xf32>
    %61 = vector.extract_strided_slice %60 {offsets = [0, 16], sizes = [16, 16], strides = [1, 1]} : vector<16x32xf32> to vector<16x16xf32>
    %cst_31 = arith.constant -9.99999997E-7 : f32
    %62 = vector.broadcast %cst_31 : f32 to vector<16x16xf32>
    %63 = arith.minimumf %61, %62 : vector<16x16xf32>
    %cst_32 = arith.constant -2.000000e+00 : f32
    %64 = vector.broadcast %cst_32 : f32 to vector<16x16xf32>
    %65 = arith.mulf %64, %63 : vector<16x16xf32>
    %66 = math.rsqrt %65 : vector<16x16xf32>
    %67 = arith.mulf %66, %66 : vector<16x16xf32>
    %68 = vector.extract_strided_slice %60 {offsets = [0, 0], sizes = [16, 16], strides = [1, 1]} : vector<16x32xf32> to vector<16x16xf32>
    %69 = arith.mulf %68, %67 : vector<16x16xf32>
    %c1 = arith.constant 1 : index
    %c0_33 = arith.constant 0 : index
    %c0_34 = arith.constant 0 : index
    %70 = vector.load %arg6[%c1, %c0_33, %c0_34] : memref<15x16x16xf32, #tpu.memory_space<vmem>>, vector<1x16x16xf32>
    %71 = vector.shape_cast %70 : vector<1x16x16xf32> to vector<16x16xf32>
    %72 = arith.mulf %66, %71 : vector<16x16xf32>
    %73 = arith.addf %69, %72 : vector<16x16xf32>
    %74 = arith.mulf %73, %73 : vector<16x16xf32>
    %75 = tpu.concatenate %73, %74 in 1 : vector<16x16xf32>, vector<16x16xf32> -> vector<16x32xf32>
    %cst_35 = arith.constant dense<0.000000e+00> : vector<16x32xf32>
    %76 = tpu.matmul %75, %1, %cst_35 {dimension_numbers = #tpu.dot_dimension_numbers<[1], [0], [0], [1], [0, 0, 1, 1], [], []>} : vector<16x32xf32>, vector<32x32xf32>, vector<16x32xf32> -> vector<16x32xf32>
    %77 = arith.addf %3, %76 : vector<16x32xf32>
    %78 = vector.extract_strided_slice %77 {offsets = [0, 16], sizes = [16, 16], strides = [1, 1]} : vector<16x32xf32> to vector<16x16xf32>
    %cst_36 = arith.constant -9.99999997E-7 : f32
    %79 = vector.broadcast %cst_36 : f32 to vector<16x16xf32>
    %80 = arith.minimumf %78, %79 : vector<16x16xf32>
    %cst_37 = arith.constant -2.000000e+00 : f32
    %81 = vector.broadcast %cst_37 : f32 to vector<16x16xf32>
    %82 = arith.mulf %81, %80 : vector<16x16xf32>
    %83 = math.rsqrt %82 : vector<16x16xf32>
    %84 = arith.mulf %83, %83 : vector<16x16xf32>
    %85 = vector.extract_strided_slice %77 {offsets = [0, 0], sizes = [16, 16], strides = [1, 1]} : vector<16x32xf32> to vector<16x16xf32>
    %86 = arith.mulf %85, %84 : vector<16x16xf32>
    %c1_38 = arith.constant 1 : index
    %c0_39 = arith.constant 0 : index
    %c0_40 = arith.constant 0 : index
    %87 = vector.load %arg7[%c1_38, %c0_39, %c0_40] : memref<15x16x16xf32, #tpu.memory_space<vmem>>, vector<1x16x16xf32>
    %88 = vector.shape_cast %87 : vector<1x16x16xf32> to vector<16x16xf32>
    %89 = arith.mulf %83, %88 : vector<16x16xf32>
    %90 = arith.addf %86, %89 : vector<16x16xf32>
    %91 = vector.extract_strided_slice %73 {offsets = [0, 0], sizes = [8, 16], strides = [1, 1]} : vector<16x16xf32> to vector<8x16xf32>
    %c1_41 = arith.constant 1 : index
    %c0_42 = arith.constant 0 : index
    %c0_43 = arith.constant 0 : index
    %92 = vector.load %arg12[%c1_41, %c0_42, %c0_43] : memref<15x8x16xf32, #tpu.memory_space<vmem>>, vector<1x8x16xf32>
    %93 = vector.shape_cast %92 : vector<1x8x16xf32> to vector<8x16xf32>
    %94 = vector.shape_cast %91 : vector<8x16xf32> to vector<1x8x16xf32>
    tpu.vector_store %arg12[%c1_41, %c0_42, %c0_43], %94 {strides = array<i32>} : memref<15x8x16xf32, #tpu.memory_space<vmem>>, vector<1x8x16xf32>,
    %95 = vector.extract_strided_slice %90 {offsets = [0, 0], sizes = [8, 16], strides = [1, 1]} : vector<16x16xf32> to vector<8x16xf32>
    %c1_44 = arith.constant 1 : index
    %c0_45 = arith.constant 0 : index
    %c0_46 = arith.constant 0 : index
    %96 = vector.load %arg13[%c1_44, %c0_45, %c0_46] : memref<15x8x16xf32, #tpu.memory_space<vmem>>, vector<1x8x16xf32>
    %97 = vector.shape_cast %96 : vector<1x8x16xf32> to vector<8x16xf32>
    %98 = vector.shape_cast %95 : vector<8x16xf32> to vector<1x8x16xf32>
    tpu.vector_store %arg13[%c1_44, %c0_45, %c0_46], %98 {strides = array<i32>} : memref<15x8x16xf32, #tpu.memory_space<vmem>>, vector<1x8x16xf32>,
    %99 = arith.addf %51, %73 : vector<16x16xf32>
    %100 = arith.mulf %73, %73 : vector<16x16xf32>
    %101 = arith.addf %53, %100 : vector<16x16xf32>
    %102 = arith.addf %54, %90 : vector<16x16xf32>
    %103 = arith.mulf %90, %90 : vector<16x16xf32>
    %104 = arith.addf %56, %103 : vector<16x16xf32>
    %105 = arith.mulf %90, %90 : vector<16x16xf32>
    %106 = tpu.concatenate %90, %105 in 1 : vector<16x16xf32>, vector<16x16xf32> -> vector<16x32xf32>
    %cst_47 = arith.constant dense<0.000000e+00> : vector<16x32xf32>
    %107 = tpu.matmul %106, %0, %cst_47 {dimension_numbers = #tpu.dot_dimension_numbers<[1], [0], [0], [1], [0, 0, 1, 1], [], []>} : vector<16x32xf32>, vector<32x32xf32>, vector<16x32xf32> -> vector<16x32xf32>
    %108 = arith.addf %2, %107 : vector<16x32xf32>
    %109 = vector.extract_strided_slice %108 {offsets = [0, 16], sizes = [16, 16], strides = [1, 1]} : vector<16x32xf32> to vector<16x16xf32>
    %cst_48 = arith.constant -9.99999997E-7 : f32
    %110 = vector.broadcast %cst_48 : f32 to vector<16x16xf32>
    %111 = arith.minimumf %109, %110 : vector<16x16xf32>
    %cst_49 = arith.constant -2.000000e+00 : f32
    %112 = vector.broadcast %cst_49 : f32 to vector<16x16xf32>
    %113 = arith.mulf %112, %111 : vector<16x16xf32>
    %114 = math.rsqrt %113 : vector<16x16xf32>
    %115 = arith.mulf %114, %114 : vector<16x16xf32>
    %116 = vector.extract_strided_slice %108 {offsets = [0, 0], sizes = [16, 16], strides = [1, 1]} : vector<16x32xf32> to vector<16x16xf32>
    %117 = arith.mulf %116, %115 : vector<16x16xf32>
    %c2 = arith.constant 2 : index
    %c0_50 = arith.constant 0 : index
    %c0_51 = arith.constant 0 : index
    %118 = vector.load %arg6[%c2, %c0_50, %c0_51] : memref<15x16x16xf32, #tpu.memory_space<vmem>>, vector<1x16x16xf32>
    %119 = vector.shape_cast %118 : vector<1x16x16xf32> to vector<16x16xf32>
    %120 = arith.mulf %114, %119 : vector<16x16xf32>
    %121 = arith.addf %117, %120 : vector<16x16xf32>
    %122 = arith.mulf %121, %121 : vector<16x16xf32>
    %123 = tpu.concatenate %121, %122 in 1 : vector<16x16xf32>, vector<16x16xf32> -> vector<16x32xf32>
    %cst_52 = arith.constant dense<0.000000e+00> : vector<16x32xf32>
    %124 = tpu.matmul %123, %1, %cst_52 {dimension_numbers = #tpu.dot_dimension_numbers<[1], [0], [0], [1], [0, 0, 1, 1], [], []>} : vector<16x32xf32>, vector<32x32xf32>, vector<16x32xf32> -> vector<16x32xf32>
    %125 = arith.addf %3, %124 : vector<16x32xf32>
    %126 = vector.extract_strided_slice %125 {offsets = [0, 16], sizes = [16, 16], strides = [1, 1]} : vector<16x32xf32> to vector<16x16xf32>
    %cst_53 = arith.constant -9.99999997E-7 : f32
    %127 = vector.broadcast %cst_53 : f32 to vector<16x16xf32>
    %128 = arith.minimumf %126, %127 : vector<16x16xf32>
    %cst_54 = arith.constant -2.000000e+00 : f32
    %129 = vector.broadcast %cst_54 : f32 to vector<16x16xf32>
    %130 = arith.mulf %129, %128 : vector<16x16xf32>
    %131 = math.rsqrt %130 : vector<16x16xf32>
    %132 = arith.mulf %131, %131 : vector<16x16xf32>
    %133 = vector.extract_strided_slice %125 {offsets = [0, 0], sizes = [16, 16], strides = [1, 1]} : vector<16x32xf32> to vector<16x16xf32>
    %134 = arith.mulf %133, %132 : vector<16x16xf32>
    %c2_55 = arith.constant 2 : index
    %c0_56 = arith.constant 0 : index
    %c0_57 = arith.constant 0 : index
    %135 = vector.load %arg7[%c2_55, %c0_56, %c0_57] : memref<15x16x16xf32, #tpu.memory_space<vmem>>, vector<1x16x16xf32>
    %136 = vector.shape_cast %135 : vector<1x16x16xf32> to vector<16x16xf32>
    %137 = arith.mulf %131, %136 : vector<16x16xf32>
    %138 = arith.addf %134, %137 : vector<16x16xf32>
    %139 = vector.extract_strided_slice %121 {offsets = [0, 0], sizes = [8, 16], strides = [1, 1]} : vector<16x16xf32> to vector<8x16xf32>
    %c2_58 = arith.constant 2 : index
    %c0_59 = arith.constant 0 : index
    %c0_60 = arith.constant 0 : index
    %140 = vector.load %arg12[%c2_58, %c0_59, %c0_60] : memref<15x8x16xf32, #tpu.memory_space<vmem>>, vector<1x8x16xf32>
    %141 = vector.shape_cast %140 : vector<1x8x16xf32> to vector<8x16xf32>
    %142 = vector.shape_cast %139 : vector<8x16xf32> to vector<1x8x16xf32>
    tpu.vector_store %arg12[%c2_58, %c0_59, %c0_60], %142 {strides = array<i32>} : memref<15x8x16xf32, #tpu.memory_space<vmem>>, vector<1x8x16xf32>,
    %143 = vector.extract_strided_slice %138 {offsets = [0, 0], sizes = [8, 16], strides = [1, 1]} : vector<16x16xf32> to vector<8x16xf32>
    %c2_61 = arith.constant 2 : index
    %c0_62 = arith.constant 0 : index
    %c0_63 = arith.constant 0 : index
    %144 = vector.load %arg13[%c2_61, %c0_62, %c0_63] : memref<15x8x16xf32, #tpu.memory_space<vmem>>, vector<1x8x16xf32>
    %145 = vector.shape_cast %144 : vector<1x8x16xf32> to vector<8x16xf32>
    %146 = vector.shape_cast %143 : vector<8x16xf32> to vector<1x8x16xf32>
    tpu.vector_store %arg13[%c2_61, %c0_62, %c0_63], %146 {strides = array<i32>} : memref<15x8x16xf32, #tpu.memory_space<vmem>>, vector<1x8x16xf32>,
    %147 = arith.addf %99, %121 : vector<16x16xf32>
    %148 = arith.mulf %121, %121 : vector<16x16xf32>
    %149 = arith.addf %101, %148 : vector<16x16xf32>
    %150 = arith.addf %102, %138 : vector<16x16xf32>
    %151 = arith.mulf %138, %138 : vector<16x16xf32>
    %152 = arith.addf %104, %151 : vector<16x16xf32>
    %153 = arith.mulf %138, %138 : vector<16x16xf32>
    %154 = tpu.concatenate %138, %153 in 1 : vector<16x16xf32>, vector<16x16xf32> -> vector<16x32xf32>
    %cst_64 = arith.constant dense<0.000000e+00> : vector<16x32xf32>
    %155 = tpu.matmul %154, %0, %cst_64 {dimension_numbers = #tpu.dot_dimension_numbers<[1], [0], [0], [1], [0, 0, 1, 1], [], []>} : vector<16x32xf32>, vector<32x32xf32>, vector<16x32xf32> -> vector<16x32xf32>
    %156 = arith.addf %2, %155 : vector<16x32xf32>
    %157 = vector.extract_strided_slice %156 {offsets = [0, 16], sizes = [16, 16], strides = [1, 1]} : vector<16x32xf32> to vector<16x16xf32>
    %cst_65 = arith.constant -9.99999997E-7 : f32
    %158 = vector.broadcast %cst_65 : f32 to vector<16x16xf32>
    %159 = arith.minimumf %157, %158 : vector<16x16xf32>
    %cst_66 = arith.constant -2.000000e+00 : f32
    %160 = vector.broadcast %cst_66 : f32 to vector<16x16xf32>
    %161 = arith.mulf %160, %159 : vector<16x16xf32>
    %162 = math.rsqrt %161 : vector<16x16xf32>
    %163 = arith.mulf %162, %162 : vector<16x16xf32>
    %164 = vector.extract_strided_slice %156 {offsets = [0, 0], sizes = [16, 16], strides = [1, 1]} : vector<16x32xf32> to vector<16x16xf32>
    %165 = arith.mulf %164, %163 : vector<16x16xf32>
    %c3 = arith.constant 3 : index
    %c0_67 = arith.constant 0 : index
    %c0_68 = arith.constant 0 : index
    %166 = vector.load %arg6[%c3, %c0_67, %c0_68] : memref<15x16x16xf32, #tpu.memory_space<vmem>>, vector<1x16x16xf32>
    %167 = vector.shape_cast %166 : vector<1x16x16xf32> to vector<16x16xf32>
    %168 = arith.mulf %162, %167 : vector<16x16xf32>
    %169 = arith.addf %165, %168 : vector<16x16xf32>
    %170 = arith.mulf %169, %169 : vector<16x16xf32>
    %171 = tpu.concatenate %169, %170 in 1 : vector<16x16xf32>, vector<16x16xf32> -> vector<16x32xf32>
    %cst_69 = arith.constant dense<0.000000e+00> : vector<16x32xf32>
    %172 = tpu.matmul %171, %1, %cst_69 {dimension_numbers = #tpu.dot_dimension_numbers<[1], [0], [0], [1], [0, 0, 1, 1], [], []>} : vector<16x32xf32>, vector<32x32xf32>, vector<16x32xf32> -> vector<16x32xf32>
    %173 = arith.addf %3, %172 : vector<16x32xf32>
    %174 = vector.extract_strided_slice %173 {offsets = [0, 16], sizes = [16, 16], strides = [1, 1]} : vector<16x32xf32> to vector<16x16xf32>
    %cst_70 = arith.constant -9.99999997E-7 : f32
    %175 = vector.broadcast %cst_70 : f32 to vector<16x16xf32>
    %176 = arith.minimumf %174, %175 : vector<16x16xf32>
    %cst_71 = arith.constant -2.000000e+00 : f32
    %177 = vector.broadcast %cst_71 : f32 to vector<16x16xf32>
    %178 = arith.mulf %177, %176 : vector<16x16xf32>
    %179 = math.rsqrt %178 : vector<16x16xf32>
    %180 = arith.mulf %179, %179 : vector<16x16xf32>
    %181 = vector.extract_strided_slice %173 {offsets = [0, 0], sizes = [16, 16], strides = [1, 1]} : vector<16x32xf32> to vector<16x16xf32>
    %182 = arith.mulf %181, %180 : vector<16x16xf32>
    %c3_72 = arith.constant 3 : index
    %c0_73 = arith.constant 0 : index
    %c0_74 = arith.constant 0 : index
    %183 = vector.load %arg7[%c3_72, %c0_73, %c0_74] : memref<15x16x16xf32, #tpu.memory_space<vmem>>, vector<1x16x16xf32>
    %184 = vector.shape_cast %183 : vector<1x16x16xf32> to vector<16x16xf32>
    %185 = arith.mulf %179, %184 : vector<16x16xf32>
    %186 = arith.addf %182, %185 : vector<16x16xf32>
    %187 = vector.extract_strided_slice %169 {offsets = [0, 0], sizes = [8, 16], strides = [1, 1]} : vector<16x16xf32> to vector<8x16xf32>
    %c3_75 = arith.constant 3 : index
    %c0_76 = arith.constant 0 : index
    %c0_77 = arith.constant 0 : index
    %188 = vector.load %arg12[%c3_75, %c0_76, %c0_77] : memref<15x8x16xf32, #tpu.memory_space<vmem>>, vector<1x8x16xf32>
    %189 = vector.shape_cast %188 : vector<1x8x16xf32> to vector<8x16xf32>
    %190 = vector.shape_cast %187 : vector<8x16xf32> to vector<1x8x16xf32>
    tpu.vector_store %arg12[%c3_75, %c0_76, %c0_77], %190 {strides = array<i32>} : memref<15x8x16xf32, #tpu.memory_space<vmem>>, vector<1x8x16xf32>,
    %191 = vector.extract_strided_slice %186 {offsets = [0, 0], sizes = [8, 16], strides = [1, 1]} : vector<16x16xf32> to vector<8x16xf32>
    %c3_78 = arith.constant 3 : index
    %c0_79 = arith.constant 0 : index
    %c0_80 = arith.constant 0 : index
    %192 = vector.load %arg13[%c3_78, %c0_79, %c0_80] : memref<15x8x16xf32, #tpu.memory_space<vmem>>, vector<1x8x16xf32>
    %193 = vector.shape_cast %192 : vector<1x8x16xf32> to vector<8x16xf32>
    %194 = vector.shape_cast %191 : vector<8x16xf32> to vector<1x8x16xf32>
    tpu.vector_store %arg13[%c3_78, %c0_79, %c0_80], %194 {strides = array<i32>} : memref<15x8x16xf32, #tpu.memory_space<vmem>>, vector<1x8x16xf32>,
    %195 = arith.addf %147, %169 : vector<16x16xf32>
    %196 = arith.mulf %169, %169 : vector<16x16xf32>
    %197 = arith.addf %149, %196 : vector<16x16xf32>
    %198 = arith.addf %150, %186 : vector<16x16xf32>
    %199 = arith.mulf %186, %186 : vector<16x16xf32>
    %200 = arith.addf %152, %199 : vector<16x16xf32>
    %201 = arith.mulf %186, %186 : vector<16x16xf32>
    %202 = tpu.concatenate %186, %201 in 1 : vector<16x16xf32>, vector<16x16xf32> -> vector<16x32xf32>
    %cst_81 = arith.constant dense<0.000000e+00> : vector<16x32xf32>
    %203 = tpu.matmul %202, %0, %cst_81 {dimension_numbers = #tpu.dot_dimension_numbers<[1], [0], [0], [1], [0, 0, 1, 1], [], []>} : vector<16x32xf32>, vector<32x32xf32>, vector<16x32xf32> -> vector<16x32xf32>
    %204 = arith.addf %2, %203 : vector<16x32xf32>
    %205 = vector.extract_strided_slice %204 {offsets = [0, 16], sizes = [16, 16], strides = [1, 1]} : vector<16x32xf32> to vector<16x16xf32>
    %cst_82 = arith.constant -9.99999997E-7 : f32
    %206 = vector.broadcast %cst_82 : f32 to vector<16x16xf32>
    %207 = arith.minimumf %205, %206 : vector<16x16xf32>
    %cst_83 = arith.constant -2.000000e+00 : f32
    %208 = vector.broadcast %cst_83 : f32 to vector<16x16xf32>
    %209 = arith.mulf %208, %207 : vector<16x16xf32>
    %210 = math.rsqrt %209 : vector<16x16xf32>
    %211 = arith.mulf %210, %210 : vector<16x16xf32>
    %212 = vector.extract_strided_slice %204 {offsets = [0, 0], sizes = [16, 16], strides = [1, 1]} : vector<16x32xf32> to vector<16x16xf32>
    %213 = arith.mulf %212, %211 : vector<16x16xf32>
    %c4 = arith.constant 4 : index
    %c0_84 = arith.constant 0 : index
    %c0_85 = arith.constant 0 : index
    %214 = vector.load %arg6[%c4, %c0_84, %c0_85] : memref<15x16x16xf32, #tpu.memory_space<vmem>>, vector<1x16x16xf32>
    %215 = vector.shape_cast %214 : vector<1x16x16xf32> to vector<16x16xf32>
    %216 = arith.mulf %210, %215 : vector<16x16xf32>
    %217 = arith.addf %213, %216 : vector<16x16xf32>
    %218 = arith.mulf %217, %217 : vector<16x16xf32>
    %219 = tpu.concatenate %217, %218 in 1 : vector<16x16xf32>, vector<16x16xf32> -> vector<16x32xf32>
    %cst_86 = arith.constant dense<0.000000e+00> : vector<16x32xf32>
    %220 = tpu.matmul %219, %1, %cst_86 {dimension_numbers = #tpu.dot_dimension_numbers<[1], [0], [0], [1], [0, 0, 1, 1], [], []>} : vector<16x32xf32>, vector<32x32xf32>, vector<16x32xf32> -> vector<16x32xf32>
    %221 = arith.addf %3, %220 : vector<16x32xf32>
    %222 = vector.extract_strided_slice %221 {offsets = [0, 16], sizes = [16, 16], strides = [1, 1]} : vector<16x32xf32> to vector<16x16xf32>
    %cst_87 = arith.constant -9.99999997E-7 : f32
    %223 = vector.broadcast %cst_87 : f32 to vector<16x16xf32>
    %224 = arith.minimumf %222, %223 : vector<16x16xf32>
    %cst_88 = arith.constant -2.000000e+00 : f32
    %225 = vector.broadcast %cst_88 : f32 to vector<16x16xf32>
    %226 = arith.mulf %225, %224 : vector<16x16xf32>
    %227 = math.rsqrt %226 : vector<16x16xf32>
    %228 = arith.mulf %227, %227 : vector<16x16xf32>
    %229 = vector.extract_strided_slice %221 {offsets = [0, 0], sizes = [16, 16], strides = [1, 1]} : vector<16x32xf32> to vector<16x16xf32>
    %230 = arith.mulf %229, %228 : vector<16x16xf32>
    %c4_89 = arith.constant 4 : index
    %c0_90 = arith.constant 0 : index
    %c0_91 = arith.constant 0 : index
    %231 = vector.load %arg7[%c4_89, %c0_90, %c0_91] : memref<15x16x16xf32, #tpu.memory_space<vmem>>, vector<1x16x16xf32>
    %232 = vector.shape_cast %231 : vector<1x16x16xf32> to vector<16x16xf32>
    %233 = arith.mulf %227, %232 : vector<16x16xf32>
    %234 = arith.addf %230, %233 : vector<16x16xf32>
    %235 = vector.extract_strided_slice %217 {offsets = [0, 0], sizes = [8, 16], strides = [1, 1]} : vector<16x16xf32> to vector<8x16xf32>
    %c4_92 = arith.constant 4 : index
    %c0_93 = arith.constant 0 : index
    %c0_94 = arith.constant 0 : index
    %236 = vector.load %arg12[%c4_92, %c0_93, %c0_94] : memref<15x8x16xf32, #tpu.memory_space<vmem>>, vector<1x8x16xf32>
    %237 = vector.shape_cast %236 : vector<1x8x16xf32> to vector<8x16xf32>
    %238 = vector.shape_cast %235 : vector<8x16xf32> to vector<1x8x16xf32>
    tpu.vector_store %arg12[%c4_92, %c0_93, %c0_94], %238 {strides = array<i32>} : memref<15x8x16xf32, #tpu.memory_space<vmem>>, vector<1x8x16xf32>,
    %239 = vector.extract_strided_slice %234 {offsets = [0, 0], sizes = [8, 16], strides = [1, 1]} : vector<16x16xf32> to vector<8x16xf32>
    %c4_95 = arith.constant 4 : index
    %c0_96 = arith.constant 0 : index
    %c0_97 = arith.constant 0 : index
    %240 = vector.load %arg13[%c4_95, %c0_96, %c0_97] : memref<15x8x16xf32, #tpu.memory_space<vmem>>, vector<1x8x16xf32>
    %241 = vector.shape_cast %240 : vector<1x8x16xf32> to vector<8x16xf32>
    %242 = vector.shape_cast %239 : vector<8x16xf32> to vector<1x8x16xf32>
    tpu.vector_store %arg13[%c4_95, %c0_96, %c0_97], %242 {strides = array<i32>} : memref<15x8x16xf32, #tpu.memory_space<vmem>>, vector<1x8x16xf32>,
    %243 = arith.addf %195, %217 : vector<16x16xf32>
    %244 = arith.mulf %217, %217 : vector<16x16xf32>
    %245 = arith.addf %197, %244 : vector<16x16xf32>
    %246 = arith.addf %198, %234 : vector<16x16xf32>
    %247 = arith.mulf %234, %234 : vector<16x16xf32>
    %248 = arith.addf %200, %247 : vector<16x16xf32>
    %249 = arith.mulf %234, %234 : vector<16x16xf32>
    %250 = tpu.concatenate %234, %249 in 1 : vector<16x16xf32>, vector<16x16xf32> -> vector<16x32xf32>
    %cst_98 = arith.constant dense<0.000000e+00> : vector<16x32xf32>
    %251 = tpu.matmul %250, %0, %cst_98 {dimension_numbers = #tpu.dot_dimension_numbers<[1], [0], [0], [1], [0, 0, 1, 1], [], []>} : vector<16x32xf32>, vector<32x32xf32>, vector<16x32xf32> -> vector<16x32xf32>
    %252 = arith.addf %2, %251 : vector<16x32xf32>
    %253 = vector.extract_strided_slice %252 {offsets = [0, 16], sizes = [16, 16], strides = [1, 1]} : vector<16x32xf32> to vector<16x16xf32>
    %cst_99 = arith.constant -9.99999997E-7 : f32
    %254 = vector.broadcast %cst_99 : f32 to vector<16x16xf32>
    %255 = arith.minimumf %253, %254 : vector<16x16xf32>
    %cst_100 = arith.constant -2.000000e+00 : f32
    %256 = vector.broadcast %cst_100 : f32 to vector<16x16xf32>
    %257 = arith.mulf %256, %255 : vector<16x16xf32>
    %258 = math.rsqrt %257 : vector<16x16xf32>
    %259 = arith.mulf %258, %258 : vector<16x16xf32>
    %260 = vector.extract_strided_slice %252 {offsets = [0, 0], sizes = [16, 16], strides = [1, 1]} : vector<16x32xf32> to vector<16x16xf32>
    %261 = arith.mulf %260, %259 : vector<16x16xf32>
    %c5 = arith.constant 5 : index
    %c0_101 = arith.constant 0 : index
    %c0_102 = arith.constant 0 : index
    %262 = vector.load %arg6[%c5, %c0_101, %c0_102] : memref<15x16x16xf32, #tpu.memory_space<vmem>>, vector<1x16x16xf32>
    %263 = vector.shape_cast %262 : vector<1x16x16xf32> to vector<16x16xf32>
    %264 = arith.mulf %258, %263 : vector<16x16xf32>
    %265 = arith.addf %261, %264 : vector<16x16xf32>
    %266 = arith.mulf %265, %265 : vector<16x16xf32>
    %267 = tpu.concatenate %265, %266 in 1 : vector<16x16xf32>, vector<16x16xf32> -> vector<16x32xf32>
    %cst_103 = arith.constant dense<0.000000e+00> : vector<16x32xf32>
    %268 = tpu.matmul %267, %1, %cst_103 {dimension_numbers = #tpu.dot_dimension_numbers<[1], [0], [0], [1], [0, 0, 1, 1], [], []>} : vector<16x32xf32>, vector<32x32xf32>, vector<16x32xf32> -> vector<16x32xf32>
    %269 = arith.addf %3, %268 : vector<16x32xf32>
    %270 = vector.extract_strided_slice %269 {offsets = [0, 16], sizes = [16, 16], strides = [1, 1]} : vector<16x32xf32> to vector<16x16xf32>
    %cst_104 = arith.constant -9.99999997E-7 : f32
    %271 = vector.broadcast %cst_104 : f32 to vector<16x16xf32>
    %272 = arith.minimumf %270, %271 : vector<16x16xf32>
    %cst_105 = arith.constant -2.000000e+00 : f32
    %273 = vector.broadcast %cst_105 : f32 to vector<16x16xf32>
    %274 = arith.mulf %273, %272 : vector<16x16xf32>
    %275 = math.rsqrt %274 : vector<16x16xf32>
    %276 = arith.mulf %275, %275 : vector<16x16xf32>
    %277 = vector.extract_strided_slice %269 {offsets = [0, 0], sizes = [16, 16], strides = [1, 1]} : vector<16x32xf32> to vector<16x16xf32>
    %278 = arith.mulf %277, %276 : vector<16x16xf32>
    %c5_106 = arith.constant 5 : index
    %c0_107 = arith.constant 0 : index
    %c0_108 = arith.constant 0 : index
    %279 = vector.load %arg7[%c5_106, %c0_107, %c0_108] : memref<15x16x16xf32, #tpu.memory_space<vmem>>, vector<1x16x16xf32>
    %280 = vector.shape_cast %279 : vector<1x16x16xf32> to vector<16x16xf32>
    %281 = arith.mulf %275, %280 : vector<16x16xf32>
    %282 = arith.addf %278, %281 : vector<16x16xf32>
    %283 = vector.extract_strided_slice %265 {offsets = [0, 0], sizes = [8, 16], strides = [1, 1]} : vector<16x16xf32> to vector<8x16xf32>
    %c5_109 = arith.constant 5 : index
    %c0_110 = arith.constant 0 : index
    %c0_111 = arith.constant 0 : index
    %284 = vector.load %arg12[%c5_109, %c0_110, %c0_111] : memref<15x8x16xf32, #tpu.memory_space<vmem>>, vector<1x8x16xf32>
    %285 = vector.shape_cast %284 : vector<1x8x16xf32> to vector<8x16xf32>
    %286 = vector.shape_cast %283 : vector<8x16xf32> to vector<1x8x16xf32>
    tpu.vector_store %arg12[%c5_109, %c0_110, %c0_111], %286 {strides = array<i32>} : memref<15x8x16xf32, #tpu.memory_space<vmem>>, vector<1x8x16xf32>,
    %287 = vector.extract_strided_slice %282 {offsets = [0, 0], sizes = [8, 16], strides = [1, 1]} : vector<16x16xf32> to vector<8x16xf32>
    %c5_112 = arith.constant 5 : index
    %c0_113 = arith.constant 0 : index
    %c0_114 = arith.constant 0 : index
    %288 = vector.load %arg13[%c5_112, %c0_113, %c0_114] : memref<15x8x16xf32, #tpu.memory_space<vmem>>, vector<1x8x16xf32>
    %289 = vector.shape_cast %288 : vector<1x8x16xf32> to vector<8x16xf32>
    %290 = vector.shape_cast %287 : vector<8x16xf32> to vector<1x8x16xf32>
    tpu.vector_store %arg13[%c5_112, %c0_113, %c0_114], %290 {strides = array<i32>} : memref<15x8x16xf32, #tpu.memory_space<vmem>>, vector<1x8x16xf32>,
    %291 = arith.addf %243, %265 : vector<16x16xf32>
    %292 = arith.mulf %265, %265 : vector<16x16xf32>
    %293 = arith.addf %245, %292 : vector<16x16xf32>
    %294 = arith.addf %246, %282 : vector<16x16xf32>
    %295 = arith.mulf %282, %282 : vector<16x16xf32>
    %296 = arith.addf %248, %295 : vector<16x16xf32>
    %297 = arith.mulf %282, %282 : vector<16x16xf32>
    %298 = tpu.concatenate %282, %297 in 1 : vector<16x16xf32>, vector<16x16xf32> -> vector<16x32xf32>
    %cst_115 = arith.constant dense<0.000000e+00> : vector<16x32xf32>
    %299 = tpu.matmul %298, %0, %cst_115 {dimension_numbers = #tpu.dot_dimension_numbers<[1], [0], [0], [1], [0, 0, 1, 1], [], []>} : vector<16x32xf32>, vector<32x32xf32>, vector<16x32xf32> -> vector<16x32xf32>
    %300 = arith.addf %2, %299 : vector<16x32xf32>
    %301 = vector.extract_strided_slice %300 {offsets = [0, 16], sizes = [16, 16], strides = [1, 1]} : vector<16x32xf32> to vector<16x16xf32>
    %cst_116 = arith.constant -9.99999997E-7 : f32
    %302 = vector.broadcast %cst_116 : f32 to vector<16x16xf32>
    %303 = arith.minimumf %301, %302 : vector<16x16xf32>
    %cst_117 = arith.constant -2.000000e+00 : f32
    %304 = vector.broadcast %cst_117 : f32 to vector<16x16xf32>
    %305 = arith.mulf %304, %303 : vector<16x16xf32>
    %306 = math.rsqrt %305 : vector<16x16xf32>
    %307 = arith.mulf %306, %306 : vector<16x16xf32>
    %308 = vector.extract_strided_slice %300 {offsets = [0, 0], sizes = [16, 16], strides = [1, 1]} : vector<16x32xf32> to vector<16x16xf32>
    %309 = arith.mulf %308, %307 : vector<16x16xf32>
    %c6 = arith.constant 6 : index
    %c0_118 = arith.constant 0 : index
    %c0_119 = arith.constant 0 : index
    %310 = vector.load %arg6[%c6, %c0_118, %c0_119] : memref<15x16x16xf32, #tpu.memory_space<vmem>>, vector<1x16x16xf32>
    %311 = vector.shape_cast %310 : vector<1x16x16xf32> to vector<16x16xf32>
    %312 = arith.mulf %306, %311 : vector<16x16xf32>
    %313 = arith.addf %309, %312 : vector<16x16xf32>
    %314 = arith.mulf %313, %313 : vector<16x16xf32>
    %315 = tpu.concatenate %313, %314 in 1 : vector<16x16xf32>, vector<16x16xf32> -> vector<16x32xf32>
    %cst_120 = arith.constant dense<0.000000e+00> : vector<16x32xf32>
    %316 = tpu.matmul %315, %1, %cst_120 {dimension_numbers = #tpu.dot_dimension_numbers<[1], [0], [0], [1], [0, 0, 1, 1], [], []>} : vector<16x32xf32>, vector<32x32xf32>, vector<16x32xf32> -> vector<16x32xf32>
    %317 = arith.addf %3, %316 : vector<16x32xf32>
    %318 = vector.extract_strided_slice %317 {offsets = [0, 16], sizes = [16, 16], strides = [1, 1]} : vector<16x32xf32> to vector<16x16xf32>
    %cst_121 = arith.constant -9.99999997E-7 : f32
    %319 = vector.broadcast %cst_121 : f32 to vector<16x16xf32>
    %320 = arith.minimumf %318, %319 : vector<16x16xf32>
    %cst_122 = arith.constant -2.000000e+00 : f32
    %321 = vector.broadcast %cst_122 : f32 to vector<16x16xf32>
    %322 = arith.mulf %321, %320 : vector<16x16xf32>
    %323 = math.rsqrt %322 : vector<16x16xf32>
    %324 = arith.mulf %323, %323 : vector<16x16xf32>
    %325 = vector.extract_strided_slice %317 {offsets = [0, 0], sizes = [16, 16], strides = [1, 1]} : vector<16x32xf32> to vector<16x16xf32>
    %326 = arith.mulf %325, %324 : vector<16x16xf32>
    %c6_123 = arith.constant 6 : index
    %c0_124 = arith.constant 0 : index
    %c0_125 = arith.constant 0 : index
    %327 = vector.load %arg7[%c6_123, %c0_124, %c0_125] : memref<15x16x16xf32, #tpu.memory_space<vmem>>, vector<1x16x16xf32>
    %328 = vector.shape_cast %327 : vector<1x16x16xf32> to vector<16x16xf32>
    %329 = arith.mulf %323, %328 : vector<16x16xf32>
    %330 = arith.addf %326, %329 : vector<16x16xf32>
    %331 = vector.extract_strided_slice %313 {offsets = [0, 0], sizes = [8, 16], strides = [1, 1]} : vector<16x16xf32> to vector<8x16xf32>
    %c6_126 = arith.constant 6 : index
    %c0_127 = arith.constant 0 : index
    %c0_128 = arith.constant 0 : index
    %332 = vector.load %arg12[%c6_126, %c0_127, %c0_128] : memref<15x8x16xf32, #tpu.memory_space<vmem>>, vector<1x8x16xf32>
    %333 = vector.shape_cast %332 : vector<1x8x16xf32> to vector<8x16xf32>
    %334 = vector.shape_cast %331 : vector<8x16xf32> to vector<1x8x16xf32>
    tpu.vector_store %arg12[%c6_126, %c0_127, %c0_128], %334 {strides = array<i32>} : memref<15x8x16xf32, #tpu.memory_space<vmem>>, vector<1x8x16xf32>,
    %335 = vector.extract_strided_slice %330 {offsets = [0, 0], sizes = [8, 16], strides = [1, 1]} : vector<16x16xf32> to vector<8x16xf32>
    %c6_129 = arith.constant 6 : index
    %c0_130 = arith.constant 0 : index
    %c0_131 = arith.constant 0 : index
    %336 = vector.load %arg13[%c6_129, %c0_130, %c0_131] : memref<15x8x16xf32, #tpu.memory_space<vmem>>, vector<1x8x16xf32>
    %337 = vector.shape_cast %336 : vector<1x8x16xf32> to vector<8x16xf32>
    %338 = vector.shape_cast %335 : vector<8x16xf32> to vector<1x8x16xf32>
    tpu.vector_store %arg13[%c6_129, %c0_130, %c0_131], %338 {strides = array<i32>} : memref<15x8x16xf32, #tpu.memory_space<vmem>>, vector<1x8x16xf32>,
    %339 = arith.addf %291, %313 : vector<16x16xf32>
    %340 = arith.mulf %313, %313 : vector<16x16xf32>
    %341 = arith.addf %293, %340 : vector<16x16xf32>
    %342 = arith.addf %294, %330 : vector<16x16xf32>
    %343 = arith.mulf %330, %330 : vector<16x16xf32>
    %344 = arith.addf %296, %343 : vector<16x16xf32>
    %345 = arith.mulf %330, %330 : vector<16x16xf32>
    %346 = tpu.concatenate %330, %345 in 1 : vector<16x16xf32>, vector<16x16xf32> -> vector<16x32xf32>
    %cst_132 = arith.constant dense<0.000000e+00> : vector<16x32xf32>
    %347 = tpu.matmul %346, %0, %cst_132 {dimension_numbers = #tpu.dot_dimension_numbers<[1], [0], [0], [1], [0, 0, 1, 1], [], []>} : vector<16x32xf32>, vector<32x32xf32>, vector<16x32xf32> -> vector<16x32xf32>
    %348 = arith.addf %2, %347 : vector<16x32xf32>
    %349 = vector.extract_strided_slice %348 {offsets = [0, 16], sizes = [16, 16], strides = [1, 1]} : vector<16x32xf32> to vector<16x16xf32>
    %cst_133 = arith.constant -9.99999997E-7 : f32
    %350 = vector.broadcast %cst_133 : f32 to vector<16x16xf32>
    %351 = arith.minimumf %349, %350 : vector<16x16xf32>
    %cst_134 = arith.constant -2.000000e+00 : f32
    %352 = vector.broadcast %cst_134 : f32 to vector<16x16xf32>
    %353 = arith.mulf %352, %351 : vector<16x16xf32>
    %354 = math.rsqrt %353 : vector<16x16xf32>
    %355 = arith.mulf %354, %354 : vector<16x16xf32>
    %356 = vector.extract_strided_slice %348 {offsets = [0, 0], sizes = [16, 16], strides = [1, 1]} : vector<16x32xf32> to vector<16x16xf32>
    %357 = arith.mulf %356, %355 : vector<16x16xf32>
    %c7 = arith.constant 7 : index
    %c0_135 = arith.constant 0 : index
    %c0_136 = arith.constant 0 : index
    %358 = vector.load %arg6[%c7, %c0_135, %c0_136] : memref<15x16x16xf32, #tpu.memory_space<vmem>>, vector<1x16x16xf32>
    %359 = vector.shape_cast %358 : vector<1x16x16xf32> to vector<16x16xf32>
    %360 = arith.mulf %354, %359 : vector<16x16xf32>
    %361 = arith.addf %357, %360 : vector<16x16xf32>
    %362 = arith.mulf %361, %361 : vector<16x16xf32>
    %363 = tpu.concatenate %361, %362 in 1 : vector<16x16xf32>, vector<16x16xf32> -> vector<16x32xf32>
    %cst_137 = arith.constant dense<0.000000e+00> : vector<16x32xf32>
    %364 = tpu.matmul %363, %1, %cst_137 {dimension_numbers = #tpu.dot_dimension_numbers<[1], [0], [0], [1], [0, 0, 1, 1], [], []>} : vector<16x32xf32>, vector<32x32xf32>, vector<16x32xf32> -> vector<16x32xf32>
    %365 = arith.addf %3, %364 : vector<16x32xf32>
    %366 = vector.extract_strided_slice %365 {offsets = [0, 16], sizes = [16, 16], strides = [1, 1]} : vector<16x32xf32> to vector<16x16xf32>
    %cst_138 = arith.constant -9.99999997E-7 : f32
    %367 = vector.broadcast %cst_138 : f32 to vector<16x16xf32>
    %368 = arith.minimumf %366, %367 : vector<16x16xf32>
    %cst_139 = arith.constant -2.000000e+00 : f32
    %369 = vector.broadcast %cst_139 : f32 to vector<16x16xf32>
    %370 = arith.mulf %369, %368 : vector<16x16xf32>
    %371 = math.rsqrt %370 : vector<16x16xf32>
    %372 = arith.mulf %371, %371 : vector<16x16xf32>
    %373 = vector.extract_strided_slice %365 {offsets = [0, 0], sizes = [16, 16], strides = [1, 1]} : vector<16x32xf32> to vector<16x16xf32>
    %374 = arith.mulf %373, %372 : vector<16x16xf32>
    %c7_140 = arith.constant 7 : index
    %c0_141 = arith.constant 0 : index
    %c0_142 = arith.constant 0 : index
    %375 = vector.load %arg7[%c7_140, %c0_141, %c0_142] : memref<15x16x16xf32, #tpu.memory_space<vmem>>, vector<1x16x16xf32>
    %376 = vector.shape_cast %375 : vector<1x16x16xf32> to vector<16x16xf32>
    %377 = arith.mulf %371, %376 : vector<16x16xf32>
    %378 = arith.addf %374, %377 : vector<16x16xf32>
    %379 = vector.extract_strided_slice %361 {offsets = [0, 0], sizes = [8, 16], strides = [1, 1]} : vector<16x16xf32> to vector<8x16xf32>
    %c7_143 = arith.constant 7 : index
    %c0_144 = arith.constant 0 : index
    %c0_145 = arith.constant 0 : index
    %380 = vector.load %arg12[%c7_143, %c0_144, %c0_145] : memref<15x8x16xf32, #tpu.memory_space<vmem>>, vector<1x8x16xf32>
    %381 = vector.shape_cast %380 : vector<1x8x16xf32> to vector<8x16xf32>
    %382 = vector.shape_cast %379 : vector<8x16xf32> to vector<1x8x16xf32>
    tpu.vector_store %arg12[%c7_143, %c0_144, %c0_145], %382 {strides = array<i32>} : memref<15x8x16xf32, #tpu.memory_space<vmem>>, vector<1x8x16xf32>,
    %383 = vector.extract_strided_slice %378 {offsets = [0, 0], sizes = [8, 16], strides = [1, 1]} : vector<16x16xf32> to vector<8x16xf32>
    %c7_146 = arith.constant 7 : index
    %c0_147 = arith.constant 0 : index
    %c0_148 = arith.constant 0 : index
    %384 = vector.load %arg13[%c7_146, %c0_147, %c0_148] : memref<15x8x16xf32, #tpu.memory_space<vmem>>, vector<1x8x16xf32>
    %385 = vector.shape_cast %384 : vector<1x8x16xf32> to vector<8x16xf32>
    %386 = vector.shape_cast %383 : vector<8x16xf32> to vector<1x8x16xf32>
    tpu.vector_store %arg13[%c7_146, %c0_147, %c0_148], %386 {strides = array<i32>} : memref<15x8x16xf32, #tpu.memory_space<vmem>>, vector<1x8x16xf32>,
    %387 = arith.addf %339, %361 : vector<16x16xf32>
    %388 = arith.mulf %361, %361 : vector<16x16xf32>
    %389 = arith.addf %341, %388 : vector<16x16xf32>
    %390 = arith.addf %342, %378 : vector<16x16xf32>
    %391 = arith.mulf %378, %378 : vector<16x16xf32>
    %392 = arith.addf %344, %391 : vector<16x16xf32>
    %393 = arith.mulf %378, %378 : vector<16x16xf32>
    %394 = tpu.concatenate %378, %393 in 1 : vector<16x16xf32>, vector<16x16xf32> -> vector<16x32xf32>
    %cst_149 = arith.constant dense<0.000000e+00> : vector<16x32xf32>
    %395 = tpu.matmul %394, %0, %cst_149 {dimension_numbers = #tpu.dot_dimension_numbers<[1], [0], [0], [1], [0, 0, 1, 1], [], []>} : vector<16x32xf32>, vector<32x32xf32>, vector<16x32xf32> -> vector<16x32xf32>
    %396 = arith.addf %2, %395 : vector<16x32xf32>
    %397 = vector.extract_strided_slice %396 {offsets = [0, 16], sizes = [16, 16], strides = [1, 1]} : vector<16x32xf32> to vector<16x16xf32>
    %cst_150 = arith.constant -9.99999997E-7 : f32
    %398 = vector.broadcast %cst_150 : f32 to vector<16x16xf32>
    %399 = arith.minimumf %397, %398 : vector<16x16xf32>
    %cst_151 = arith.constant -2.000000e+00 : f32
    %400 = vector.broadcast %cst_151 : f32 to vector<16x16xf32>
    %401 = arith.mulf %400, %399 : vector<16x16xf32>
    %402 = math.rsqrt %401 : vector<16x16xf32>
    %403 = arith.mulf %402, %402 : vector<16x16xf32>
    %404 = vector.extract_strided_slice %396 {offsets = [0, 0], sizes = [16, 16], strides = [1, 1]} : vector<16x32xf32> to vector<16x16xf32>
    %405 = arith.mulf %404, %403 : vector<16x16xf32>
    %c8 = arith.constant 8 : index
    %c0_152 = arith.constant 0 : index
    %c0_153 = arith.constant 0 : index
    %406 = vector.load %arg6[%c8, %c0_152, %c0_153] : memref<15x16x16xf32, #tpu.memory_space<vmem>>, vector<1x16x16xf32>
    %407 = vector.shape_cast %406 : vector<1x16x16xf32> to vector<16x16xf32>
    %408 = arith.mulf %402, %407 : vector<16x16xf32>
    %409 = arith.addf %405, %408 : vector<16x16xf32>
    %410 = arith.mulf %409, %409 : vector<16x16xf32>
    %411 = tpu.concatenate %409, %410 in 1 : vector<16x16xf32>, vector<16x16xf32> -> vector<16x32xf32>
    %cst_154 = arith.constant dense<0.000000e+00> : vector<16x32xf32>
    %412 = tpu.matmul %411, %1, %cst_154 {dimension_numbers = #tpu.dot_dimension_numbers<[1], [0], [0], [1], [0, 0, 1, 1], [], []>} : vector<16x32xf32>, vector<32x32xf32>, vector<16x32xf32> -> vector<16x32xf32>
    %413 = arith.addf %3, %412 : vector<16x32xf32>
    %414 = vector.extract_strided_slice %413 {offsets = [0, 16], sizes = [16, 16], strides = [1, 1]} : vector<16x32xf32> to vector<16x16xf32>
    %cst_155 = arith.constant -9.99999997E-7 : f32
    %415 = vector.broadcast %cst_155 : f32 to vector<16x16xf32>
    %416 = arith.minimumf %414, %415 : vector<16x16xf32>
    %cst_156 = arith.constant -2.000000e+00 : f32
    %417 = vector.broadcast %cst_156 : f32 to vector<16x16xf32>
    %418 = arith.mulf %417, %416 : vector<16x16xf32>
    %419 = math.rsqrt %418 : vector<16x16xf32>
    %420 = arith.mulf %419, %419 : vector<16x16xf32>
    %421 = vector.extract_strided_slice %413 {offsets = [0, 0], sizes = [16, 16], strides = [1, 1]} : vector<16x32xf32> to vector<16x16xf32>
    %422 = arith.mulf %421, %420 : vector<16x16xf32>
    %c8_157 = arith.constant 8 : index
    %c0_158 = arith.constant 0 : index
    %c0_159 = arith.constant 0 : index
    %423 = vector.load %arg7[%c8_157, %c0_158, %c0_159] : memref<15x16x16xf32, #tpu.memory_space<vmem>>, vector<1x16x16xf32>
    %424 = vector.shape_cast %423 : vector<1x16x16xf32> to vector<16x16xf32>
    %425 = arith.mulf %419, %424 : vector<16x16xf32>
    %426 = arith.addf %422, %425 : vector<16x16xf32>
    %427 = vector.extract_strided_slice %409 {offsets = [0, 0], sizes = [8, 16], strides = [1, 1]} : vector<16x16xf32> to vector<8x16xf32>
    %c8_160 = arith.constant 8 : index
    %c0_161 = arith.constant 0 : index
    %c0_162 = arith.constant 0 : index
    %428 = vector.load %arg12[%c8_160, %c0_161, %c0_162] : memref<15x8x16xf32, #tpu.memory_space<vmem>>, vector<1x8x16xf32>
    %429 = vector.shape_cast %428 : vector<1x8x16xf32> to vector<8x16xf32>
    %430 = vector.shape_cast %427 : vector<8x16xf32> to vector<1x8x16xf32>
    tpu.vector_store %arg12[%c8_160, %c0_161, %c0_162], %430 {strides = array<i32>} : memref<15x8x16xf32, #tpu.memory_space<vmem>>, vector<1x8x16xf32>,
    %431 = vector.extract_strided_slice %426 {offsets = [0, 0], sizes = [8, 16], strides = [1, 1]} : vector<16x16xf32> to vector<8x16xf32>
    %c8_163 = arith.constant 8 : index
    %c0_164 = arith.constant 0 : index
    %c0_165 = arith.constant 0 : index
    %432 = vector.load %arg13[%c8_163, %c0_164, %c0_165] : memref<15x8x16xf32, #tpu.memory_space<vmem>>, vector<1x8x16xf32>
    %433 = vector.shape_cast %432 : vector<1x8x16xf32> to vector<8x16xf32>
    %434 = vector.shape_cast %431 : vector<8x16xf32> to vector<1x8x16xf32>
    tpu.vector_store %arg13[%c8_163, %c0_164, %c0_165], %434 {strides = array<i32>} : memref<15x8x16xf32, #tpu.memory_space<vmem>>, vector<1x8x16xf32>,
    %435 = arith.addf %387, %409 : vector<16x16xf32>
    %436 = arith.mulf %409, %409 : vector<16x16xf32>
    %437 = arith.addf %389, %436 : vector<16x16xf32>
    %438 = arith.addf %390, %426 : vector<16x16xf32>
    %439 = arith.mulf %426, %426 : vector<16x16xf32>
    %440 = arith.addf %392, %439 : vector<16x16xf32>
    %441 = arith.mulf %426, %426 : vector<16x16xf32>
    %442 = tpu.concatenate %426, %441 in 1 : vector<16x16xf32>, vector<16x16xf32> -> vector<16x32xf32>
    %cst_166 = arith.constant dense<0.000000e+00> : vector<16x32xf32>
    %443 = tpu.matmul %442, %0, %cst_166 {dimension_numbers = #tpu.dot_dimension_numbers<[1], [0], [0], [1], [0, 0, 1, 1], [], []>} : vector<16x32xf32>, vector<32x32xf32>, vector<16x32xf32> -> vector<16x32xf32>
    %444 = arith.addf %2, %443 : vector<16x32xf32>
    %445 = vector.extract_strided_slice %444 {offsets = [0, 16], sizes = [16, 16], strides = [1, 1]} : vector<16x32xf32> to vector<16x16xf32>
    %cst_167 = arith.constant -9.99999997E-7 : f32
    %446 = vector.broadcast %cst_167 : f32 to vector<16x16xf32>
    %447 = arith.minimumf %445, %446 : vector<16x16xf32>
    %cst_168 = arith.constant -2.000000e+00 : f32
    %448 = vector.broadcast %cst_168 : f32 to vector<16x16xf32>
    %449 = arith.mulf %448, %447 : vector<16x16xf32>
    %450 = math.rsqrt %449 : vector<16x16xf32>
    %451 = arith.mulf %450, %450 : vector<16x16xf32>
    %452 = vector.extract_strided_slice %444 {offsets = [0, 0], sizes = [16, 16], strides = [1, 1]} : vector<16x32xf32> to vector<16x16xf32>
    %453 = arith.mulf %452, %451 : vector<16x16xf32>
    %c9 = arith.constant 9 : index
    %c0_169 = arith.constant 0 : index
    %c0_170 = arith.constant 0 : index
    %454 = vector.load %arg6[%c9, %c0_169, %c0_170] : memref<15x16x16xf32, #tpu.memory_space<vmem>>, vector<1x16x16xf32>
    %455 = vector.shape_cast %454 : vector<1x16x16xf32> to vector<16x16xf32>
    %456 = arith.mulf %450, %455 : vector<16x16xf32>
    %457 = arith.addf %453, %456 : vector<16x16xf32>
    %458 = arith.mulf %457, %457 : vector<16x16xf32>
    %459 = tpu.concatenate %457, %458 in 1 : vector<16x16xf32>, vector<16x16xf32> -> vector<16x32xf32>
    %cst_171 = arith.constant dense<0.000000e+00> : vector<16x32xf32>
    %460 = tpu.matmul %459, %1, %cst_171 {dimension_numbers = #tpu.dot_dimension_numbers<[1], [0], [0], [1], [0, 0, 1, 1], [], []>} : vector<16x32xf32>, vector<32x32xf32>, vector<16x32xf32> -> vector<16x32xf32>
    %461 = arith.addf %3, %460 : vector<16x32xf32>
    %462 = vector.extract_strided_slice %461 {offsets = [0, 16], sizes = [16, 16], strides = [1, 1]} : vector<16x32xf32> to vector<16x16xf32>
    %cst_172 = arith.constant -9.99999997E-7 : f32
    %463 = vector.broadcast %cst_172 : f32 to vector<16x16xf32>
    %464 = arith.minimumf %462, %463 : vector<16x16xf32>
    %cst_173 = arith.constant -2.000000e+00 : f32
    %465 = vector.broadcast %cst_173 : f32 to vector<16x16xf32>
    %466 = arith.mulf %465, %464 : vector<16x16xf32>
    %467 = math.rsqrt %466 : vector<16x16xf32>
    %468 = arith.mulf %467, %467 : vector<16x16xf32>
    %469 = vector.extract_strided_slice %461 {offsets = [0, 0], sizes = [16, 16], strides = [1, 1]} : vector<16x32xf32> to vector<16x16xf32>
    %470 = arith.mulf %469, %468 : vector<16x16xf32>
    %c9_174 = arith.constant 9 : index
    %c0_175 = arith.constant 0 : index
    %c0_176 = arith.constant 0 : index
    %471 = vector.load %arg7[%c9_174, %c0_175, %c0_176] : memref<15x16x16xf32, #tpu.memory_space<vmem>>, vector<1x16x16xf32>
    %472 = vector.shape_cast %471 : vector<1x16x16xf32> to vector<16x16xf32>
    %473 = arith.mulf %467, %472 : vector<16x16xf32>
    %474 = arith.addf %470, %473 : vector<16x16xf32>
    %475 = vector.extract_strided_slice %457 {offsets = [0, 0], sizes = [8, 16], strides = [1, 1]} : vector<16x16xf32> to vector<8x16xf32>
    %c9_177 = arith.constant 9 : index
    %c0_178 = arith.constant 0 : index
    %c0_179 = arith.constant 0 : index
    %476 = vector.load %arg12[%c9_177, %c0_178, %c0_179] : memref<15x8x16xf32, #tpu.memory_space<vmem>>, vector<1x8x16xf32>
    %477 = vector.shape_cast %476 : vector<1x8x16xf32> to vector<8x16xf32>
    %478 = vector.shape_cast %475 : vector<8x16xf32> to vector<1x8x16xf32>
    tpu.vector_store %arg12[%c9_177, %c0_178, %c0_179], %478 {strides = array<i32>} : memref<15x8x16xf32, #tpu.memory_space<vmem>>, vector<1x8x16xf32>,
    %479 = vector.extract_strided_slice %474 {offsets = [0, 0], sizes = [8, 16], strides = [1, 1]} : vector<16x16xf32> to vector<8x16xf32>
    %c9_180 = arith.constant 9 : index
    %c0_181 = arith.constant 0 : index
    %c0_182 = arith.constant 0 : index
    %480 = vector.load %arg13[%c9_180, %c0_181, %c0_182] : memref<15x8x16xf32, #tpu.memory_space<vmem>>, vector<1x8x16xf32>
    %481 = vector.shape_cast %480 : vector<1x8x16xf32> to vector<8x16xf32>
    %482 = vector.shape_cast %479 : vector<8x16xf32> to vector<1x8x16xf32>
    tpu.vector_store %arg13[%c9_180, %c0_181, %c0_182], %482 {strides = array<i32>} : memref<15x8x16xf32, #tpu.memory_space<vmem>>, vector<1x8x16xf32>,
    %483 = arith.addf %435, %457 : vector<16x16xf32>
    %484 = arith.mulf %457, %457 : vector<16x16xf32>
    %485 = arith.addf %437, %484 : vector<16x16xf32>
    %486 = arith.addf %438, %474 : vector<16x16xf32>
    %487 = arith.mulf %474, %474 : vector<16x16xf32>
    %488 = arith.addf %440, %487 : vector<16x16xf32>
    %489 = arith.mulf %474, %474 : vector<16x16xf32>
    %490 = tpu.concatenate %474, %489 in 1 : vector<16x16xf32>, vector<16x16xf32> -> vector<16x32xf32>
    %cst_183 = arith.constant dense<0.000000e+00> : vector<16x32xf32>
    %491 = tpu.matmul %490, %0, %cst_183 {dimension_numbers = #tpu.dot_dimension_numbers<[1], [0], [0], [1], [0, 0, 1, 1], [], []>} : vector<16x32xf32>, vector<32x32xf32>, vector<16x32xf32> -> vector<16x32xf32>
    %492 = arith.addf %2, %491 : vector<16x32xf32>
    %493 = vector.extract_strided_slice %492 {offsets = [0, 16], sizes = [16, 16], strides = [1, 1]} : vector<16x32xf32> to vector<16x16xf32>
    %cst_184 = arith.constant -9.99999997E-7 : f32
    %494 = vector.broadcast %cst_184 : f32 to vector<16x16xf32>
    %495 = arith.minimumf %493, %494 : vector<16x16xf32>
    %cst_185 = arith.constant -2.000000e+00 : f32
    %496 = vector.broadcast %cst_185 : f32 to vector<16x16xf32>
    %497 = arith.mulf %496, %495 : vector<16x16xf32>
    %498 = math.rsqrt %497 : vector<16x16xf32>
    %499 = arith.mulf %498, %498 : vector<16x16xf32>
    %500 = vector.extract_strided_slice %492 {offsets = [0, 0], sizes = [16, 16], strides = [1, 1]} : vector<16x32xf32> to vector<16x16xf32>
    %501 = arith.mulf %500, %499 : vector<16x16xf32>
    %c10 = arith.constant 10 : index
    %c0_186 = arith.constant 0 : index
    %c0_187 = arith.constant 0 : index
    %502 = vector.load %arg6[%c10, %c0_186, %c0_187] : memref<15x16x16xf32, #tpu.memory_space<vmem>>, vector<1x16x16xf32>
    %503 = vector.shape_cast %502 : vector<1x16x16xf32> to vector<16x16xf32>
    %504 = arith.mulf %498, %503 : vector<16x16xf32>
    %505 = arith.addf %501, %504 : vector<16x16xf32>
    %506 = arith.mulf %505, %505 : vector<16x16xf32>
    %507 = tpu.concatenate %505, %506 in 1 : vector<16x16xf32>, vector<16x16xf32> -> vector<16x32xf32>
    %cst_188 = arith.constant dense<0.000000e+00> : vector<16x32xf32>
    %508 = tpu.matmul %507, %1, %cst_188 {dimension_numbers = #tpu.dot_dimension_numbers<[1], [0], [0], [1], [0, 0, 1, 1], [], []>} : vector<16x32xf32>, vector<32x32xf32>, vector<16x32xf32> -> vector<16x32xf32>
    %509 = arith.addf %3, %508 : vector<16x32xf32>
    %510 = vector.extract_strided_slice %509 {offsets = [0, 16], sizes = [16, 16], strides = [1, 1]} : vector<16x32xf32> to vector<16x16xf32>
    %cst_189 = arith.constant -9.99999997E-7 : f32
    %511 = vector.broadcast %cst_189 : f32 to vector<16x16xf32>
    %512 = arith.minimumf %510, %511 : vector<16x16xf32>
    %cst_190 = arith.constant -2.000000e+00 : f32
    %513 = vector.broadcast %cst_190 : f32 to vector<16x16xf32>
    %514 = arith.mulf %513, %512 : vector<16x16xf32>
    %515 = math.rsqrt %514 : vector<16x16xf32>
    %516 = arith.mulf %515, %515 : vector<16x16xf32>
    %517 = vector.extract_strided_slice %509 {offsets = [0, 0], sizes = [16, 16], strides = [1, 1]} : vector<16x32xf32> to vector<16x16xf32>
    %518 = arith.mulf %517, %516 : vector<16x16xf32>
    %c10_191 = arith.constant 10 : index
    %c0_192 = arith.constant 0 : index
    %c0_193 = arith.constant 0 : index
    %519 = vector.load %arg7[%c10_191, %c0_192, %c0_193] : memref<15x16x16xf32, #tpu.memory_space<vmem>>, vector<1x16x16xf32>
    %520 = vector.shape_cast %519 : vector<1x16x16xf32> to vector<16x16xf32>
    %521 = arith.mulf %515, %520 : vector<16x16xf32>
    %522 = arith.addf %518, %521 : vector<16x16xf32>
    %523 = vector.extract_strided_slice %505 {offsets = [0, 0], sizes = [8, 16], strides = [1, 1]} : vector<16x16xf32> to vector<8x16xf32>
    %c10_194 = arith.constant 10 : index
    %c0_195 = arith.constant 0 : index
    %c0_196 = arith.constant 0 : index
    %524 = vector.load %arg12[%c10_194, %c0_195, %c0_196] : memref<15x8x16xf32, #tpu.memory_space<vmem>>, vector<1x8x16xf32>
    %525 = vector.shape_cast %524 : vector<1x8x16xf32> to vector<8x16xf32>
    %526 = vector.shape_cast %523 : vector<8x16xf32> to vector<1x8x16xf32>
    tpu.vector_store %arg12[%c10_194, %c0_195, %c0_196], %526 {strides = array<i32>} : memref<15x8x16xf32, #tpu.memory_space<vmem>>, vector<1x8x16xf32>,
    %527 = vector.extract_strided_slice %522 {offsets = [0, 0], sizes = [8, 16], strides = [1, 1]} : vector<16x16xf32> to vector<8x16xf32>
    %c10_197 = arith.constant 10 : index
    %c0_198 = arith.constant 0 : index
    %c0_199 = arith.constant 0 : index
    %528 = vector.load %arg13[%c10_197, %c0_198, %c0_199] : memref<15x8x16xf32, #tpu.memory_space<vmem>>, vector<1x8x16xf32>
    %529 = vector.shape_cast %528 : vector<1x8x16xf32> to vector<8x16xf32>
    %530 = vector.shape_cast %527 : vector<8x16xf32> to vector<1x8x16xf32>
    tpu.vector_store %arg13[%c10_197, %c0_198, %c0_199], %530 {strides = array<i32>} : memref<15x8x16xf32, #tpu.memory_space<vmem>>, vector<1x8x16xf32>,
    %531 = arith.addf %483, %505 : vector<16x16xf32>
    %532 = arith.mulf %505, %505 : vector<16x16xf32>
    %533 = arith.addf %485, %532 : vector<16x16xf32>
    %534 = arith.addf %486, %522 : vector<16x16xf32>
    %535 = arith.mulf %522, %522 : vector<16x16xf32>
    %536 = arith.addf %488, %535 : vector<16x16xf32>
    %537 = arith.mulf %522, %522 : vector<16x16xf32>
    %538 = tpu.concatenate %522, %537 in 1 : vector<16x16xf32>, vector<16x16xf32> -> vector<16x32xf32>
    %cst_200 = arith.constant dense<0.000000e+00> : vector<16x32xf32>
    %539 = tpu.matmul %538, %0, %cst_200 {dimension_numbers = #tpu.dot_dimension_numbers<[1], [0], [0], [1], [0, 0, 1, 1], [], []>} : vector<16x32xf32>, vector<32x32xf32>, vector<16x32xf32> -> vector<16x32xf32>
    %540 = arith.addf %2, %539 : vector<16x32xf32>
    %541 = vector.extract_strided_slice %540 {offsets = [0, 16], sizes = [16, 16], strides = [1, 1]} : vector<16x32xf32> to vector<16x16xf32>
    %cst_201 = arith.constant -9.99999997E-7 : f32
    %542 = vector.broadcast %cst_201 : f32 to vector<16x16xf32>
    %543 = arith.minimumf %541, %542 : vector<16x16xf32>
    %cst_202 = arith.constant -2.000000e+00 : f32
    %544 = vector.broadcast %cst_202 : f32 to vector<16x16xf32>
    %545 = arith.mulf %544, %543 : vector<16x16xf32>
    %546 = math.rsqrt %545 : vector<16x16xf32>
    %547 = arith.mulf %546, %546 : vector<16x16xf32>
    %548 = vector.extract_strided_slice %540 {offsets = [0, 0], sizes = [16, 16], strides = [1, 1]} : vector<16x32xf32> to vector<16x16xf32>
    %549 = arith.mulf %548, %547 : vector<16x16xf32>
    %c11 = arith.constant 11 : index
    %c0_203 = arith.constant 0 : index
    %c0_204 = arith.constant 0 : index
    %550 = vector.load %arg6[%c11, %c0_203, %c0_204] : memref<15x16x16xf32, #tpu.memory_space<vmem>>, vector<1x16x16xf32>
    %551 = vector.shape_cast %550 : vector<1x16x16xf32> to vector<16x16xf32>
    %552 = arith.mulf %546, %551 : vector<16x16xf32>
    %553 = arith.addf %549, %552 : vector<16x16xf32>
    %554 = arith.mulf %553, %553 : vector<16x16xf32>
    %555 = tpu.concatenate %553, %554 in 1 : vector<16x16xf32>, vector<16x16xf32> -> vector<16x32xf32>
    %cst_205 = arith.constant dense<0.000000e+00> : vector<16x32xf32>
    %556 = tpu.matmul %555, %1, %cst_205 {dimension_numbers = #tpu.dot_dimension_numbers<[1], [0], [0], [1], [0, 0, 1, 1], [], []>} : vector<16x32xf32>, vector<32x32xf32>, vector<16x32xf32> -> vector<16x32xf32>
    %557 = arith.addf %3, %556 : vector<16x32xf32>
    %558 = vector.extract_strided_slice %557 {offsets = [0, 16], sizes = [16, 16], strides = [1, 1]} : vector<16x32xf32> to vector<16x16xf32>
    %cst_206 = arith.constant -9.99999997E-7 : f32
    %559 = vector.broadcast %cst_206 : f32 to vector<16x16xf32>
    %560 = arith.minimumf %558, %559 : vector<16x16xf32>
    %cst_207 = arith.constant -2.000000e+00 : f32
    %561 = vector.broadcast %cst_207 : f32 to vector<16x16xf32>
    %562 = arith.mulf %561, %560 : vector<16x16xf32>
    %563 = math.rsqrt %562 : vector<16x16xf32>
    %564 = arith.mulf %563, %563 : vector<16x16xf32>
    %565 = vector.extract_strided_slice %557 {offsets = [0, 0], sizes = [16, 16], strides = [1, 1]} : vector<16x32xf32> to vector<16x16xf32>
    %566 = arith.mulf %565, %564 : vector<16x16xf32>
    %c11_208 = arith.constant 11 : index
    %c0_209 = arith.constant 0 : index
    %c0_210 = arith.constant 0 : index
    %567 = vector.load %arg7[%c11_208, %c0_209, %c0_210] : memref<15x16x16xf32, #tpu.memory_space<vmem>>, vector<1x16x16xf32>
    %568 = vector.shape_cast %567 : vector<1x16x16xf32> to vector<16x16xf32>
    %569 = arith.mulf %563, %568 : vector<16x16xf32>
    %570 = arith.addf %566, %569 : vector<16x16xf32>
    %571 = vector.extract_strided_slice %553 {offsets = [0, 0], sizes = [8, 16], strides = [1, 1]} : vector<16x16xf32> to vector<8x16xf32>
    %c11_211 = arith.constant 11 : index
    %c0_212 = arith.constant 0 : index
    %c0_213 = arith.constant 0 : index
    %572 = vector.load %arg12[%c11_211, %c0_212, %c0_213] : memref<15x8x16xf32, #tpu.memory_space<vmem>>, vector<1x8x16xf32>
    %573 = vector.shape_cast %572 : vector<1x8x16xf32> to vector<8x16xf32>
    %574 = vector.shape_cast %571 : vector<8x16xf32> to vector<1x8x16xf32>
    tpu.vector_store %arg12[%c11_211, %c0_212, %c0_213], %574 {strides = array<i32>} : memref<15x8x16xf32, #tpu.memory_space<vmem>>, vector<1x8x16xf32>,
    %575 = vector.extract_strided_slice %570 {offsets = [0, 0], sizes = [8, 16], strides = [1, 1]} : vector<16x16xf32> to vector<8x16xf32>
    %c11_214 = arith.constant 11 : index
    %c0_215 = arith.constant 0 : index
    %c0_216 = arith.constant 0 : index
    %576 = vector.load %arg13[%c11_214, %c0_215, %c0_216] : memref<15x8x16xf32, #tpu.memory_space<vmem>>, vector<1x8x16xf32>
    %577 = vector.shape_cast %576 : vector<1x8x16xf32> to vector<8x16xf32>
    %578 = vector.shape_cast %575 : vector<8x16xf32> to vector<1x8x16xf32>
    tpu.vector_store %arg13[%c11_214, %c0_215, %c0_216], %578 {strides = array<i32>} : memref<15x8x16xf32, #tpu.memory_space<vmem>>, vector<1x8x16xf32>,
    %579 = arith.addf %531, %553 : vector<16x16xf32>
    %580 = arith.mulf %553, %553 : vector<16x16xf32>
    %581 = arith.addf %533, %580 : vector<16x16xf32>
    %582 = arith.addf %534, %570 : vector<16x16xf32>
    %583 = arith.mulf %570, %570 : vector<16x16xf32>
    %584 = arith.addf %536, %583 : vector<16x16xf32>
    %585 = arith.mulf %570, %570 : vector<16x16xf32>
    %586 = tpu.concatenate %570, %585 in 1 : vector<16x16xf32>, vector<16x16xf32> -> vector<16x32xf32>
    %cst_217 = arith.constant dense<0.000000e+00> : vector<16x32xf32>
    %587 = tpu.matmul %586, %0, %cst_217 {dimension_numbers = #tpu.dot_dimension_numbers<[1], [0], [0], [1], [0, 0, 1, 1], [], []>} : vector<16x32xf32>, vector<32x32xf32>, vector<16x32xf32> -> vector<16x32xf32>
    %588 = arith.addf %2, %587 : vector<16x32xf32>
    %589 = vector.extract_strided_slice %588 {offsets = [0, 16], sizes = [16, 16], strides = [1, 1]} : vector<16x32xf32> to vector<16x16xf32>
    %cst_218 = arith.constant -9.99999997E-7 : f32
    %590 = vector.broadcast %cst_218 : f32 to vector<16x16xf32>
    %591 = arith.minimumf %589, %590 : vector<16x16xf32>
    %cst_219 = arith.constant -2.000000e+00 : f32
    %592 = vector.broadcast %cst_219 : f32 to vector<16x16xf32>
    %593 = arith.mulf %592, %591 : vector<16x16xf32>
    %594 = math.rsqrt %593 : vector<16x16xf32>
    %595 = arith.mulf %594, %594 : vector<16x16xf32>
    %596 = vector.extract_strided_slice %588 {offsets = [0, 0], sizes = [16, 16], strides = [1, 1]} : vector<16x32xf32> to vector<16x16xf32>
    %597 = arith.mulf %596, %595 : vector<16x16xf32>
    %c12 = arith.constant 12 : index
    %c0_220 = arith.constant 0 : index
    %c0_221 = arith.constant 0 : index
    %598 = vector.load %arg6[%c12, %c0_220, %c0_221] : memref<15x16x16xf32, #tpu.memory_space<vmem>>, vector<1x16x16xf32>
    %599 = vector.shape_cast %598 : vector<1x16x16xf32> to vector<16x16xf32>
    %600 = arith.mulf %594, %599 : vector<16x16xf32>
    %601 = arith.addf %597, %600 : vector<16x16xf32>
    %602 = arith.mulf %601, %601 : vector<16x16xf32>
    %603 = tpu.concatenate %601, %602 in 1 : vector<16x16xf32>, vector<16x16xf32> -> vector<16x32xf32>
    %cst_222 = arith.constant dense<0.000000e+00> : vector<16x32xf32>
    %604 = tpu.matmul %603, %1, %cst_222 {dimension_numbers = #tpu.dot_dimension_numbers<[1], [0], [0], [1], [0, 0, 1, 1], [], []>} : vector<16x32xf32>, vector<32x32xf32>, vector<16x32xf32> -> vector<16x32xf32>
    %605 = arith.addf %3, %604 : vector<16x32xf32>
    %606 = vector.extract_strided_slice %605 {offsets = [0, 16], sizes = [16, 16], strides = [1, 1]} : vector<16x32xf32> to vector<16x16xf32>
    %cst_223 = arith.constant -9.99999997E-7 : f32
    %607 = vector.broadcast %cst_223 : f32 to vector<16x16xf32>
    %608 = arith.minimumf %606, %607 : vector<16x16xf32>
    %cst_224 = arith.constant -2.000000e+00 : f32
    %609 = vector.broadcast %cst_224 : f32 to vector<16x16xf32>
    %610 = arith.mulf %609, %608 : vector<16x16xf32>
    %611 = math.rsqrt %610 : vector<16x16xf32>
    %612 = arith.mulf %611, %611 : vector<16x16xf32>
    %613 = vector.extract_strided_slice %605 {offsets = [0, 0], sizes = [16, 16], strides = [1, 1]} : vector<16x32xf32> to vector<16x16xf32>
    %614 = arith.mulf %613, %612 : vector<16x16xf32>
    %c12_225 = arith.constant 12 : index
    %c0_226 = arith.constant 0 : index
    %c0_227 = arith.constant 0 : index
    %615 = vector.load %arg7[%c12_225, %c0_226, %c0_227] : memref<15x16x16xf32, #tpu.memory_space<vmem>>, vector<1x16x16xf32>
    %616 = vector.shape_cast %615 : vector<1x16x16xf32> to vector<16x16xf32>
    %617 = arith.mulf %611, %616 : vector<16x16xf32>
    %618 = arith.addf %614, %617 : vector<16x16xf32>
    %619 = vector.extract_strided_slice %601 {offsets = [0, 0], sizes = [8, 16], strides = [1, 1]} : vector<16x16xf32> to vector<8x16xf32>
    %c12_228 = arith.constant 12 : index
    %c0_229 = arith.constant 0 : index
    %c0_230 = arith.constant 0 : index
    %620 = vector.load %arg12[%c12_228, %c0_229, %c0_230] : memref<15x8x16xf32, #tpu.memory_space<vmem>>, vector<1x8x16xf32>
    %621 = vector.shape_cast %620 : vector<1x8x16xf32> to vector<8x16xf32>
    %622 = vector.shape_cast %619 : vector<8x16xf32> to vector<1x8x16xf32>
    tpu.vector_store %arg12[%c12_228, %c0_229, %c0_230], %622 {strides = array<i32>} : memref<15x8x16xf32, #tpu.memory_space<vmem>>, vector<1x8x16xf32>,
    %623 = vector.extract_strided_slice %618 {offsets = [0, 0], sizes = [8, 16], strides = [1, 1]} : vector<16x16xf32> to vector<8x16xf32>
    %c12_231 = arith.constant 12 : index
    %c0_232 = arith.constant 0 : index
    %c0_233 = arith.constant 0 : index
    %624 = vector.load %arg13[%c12_231, %c0_232, %c0_233] : memref<15x8x16xf32, #tpu.memory_space<vmem>>, vector<1x8x16xf32>
    %625 = vector.shape_cast %624 : vector<1x8x16xf32> to vector<8x16xf32>
    %626 = vector.shape_cast %623 : vector<8x16xf32> to vector<1x8x16xf32>
    tpu.vector_store %arg13[%c12_231, %c0_232, %c0_233], %626 {strides = array<i32>} : memref<15x8x16xf32, #tpu.memory_space<vmem>>, vector<1x8x16xf32>,
    %627 = arith.addf %579, %601 : vector<16x16xf32>
    %628 = arith.mulf %601, %601 : vector<16x16xf32>
    %629 = arith.addf %581, %628 : vector<16x16xf32>
    %630 = arith.addf %582, %618 : vector<16x16xf32>
    %631 = arith.mulf %618, %618 : vector<16x16xf32>
    %632 = arith.addf %584, %631 : vector<16x16xf32>
    %633 = arith.mulf %618, %618 : vector<16x16xf32>
    %634 = tpu.concatenate %618, %633 in 1 : vector<16x16xf32>, vector<16x16xf32> -> vector<16x32xf32>
    %cst_234 = arith.constant dense<0.000000e+00> : vector<16x32xf32>
    %635 = tpu.matmul %634, %0, %cst_234 {dimension_numbers = #tpu.dot_dimension_numbers<[1], [0], [0], [1], [0, 0, 1, 1], [], []>} : vector<16x32xf32>, vector<32x32xf32>, vector<16x32xf32> -> vector<16x32xf32>
    %636 = arith.addf %2, %635 : vector<16x32xf32>
    %637 = vector.extract_strided_slice %636 {offsets = [0, 16], sizes = [16, 16], strides = [1, 1]} : vector<16x32xf32> to vector<16x16xf32>
    %cst_235 = arith.constant -9.99999997E-7 : f32
    %638 = vector.broadcast %cst_235 : f32 to vector<16x16xf32>
    %639 = arith.minimumf %637, %638 : vector<16x16xf32>
    %cst_236 = arith.constant -2.000000e+00 : f32
    %640 = vector.broadcast %cst_236 : f32 to vector<16x16xf32>
    %641 = arith.mulf %640, %639 : vector<16x16xf32>
    %642 = math.rsqrt %641 : vector<16x16xf32>
    %643 = arith.mulf %642, %642 : vector<16x16xf32>
    %644 = vector.extract_strided_slice %636 {offsets = [0, 0], sizes = [16, 16], strides = [1, 1]} : vector<16x32xf32> to vector<16x16xf32>
    %645 = arith.mulf %644, %643 : vector<16x16xf32>
    %c13 = arith.constant 13 : index
    %c0_237 = arith.constant 0 : index
    %c0_238 = arith.constant 0 : index
    %646 = vector.load %arg6[%c13, %c0_237, %c0_238] : memref<15x16x16xf32, #tpu.memory_space<vmem>>, vector<1x16x16xf32>
    %647 = vector.shape_cast %646 : vector<1x16x16xf32> to vector<16x16xf32>
    %648 = arith.mulf %642, %647 : vector<16x16xf32>
    %649 = arith.addf %645, %648 : vector<16x16xf32>
    %650 = arith.mulf %649, %649 : vector<16x16xf32>
    %651 = tpu.concatenate %649, %650 in 1 : vector<16x16xf32>, vector<16x16xf32> -> vector<16x32xf32>
    %cst_239 = arith.constant dense<0.000000e+00> : vector<16x32xf32>
    %652 = tpu.matmul %651, %1, %cst_239 {dimension_numbers = #tpu.dot_dimension_numbers<[1], [0], [0], [1], [0, 0, 1, 1], [], []>} : vector<16x32xf32>, vector<32x32xf32>, vector<16x32xf32> -> vector<16x32xf32>
    %653 = arith.addf %3, %652 : vector<16x32xf32>
    %654 = vector.extract_strided_slice %653 {offsets = [0, 16], sizes = [16, 16], strides = [1, 1]} : vector<16x32xf32> to vector<16x16xf32>
    %cst_240 = arith.constant -9.99999997E-7 : f32
    %655 = vector.broadcast %cst_240 : f32 to vector<16x16xf32>
    %656 = arith.minimumf %654, %655 : vector<16x16xf32>
    %cst_241 = arith.constant -2.000000e+00 : f32
    %657 = vector.broadcast %cst_241 : f32 to vector<16x16xf32>
    %658 = arith.mulf %657, %656 : vector<16x16xf32>
    %659 = math.rsqrt %658 : vector<16x16xf32>
    %660 = arith.mulf %659, %659 : vector<16x16xf32>
    %661 = vector.extract_strided_slice %653 {offsets = [0, 0], sizes = [16, 16], strides = [1, 1]} : vector<16x32xf32> to vector<16x16xf32>
    %662 = arith.mulf %661, %660 : vector<16x16xf32>
    %c13_242 = arith.constant 13 : index
    %c0_243 = arith.constant 0 : index
    %c0_244 = arith.constant 0 : index
    %663 = vector.load %arg7[%c13_242, %c0_243, %c0_244] : memref<15x16x16xf32, #tpu.memory_space<vmem>>, vector<1x16x16xf32>
    %664 = vector.shape_cast %663 : vector<1x16x16xf32> to vector<16x16xf32>
    %665 = arith.mulf %659, %664 : vector<16x16xf32>
    %666 = arith.addf %662, %665 : vector<16x16xf32>
    %667 = vector.extract_strided_slice %649 {offsets = [0, 0], sizes = [8, 16], strides = [1, 1]} : vector<16x16xf32> to vector<8x16xf32>
    %c13_245 = arith.constant 13 : index
    %c0_246 = arith.constant 0 : index
    %c0_247 = arith.constant 0 : index
    %668 = vector.load %arg12[%c13_245, %c0_246, %c0_247] : memref<15x8x16xf32, #tpu.memory_space<vmem>>, vector<1x8x16xf32>
    %669 = vector.shape_cast %668 : vector<1x8x16xf32> to vector<8x16xf32>
    %670 = vector.shape_cast %667 : vector<8x16xf32> to vector<1x8x16xf32>
    tpu.vector_store %arg12[%c13_245, %c0_246, %c0_247], %670 {strides = array<i32>} : memref<15x8x16xf32, #tpu.memory_space<vmem>>, vector<1x8x16xf32>,
    %671 = vector.extract_strided_slice %666 {offsets = [0, 0], sizes = [8, 16], strides = [1, 1]} : vector<16x16xf32> to vector<8x16xf32>
    %c13_248 = arith.constant 13 : index
    %c0_249 = arith.constant 0 : index
    %c0_250 = arith.constant 0 : index
    %672 = vector.load %arg13[%c13_248, %c0_249, %c0_250] : memref<15x8x16xf32, #tpu.memory_space<vmem>>, vector<1x8x16xf32>
    %673 = vector.shape_cast %672 : vector<1x8x16xf32> to vector<8x16xf32>
    %674 = vector.shape_cast %671 : vector<8x16xf32> to vector<1x8x16xf32>
    tpu.vector_store %arg13[%c13_248, %c0_249, %c0_250], %674 {strides = array<i32>} : memref<15x8x16xf32, #tpu.memory_space<vmem>>, vector<1x8x16xf32>,
    %675 = arith.addf %627, %649 : vector<16x16xf32>
    %676 = arith.mulf %649, %649 : vector<16x16xf32>
    %677 = arith.addf %629, %676 : vector<16x16xf32>
    %678 = arith.addf %630, %666 : vector<16x16xf32>
    %679 = arith.mulf %666, %666 : vector<16x16xf32>
    %680 = arith.addf %632, %679 : vector<16x16xf32>
    %681 = arith.mulf %666, %666 : vector<16x16xf32>
    %682 = tpu.concatenate %666, %681 in 1 : vector<16x16xf32>, vector<16x16xf32> -> vector<16x32xf32>
    %cst_251 = arith.constant dense<0.000000e+00> : vector<16x32xf32>
    %683 = tpu.matmul %682, %0, %cst_251 {dimension_numbers = #tpu.dot_dimension_numbers<[1], [0], [0], [1], [0, 0, 1, 1], [], []>} : vector<16x32xf32>, vector<32x32xf32>, vector<16x32xf32> -> vector<16x32xf32>
    %684 = arith.addf %2, %683 : vector<16x32xf32>
    %685 = vector.extract_strided_slice %684 {offsets = [0, 16], sizes = [16, 16], strides = [1, 1]} : vector<16x32xf32> to vector<16x16xf32>
    %cst_252 = arith.constant -9.99999997E-7 : f32
    %686 = vector.broadcast %cst_252 : f32 to vector<16x16xf32>
    %687 = arith.minimumf %685, %686 : vector<16x16xf32>
    %cst_253 = arith.constant -2.000000e+00 : f32
    %688 = vector.broadcast %cst_253 : f32 to vector<16x16xf32>
    %689 = arith.mulf %688, %687 : vector<16x16xf32>
    %690 = math.rsqrt %689 : vector<16x16xf32>
    %691 = arith.mulf %690, %690 : vector<16x16xf32>
    %692 = vector.extract_strided_slice %684 {offsets = [0, 0], sizes = [16, 16], strides = [1, 1]} : vector<16x32xf32> to vector<16x16xf32>
    %693 = arith.mulf %692, %691 : vector<16x16xf32>
    %c14 = arith.constant 14 : index
    %c0_254 = arith.constant 0 : index
    %c0_255 = arith.constant 0 : index
    %694 = vector.load %arg6[%c14, %c0_254, %c0_255] : memref<15x16x16xf32, #tpu.memory_space<vmem>>, vector<1x16x16xf32>
    %695 = vector.shape_cast %694 : vector<1x16x16xf32> to vector<16x16xf32>
    %696 = arith.mulf %690, %695 : vector<16x16xf32>
    %697 = arith.addf %693, %696 : vector<16x16xf32>
    %698 = arith.mulf %697, %697 : vector<16x16xf32>
    %699 = tpu.concatenate %697, %698 in 1 : vector<16x16xf32>, vector<16x16xf32> -> vector<16x32xf32>
    %cst_256 = arith.constant dense<0.000000e+00> : vector<16x32xf32>
    %700 = tpu.matmul %699, %1, %cst_256 {dimension_numbers = #tpu.dot_dimension_numbers<[1], [0], [0], [1], [0, 0, 1, 1], [], []>} : vector<16x32xf32>, vector<32x32xf32>, vector<16x32xf32> -> vector<16x32xf32>
    %701 = arith.addf %3, %700 : vector<16x32xf32>
    %702 = vector.extract_strided_slice %701 {offsets = [0, 16], sizes = [16, 16], strides = [1, 1]} : vector<16x32xf32> to vector<16x16xf32>
    %cst_257 = arith.constant -9.99999997E-7 : f32
    %703 = vector.broadcast %cst_257 : f32 to vector<16x16xf32>
    %704 = arith.minimumf %702, %703 : vector<16x16xf32>
    %cst_258 = arith.constant -2.000000e+00 : f32
    %705 = vector.broadcast %cst_258 : f32 to vector<16x16xf32>
    %706 = arith.mulf %705, %704 : vector<16x16xf32>
    %707 = math.rsqrt %706 : vector<16x16xf32>
    %708 = arith.mulf %707, %707 : vector<16x16xf32>
    %709 = vector.extract_strided_slice %701 {offsets = [0, 0], sizes = [16, 16], strides = [1, 1]} : vector<16x32xf32> to vector<16x16xf32>
    %710 = arith.mulf %709, %708 : vector<16x16xf32>
    %c14_259 = arith.constant 14 : index
    %c0_260 = arith.constant 0 : index
    %c0_261 = arith.constant 0 : index
    %711 = vector.load %arg7[%c14_259, %c0_260, %c0_261] : memref<15x16x16xf32, #tpu.memory_space<vmem>>, vector<1x16x16xf32>
    %712 = vector.shape_cast %711 : vector<1x16x16xf32> to vector<16x16xf32>
    %713 = arith.mulf %707, %712 : vector<16x16xf32>
    %714 = arith.addf %710, %713 : vector<16x16xf32>
    %715 = vector.extract_strided_slice %697 {offsets = [0, 0], sizes = [8, 16], strides = [1, 1]} : vector<16x16xf32> to vector<8x16xf32>
    %c14_262 = arith.constant 14 : index
    %c0_263 = arith.constant 0 : index
    %c0_264 = arith.constant 0 : index
    %716 = vector.load %arg12[%c14_262, %c0_263, %c0_264] : memref<15x8x16xf32, #tpu.memory_space<vmem>>, vector<1x8x16xf32>
    %717 = vector.shape_cast %716 : vector<1x8x16xf32> to vector<8x16xf32>
    %718 = vector.shape_cast %715 : vector<8x16xf32> to vector<1x8x16xf32>
    tpu.vector_store %arg12[%c14_262, %c0_263, %c0_264], %718 {strides = array<i32>} : memref<15x8x16xf32, #tpu.memory_space<vmem>>, vector<1x8x16xf32>,
    %719 = vector.extract_strided_slice %714 {offsets = [0, 0], sizes = [8, 16], strides = [1, 1]} : vector<16x16xf32> to vector<8x16xf32>
    %c14_265 = arith.constant 14 : index
    %c0_266 = arith.constant 0 : index
    %c0_267 = arith.constant 0 : index
    %720 = vector.load %arg13[%c14_265, %c0_266, %c0_267] : memref<15x8x16xf32, #tpu.memory_space<vmem>>, vector<1x8x16xf32>
    %721 = vector.shape_cast %720 : vector<1x8x16xf32> to vector<8x16xf32>
    %722 = vector.shape_cast %719 : vector<8x16xf32> to vector<1x8x16xf32>
    tpu.vector_store %arg13[%c14_265, %c0_266, %c0_267], %722 {strides = array<i32>} : memref<15x8x16xf32, #tpu.memory_space<vmem>>, vector<1x8x16xf32>,
    %723 = arith.addf %675, %697 : vector<16x16xf32>
    %724 = arith.mulf %697, %697 : vector<16x16xf32>
    %725 = arith.addf %677, %724 : vector<16x16xf32>
    %726 = arith.addf %678, %714 : vector<16x16xf32>
    %727 = arith.mulf %714, %714 : vector<16x16xf32>
    %728 = arith.addf %680, %727 : vector<16x16xf32>
    %729 = vector.extract_strided_slice %723 {offsets = [0, 0], sizes = [8, 16], strides = [1, 1]} : vector<16x16xf32> to vector<8x16xf32>
    %730 = vector.extract_strided_slice %723 {offsets = [8, 0], sizes = [8, 16], strides = [1, 1]} : vector<16x16xf32> to vector<8x16xf32>
    %731 = arith.subf %729, %730 : vector<8x16xf32>
    %cst_268 = arith.constant 0.0666666701 : f32
    %732 = vector.broadcast %cst_268 : f32 to vector<8x16xf32>
    %733 = arith.mulf %731, %732 : vector<8x16xf32>
    %734 = vector.extract_strided_slice %725 {offsets = [0, 0], sizes = [8, 16], strides = [1, 1]} : vector<16x16xf32> to vector<8x16xf32>
    %735 = vector.extract_strided_slice %725 {offsets = [8, 0], sizes = [8, 16], strides = [1, 1]} : vector<16x16xf32> to vector<8x16xf32>
    %736 = arith.subf %734, %735 : vector<8x16xf32>
    %cst_269 = arith.constant 0.0666666701 : f32
    %737 = vector.broadcast %cst_269 : f32 to vector<8x16xf32>
    %738 = arith.mulf %736, %737 : vector<8x16xf32>
    %739 = vector.extract_strided_slice %726 {offsets = [0, 0], sizes = [8, 16], strides = [1, 1]} : vector<16x16xf32> to vector<8x16xf32>
    %740 = vector.extract_strided_slice %726 {offsets = [8, 0], sizes = [8, 16], strides = [1, 1]} : vector<16x16xf32> to vector<8x16xf32>
    %741 = arith.subf %739, %740 : vector<8x16xf32>
    %cst_270 = arith.constant 0.0666666701 : f32
    %742 = vector.broadcast %cst_270 : f32 to vector<8x16xf32>
    %743 = arith.mulf %741, %742 : vector<8x16xf32>
    %744 = vector.extract_strided_slice %728 {offsets = [0, 0], sizes = [8, 16], strides = [1, 1]} : vector<16x16xf32> to vector<8x16xf32>
    %745 = vector.extract_strided_slice %728 {offsets = [8, 0], sizes = [8, 16], strides = [1, 1]} : vector<16x16xf32> to vector<8x16xf32>
    %746 = arith.subf %744, %745 : vector<8x16xf32>
    %cst_271 = arith.constant 0.0666666701 : f32
    %747 = vector.broadcast %cst_271 : f32 to vector<8x16xf32>
    %748 = arith.mulf %746, %747 : vector<8x16xf32>
    %c0_272 = arith.constant 0 : index
    %c0_273 = arith.constant 0 : index
    %749 = vector.load %arg8[%c0_272, %c0_273] : memref<8x16xf32, #tpu.memory_space<vmem>>, vector<8x16xf32>
    %750 = arith.mulf %749, %733 : vector<8x16xf32>
    %c0_274 = arith.constant 0 : index
    %c0_275 = arith.constant 0 : index
    %751 = vector.load %arg9[%c0_274, %c0_275] : memref<8x16xf32, #tpu.memory_space<vmem>>, vector<8x16xf32>
    %752 = arith.mulf %751, %738 : vector<8x16xf32>
    %753 = arith.addf %750, %752 : vector<8x16xf32>
    %cst_276 = arith.constant dense<0.000000e+00> : vector<8xf32>
    %754 = vector.multi_reduction <add>, %753, %cst_276 [1] : vector<8x16xf32> to vector<8xf32>
    %755 = vector.shape_cast %754 : vector<8xf32> to vector<8x1xf32>
    %c0_277 = arith.constant 0 : index
    %c0_278 = arith.constant 0 : index
    %756 = vector.load %arg10[%c0_277, %c0_278] : memref<8x16xf32, #tpu.memory_space<vmem>>, vector<8x16xf32>
    %757 = arith.mulf %756, %743 : vector<8x16xf32>
    %c0_279 = arith.constant 0 : index
    %c0_280 = arith.constant 0 : index
    %758 = vector.load %arg11[%c0_279, %c0_280] : memref<8x16xf32, #tpu.memory_space<vmem>>, vector<8x16xf32>
    %759 = arith.mulf %758, %748 : vector<8x16xf32>
    %760 = arith.addf %757, %759 : vector<8x16xf32>
    %cst_281 = arith.constant dense<0.000000e+00> : vector<8xf32>
    %761 = vector.multi_reduction <add>, %760, %cst_281 [1] : vector<8x16xf32> to vector<8xf32>
    %762 = vector.shape_cast %761 : vector<8xf32> to vector<8x1xf32>
    %763 = arith.addf %755, %762 : vector<8x1xf32>
    %cst_282 = arith.constant dense<0.000000e+00> : vector<1xf32>
    %764 = vector.multi_reduction <add>, %763, %cst_282 [0] : vector<8x1xf32> to vector<1xf32>
    %765 = vector.shape_cast %764 : vector<1xf32> to vector<1x1xf32>
    %cst_283 = arith.constant 1.250000e-01 : f32
    %766 = vector.broadcast %cst_283 : f32 to vector<1x1xf32>
    %767 = arith.mulf %765, %766 : vector<1x1xf32>
    %c0_284 = arith.constant 0 : index
    %c0_285 = arith.constant 0 : index
    %768 = vector.load %arg14[%c0_284, %c0_285] : memref<1x1xf32, #tpu.memory_space<vmem>>, vector<1x1xf32>
    tpu.vector_store %arg14[%c0_284, %c0_285], %767 {strides = array<i32>} : memref<1x1xf32, #tpu.memory_space<vmem>>, vector<1x1xf32>,
    return
  }
}

module attributes {stable_mosaic.version = 11 : i64} {
  func.func @_decoder2_kernel(%arg0: memref<120x16xf32, #tpu.memory_space<vmem>>, %arg1: memref<16x64xf32, #tpu.memory_space<vmem>>, %arg2: memref<1x64xf32, #tpu.memory_space<vmem>>, %arg3: memref<120x64xf32, #tpu.memory_space<vmem>>, %arg4: memref<120x16xf32, #tpu.memory_space<vmem>>, %arg5: memref<16x32xf32, #tpu.memory_space<vmem>>, %arg6: memref<1x32xf32, #tpu.memory_space<vmem>>, %arg7: memref<120x32xf32, #tpu.memory_space<vmem>>, %arg8: memref<8x64xf32, #tpu.memory_space<vmem>>, %arg9: memref<1x1xf32, #tpu.memory_space<vmem>>, %arg10: memref<8x32xf32, #tpu.memory_space<vmem>>, %arg11: memref<1x1xf32, #tpu.memory_space<vmem>>) attributes {dimension_semantics = [], scalar_prefetch = 0 : i64, scratch_operands = 0 : i64, tpu.core_type = #tpu.core_type<tc>} {
    %c0 = arith.constant 0 : index
    %c0_0 = arith.constant 0 : index
    %0 = vector.load %arg0[%c0, %c0_0] : memref<120x16xf32, #tpu.memory_space<vmem>>, vector<120x16xf32>
    %c0_1 = arith.constant 0 : index
    %c0_2 = arith.constant 0 : index
    %1 = vector.load %arg1[%c0_1, %c0_2] : memref<16x64xf32, #tpu.memory_space<vmem>>, vector<16x64xf32>
    %cst = arith.constant dense<0.000000e+00> : vector<120x64xf32>
    %2 = tpu.matmul %0, %1, %cst {dimension_numbers = #tpu.dot_dimension_numbers<[1], [0], [0], [1], [0, 0, 1, 1], [], []>} : vector<120x16xf32>, vector<16x64xf32>, vector<120x64xf32> -> vector<120x64xf32>
    %c0_3 = arith.constant 0 : index
    %c0_4 = arith.constant 0 : index
    %3 = vector.load %arg2[%c0_3, %c0_4] : memref<1x64xf32, #tpu.memory_space<vmem>>, vector<1x64xf32>
    %4 = vector.broadcast %3 : vector<1x64xf32> to vector<120x64xf32>
    %5 = arith.addf %2, %4 : vector<120x64xf32>
    %c0_5 = arith.constant 0 : index
    %c0_6 = arith.constant 0 : index
    %6 = vector.load %arg3[%c0_5, %c0_6] : memref<120x64xf32, #tpu.memory_space<vmem>>, vector<120x64xf32>
    %7 = arith.subf %6, %5 : vector<120x64xf32>
    %8 = arith.mulf %7, %7 : vector<120x64xf32>
    %cst_7 = arith.constant dense<0.000000e+00> : vector<120xf32>
    %9 = vector.multi_reduction <add>, %8, %cst_7 [1] : vector<120x64xf32> to vector<120xf32>
    %10 = vector.shape_cast %9 : vector<120xf32> to vector<120x1xf32>
    %cst_8 = arith.constant 5.000000e-01 : f32
    %11 = vector.broadcast %cst_8 : f32 to vector<120x1xf32>
    %12 = arith.mulf %11, %10 : vector<120x1xf32>
    %cst_9 = arith.constant 58.8120651 : f32
    %13 = vector.broadcast %cst_9 : f32 to vector<120x1xf32>
    %14 = arith.addf %12, %13 : vector<120x1xf32>
    %15 = vector.extract_strided_slice %5 {offsets = [112, 0], sizes = [8, 64], strides = [1, 1]} : vector<120x64xf32> to vector<8x64xf32>
    %c0_10 = arith.constant 0 : index
    %c0_11 = arith.constant 0 : index
    %16 = vector.load %arg8[%c0_10, %c0_11] : memref<8x64xf32, #tpu.memory_space<vmem>>, vector<8x64xf32>
    tpu.vector_store %arg8[%c0_10, %c0_11], %15 {strides = array<i32>} : memref<8x64xf32, #tpu.memory_space<vmem>>, vector<8x64xf32>,
    %cst_12 = arith.constant dense<0.000000e+00> : vector<1xf32>
    %17 = vector.multi_reduction <add>, %14, %cst_12 [0] : vector<120x1xf32> to vector<1xf32>
    %18 = vector.shape_cast %17 : vector<1xf32> to vector<1x1xf32>
    %c0_13 = arith.constant 0 : index
    %c0_14 = arith.constant 0 : index
    %19 = vector.load %arg9[%c0_13, %c0_14] : memref<1x1xf32, #tpu.memory_space<vmem>>, vector<1x1xf32>
    tpu.vector_store %arg9[%c0_13, %c0_14], %18 {strides = array<i32>} : memref<1x1xf32, #tpu.memory_space<vmem>>, vector<1x1xf32>,
    %c0_15 = arith.constant 0 : index
    %c0_16 = arith.constant 0 : index
    %20 = vector.load %arg4[%c0_15, %c0_16] : memref<120x16xf32, #tpu.memory_space<vmem>>, vector<120x16xf32>
    %c0_17 = arith.constant 0 : index
    %c0_18 = arith.constant 0 : index
    %21 = vector.load %arg5[%c0_17, %c0_18] : memref<16x32xf32, #tpu.memory_space<vmem>>, vector<16x32xf32>
    %cst_19 = arith.constant dense<0.000000e+00> : vector<120x32xf32>
    %22 = tpu.matmul %20, %21, %cst_19 {dimension_numbers = #tpu.dot_dimension_numbers<[1], [0], [0], [1], [0, 0, 1, 1], [], []>} : vector<120x16xf32>, vector<16x32xf32>, vector<120x32xf32> -> vector<120x32xf32>
    %c0_20 = arith.constant 0 : index
    %c0_21 = arith.constant 0 : index
    %23 = vector.load %arg6[%c0_20, %c0_21] : memref<1x32xf32, #tpu.memory_space<vmem>>, vector<1x32xf32>
    %24 = vector.broadcast %23 : vector<1x32xf32> to vector<120x32xf32>
    %25 = arith.addf %22, %24 : vector<120x32xf32>
    %c0_22 = arith.constant 0 : index
    %c0_23 = arith.constant 0 : index
    %26 = vector.load %arg7[%c0_22, %c0_23] : memref<120x32xf32, #tpu.memory_space<vmem>>, vector<120x32xf32>
    %27 = arith.subf %26, %25 : vector<120x32xf32>
    %28 = arith.mulf %27, %27 : vector<120x32xf32>
    %cst_24 = arith.constant dense<0.000000e+00> : vector<120xf32>
    %29 = vector.multi_reduction <add>, %28, %cst_24 [1] : vector<120x32xf32> to vector<120xf32>
    %30 = vector.shape_cast %29 : vector<120xf32> to vector<120x1xf32>
    %cst_25 = arith.constant 5.000000e-01 : f32
    %31 = vector.broadcast %cst_25 : f32 to vector<120x1xf32>
    %32 = arith.mulf %31, %30 : vector<120x1xf32>
    %cst_26 = arith.constant 29.4060326 : f32
    %33 = vector.broadcast %cst_26 : f32 to vector<120x1xf32>
    %34 = arith.addf %32, %33 : vector<120x1xf32>
    %35 = vector.extract_strided_slice %25 {offsets = [112, 0], sizes = [8, 32], strides = [1, 1]} : vector<120x32xf32> to vector<8x32xf32>
    %c0_27 = arith.constant 0 : index
    %c0_28 = arith.constant 0 : index
    %36 = vector.load %arg10[%c0_27, %c0_28] : memref<8x32xf32, #tpu.memory_space<vmem>>, vector<8x32xf32>
    tpu.vector_store %arg10[%c0_27, %c0_28], %35 {strides = array<i32>} : memref<8x32xf32, #tpu.memory_space<vmem>>, vector<8x32xf32>,
    %cst_29 = arith.constant dense<0.000000e+00> : vector<1xf32>
    %37 = vector.multi_reduction <add>, %34, %cst_29 [0] : vector<120x1xf32> to vector<1xf32>
    %38 = vector.shape_cast %37 : vector<1xf32> to vector<1x1xf32>
    %c0_30 = arith.constant 0 : index
    %c0_31 = arith.constant 0 : index
    %39 = vector.load %arg11[%c0_30, %c0_31] : memref<1x1xf32, #tpu.memory_space<vmem>>, vector<1x1xf32>
    tpu.vector_store %arg11[%c0_30, %c0_31], %38 {strides = array<i32>} : memref<1x1xf32, #tpu.memory_space<vmem>>, vector<1x1xf32>,
    return
  }
}

</mosaic_0001>

<bundles_post_ra>
// kernel: poisevae_forward.5
= control target key start
LH: loop header
LB: loop body
LE: loop exit
PB: predicated region body
PF: predicated region fallthrough
CT: control target
= control target key end

     0   :  { %v742_v0 = vmov 0.0   ;;  %vm743_vm0 = vmmov 0   ;;  %vm67_vm1 = vcmask 523264   ;;  %vm153_vm2 = vcmask 261120   ;;  %s1003_s1 = inlined_call_operand.vmem [shape: f32[64,32], index: 1, kind: input, shape index: {}]   ;;  %s1004_s3 = inlined_call_operand.vmem [shape: f32[32,16], index: 3, kind: input, shape index: {}]   ;;  %s1005_s0 = inlined_call_operand.vmem [shape: f32[8,64], index: 0, kind: input, shape index: {}]   ;;  %s1006_s8 = inlined_call_operand.vmem [shape: f32[32,32], index: 8, kind: input, shape index: {}]   ;;  %s1007_s7 = inlined_call_operand.vmem [shape: f32[8,32], index: 7, kind: input, shape index: {}]   ;;  %s1008_s12 = inlined_call_operand.vmem [shape: f32[32,16], index: 12, kind: input, shape index: {}]   ;;  %s1009_s2 = inlined_call_operand.vmem [shape: f32[1,32], index: 2, kind: input, shape index: {}]   ;;  %s1010_s5 = inlined_call_operand.vmem [shape: f32[32,16], index: 5, kind: input, shape index: {}]   ;;  %s1011_s9 = inlined_call_operand.vmem [shape: f32[1,32], index: 9, kind: input, shape index: {}]   ;;  %s1012_s10 = inlined_call_operand.vmem [shape: f32[32,16], index: 10, kind: input, shape index: {}]   ;;  %s1013_s4 = inlined_call_operand.vmem [shape: f32[1,16], index: 4, kind: input, shape index: {}]   ;;  %s1014_s14 = inlined_call_operand.vmem [shape: f32[8,16], index: 14, kind: output, shape index: {0}]   ;;  %s1015_s6 = inlined_call_operand.vmem [shape: f32[1,16], index: 6, kind: input, shape index: {}]   ;;  %s1016_s13 = inlined_call_operand.vmem [shape: f32[1,16], index: 13, kind: input, shape index: {}]   ;;  %s1017_s11 = inlined_call_operand.vmem [shape: f32[1,16], index: 11, kind: input, shape index: {}]   ;;  %s1018_s16 = inlined_call_operand.vmem [shape: f32[8,16], index: 16, kind: output, shape index: {2}]   ;;  %s1019_s15 = inlined_call_operand.vmem [shape: f32[8,16], index: 15, kind: output, shape index: {1}]   ;;  %s1020_s17 = inlined_call_operand.vmem [shape: f32[8,16], index: 17, kind: output, shape index: {3}]  }
   0x1   :  { %1023 = sst [smem:[#allocation2_spill]] %s1003_s1  ;;  %658 = vmatprep.subr.mxu0 %v742_v0  ;;  %674 = vmatprep.mubr.msk.f32.mxu0 %vm743_vm0, %v742_v0  ;;  %v51_v11 = vld [vmem:[%s1005_s0] sm:$0xff]  ;;  %v331_v12 = vld [vmem:[%s1006_s8 + $0x18] sm:$0xff]  ;;  %v330_v13 = vld [vmem:[%s1006_s8 + $0x10] sm:$0xff]  ;;  %vm227_vm3 = vcmask 130048  }
   0x2   :  { %1024 = sst [smem:[#allocation3_spill]] %s1004_s3  ;;  %677 = vmatprep.subr.mxu1 %v742_v0  ;;  %685 = vmatprep.mubr.msk.f32.mxu1 %vm743_vm0, %v742_v0  ;;  %v329_v14 = vld [vmem:[%s1006_s8 + $0x8] sm:$0xff]  ;;  %v328_v15 = vld [vmem:[%s1006_s8] sm:$0xff]  ;;  %v501_v19 = vld [vmem:[%s1008_s12 + $0x18] sm:$0xff] }
   0x3   :  { %s1025_s26 = sld [smem:[#allocation2_spill]]  ;;  %v327_v16 = vld [vmem:[%s1007_s7] sm:$0xff]  ;;  %v500_v20 = vld [vmem:[%s1008_s12 + $0x10] sm:$0xff]  ;;  %v499_v21 = vld [vmem:[%s1008_s12 + $0x8] sm:$0xff] }
   0x4   :  { %s1026_s20 = sld [smem:[#allocation3_spill]]  ;;  %v498_v22 = vld [vmem:[%s1008_s12] sm:$0xff]  ;;  %v232_v28 = vld [vmem:[%s1010_s5 + $0x18] sm:$0xff]  ;;  %v231_v29 = vld [vmem:[%s1010_s5 + $0x10] sm:$0xff] }
   0x5   :  { %v612_v23 = vld [vmem:[%s1009_s2] ss:$0 sm:$0xff]  ;;  %v230_v31 = vld [vmem:[%s1010_s5 + $0x8] sm:$0xff]  ;;  %v416_v37 = vld [vmem:[%s1012_s10 + $0x18] sm:$0xff] }
   0x6   :  { %v618_v30 = vld [vmem:[%s1011_s9] ss:$0 sm:$0xff]  ;;  %v415_v38 = vld [vmem:[%s1012_s10 + $0x10] sm:$0xff]  ;;  %v414_v39 = vld [vmem:[%s1012_s10 + $0x8] sm:$0xff] }
   0x7   :  { %v229_v34 = vld [vmem:[%s1010_s5] sm:$0xff] }
   0x8   :  { %v413_v40 = vld [vmem:[%s1012_s10] sm:$0xff] }
   0x9   :  { %v59_v1 = vld [vmem:[%s1025_s26 + $0x38] sm:$0xff]  ;;  %v58_v2 = vld [vmem:[%s1025_s26 + $0x30] sm:$0xff]  ;;  %v57_v3 = vld [vmem:[%s1025_s26 + $0x28] sm:$0xff] }
   0xa   :  { %659 = vmatpush3.msra.mxu0 %v59_v1  ;;  %v56_v4 = vld [vmem:[%s1025_s26 + $0x20] sm:$0xff]  ;;  %v145_v5 = vld [vmem:[%s1026_s20 + $0x18] sm:$0xff]  ;;  %v144_v6 = vld [vmem:[%s1026_s20 + $0x10] sm:$0xff] }
   0xb   :  { %660 = vmatprep.subr.mxu0 %v742_v0  ;;  %678 = vmatpush3.msra.mxu1 %v145_v5  ;;  %v55_v7 = vld [vmem:[%s1025_s26 + $0x18] sm:$0xff]  ;;  %v54_v8 = vld [vmem:[%s1025_s26 + $0x10] sm:$0xff]  ;;  %v53_v9 = vld [vmem:[%s1025_s26 + $0x8] sm:$0xff] }
   0xc   :  { %661 = vmatpush3.msra.mxu0 %v58_v2  ;;  %679 = vmatprep.subr.mxu1 %v742_v0  ;;  %v52_v10 = vld [vmem:[%s1025_s26] sm:$0xff]  ;;  %v143_v17 = vld [vmem:[%s1026_s20 + $0x8] sm:$0xff] }
   0xd   :  { %662 = vmatprep.subr.mxu0 %v742_v0  ;;  %680 = vmatpush3.msra.mxu1 %v144_v6  ;;  %v142_v18 = vld [vmem:[%s1026_s20] sm:$0xff] }
   0xe   :  { %663 = vmatpush3.msra.mxu0 %v57_v3  ;;  %681 = vmatprep.subr.mxu1 %v742_v0  ;;  %v614_v41 = vld [vmem:[%s1013_s4] ss:$0 sm:$0xff] }
   0xf   :  { %664 = vmatprep.subr.mxu0 %v742_v0  ;;  %682 = vmatpush3.msra.mxu1 %v143_v17  ;;  %v616_v45 = vld [vmem:[%s1015_s6] ss:$0 sm:$0xff] }
  0x10   :  { %665 = vmatpush3.msra.mxu0 %v56_v4  ;;  %683 = vmatprep.subr.mxu1 %v742_v0  ;;  %v622_v46 = vld [vmem:[%s1016_s13] ss:$0 sm:$0xff] }
  0x11   :  { %666 = vmatprep.subr.mxu0 %v742_v0  ;;  %684 = vmatpush3.msra.mxu1 %v142_v18  ;;  %v620_v57 = vld [vmem:[%s1017_s11] ss:$0 sm:$0xff] }
  0x12   :  { %667 = vmatpush3.msra.mxu0 %v55_v7  ;;  %688 = vmatprep.subr.mxu1 %v742_v0 }
  0x13   :  { %668 = vmatprep.subr.mxu0 %v742_v0 }
  0x14   :  { %669 = vmatpush3.msra.mxu0 %v54_v8 }
  0x15   :  { %670 = vmatprep.subr.mxu0 %v742_v0 }
  0x16   :  { %671 = vmatpush3.msra.mxu0 %v53_v9 }
  0x17   :  { %672 = vmatprep.subr.mxu0 %v742_v0 }
  0x18   :  { %673 = vmatpush3.msra.mxu0 %v52_v10 }
  0x19   :  { %675 = vmatmul.mubr.msk.f32.vlgmr.msra.gmra.mxu0 %vm67_vm1, %v51_v11  ;;  %699 = vmatprep.subr.mxu0 %v742_v0 }
  0x1a   :  { %700 = vmatpush3.msra.mxu0 %v331_v12  ;;  %707 = vmatprep.mubr.msk.f32.mxu0 %vm743_vm0, %v742_v0 }
  0x1b   :  { %701 = vmatprep.subr.mxu0 %v742_v0 }
  0x1c   :  { %702 = vmatpush3.msra.mxu0 %v330_v13 }
  0x1d   :  { %703 = vmatprep.subr.mxu0 %v742_v0 }
  0x1e   :  { %704 = vmatpush3.msra.mxu0 %v329_v14 }
  0x1f   :  { %705 = vmatprep.subr.mxu0 %v742_v0 }
  0x20   :  { %706 = vmatpush3.msra.mxu0 %v328_v15 }
  0x21   :  { %708 = vmatmul.mubr.msk.f32.vlgmr.msra.gmra.mxu0 %vm153_vm2, %v327_v16  ;;  %721 = vmatprep.subr.mxu0 %v742_v0 }
  0x22   :  { %729 = vmatprep.mubr.msk.f32.mxu0 %vm743_vm0, %v742_v0  ;;  %722 = vmatpush3.msra.mxu0 %v501_v19 }
  0x23   :  { %723 = vmatprep.subr.mxu0 %v742_v0 }
  0x24   :  { %724 = vmatpush3.msra.mxu0 %v500_v20 }
  0x25   :  { %725 = vmatprep.subr.mxu0 %v742_v0 }
  0x26   :  { %726 = vmatpush3.msra.mxu0 %v499_v21 }
  0x27   :  { %727 = vmatprep.subr.mxu0 %v742_v0 }
  0x28   :  { %728 = vmatpush3.msra.mxu0 %v498_v22 }
  0xd9   :  { %v137_v24 = vpop.f32.mrf.mxu0 }
  0xda   :  { %v138_v25 = vadd.f32 %v612_v23, %v137_v24 }
  0xdb   :  { %v676_v26 = vpop.f32.mrf.mxu0 }
  0xdc   :  { %v141_v27 = vmax.f32 %v138_v25, 0.0 }
  0xde   :  { %686 = vmatmul.mubr.msk.f32.vlgmr.msra.gmra.mxu1 %vm153_vm2, %v141_v27 }
  0xdf   :  { %689 = vmatpush3.msra.mxu1 %v232_v28  ;;  %696 = vmatprep.mubr.msk.f32.mxu1 %vm743_vm0, %v742_v0 }
  0xe0   :  { %690 = vmatprep.subr.mxu1 %v742_v0 }
  0xe1   :  { %691 = vmatpush3.msra.mxu1 %v231_v29  ;;  %v408_v32 = vpop.f32.mrf.mxu0 }
  0xe2   :  { %692 = vmatprep.subr.mxu1 %v742_v0  ;;  %v409_v33 = vadd.f32 %v618_v30, %v408_v32 }
  0xe3   :  { %693 = vmatpush3.msra.mxu1 %v230_v31  ;;  %v709_v35 = vpop.f32.mrf.mxu0 }
  0xe4   :  { %v412_v36 = vmax.f32 %v409_v33, 0.0  ;;  %694 = vmatprep.subr.mxu1 %v742_v0 }
  0xe5   :  { %695 = vmatpush3.msra.mxu1 %v229_v34 }
  0xe6   :  { %697 = vmatmul.mubr.msk.f32.vlgmr.msra.gmra.mxu1 %vm153_vm2, %v141_v27  ;;  %710 = vmatprep.subr.mxu1 %v742_v0 }
  0xe7   :  { %711 = vmatpush3.msra.mxu1 %v416_v37  ;;  %730 = vmatmul.mubr.msk.f32.vlgmr.msra.gmra.mxu0 %vm153_vm2, %v412_v36 }
  0xe8   :  { %712 = vmatprep.subr.mxu1 %v742_v0  ;;  %718 = vmatprep.mubr.msk.f32.mxu1 %vm743_vm0, %v742_v0 }
  0xe9   :  { %713 = vmatpush3.msra.mxu1 %v415_v38 }
  0xea   :  { %714 = vmatprep.subr.mxu1 %v742_v0 }
  0xeb   :  { %715 = vmatpush3.msra.mxu1 %v414_v39 }
  0xec   :  { %716 = vmatprep.subr.mxu1 %v742_v0 }
  0xed   :  { %717 = vmatpush3.msra.mxu1 %v413_v40 }
  0xee   :  { %719 = vmatmul.mubr.msk.f32.vlgmr.msra.gmra.mxu1 %vm153_vm2, %v412_v36 }
 0x19e   :  { %v223_v42 = vpop.f32.mrf.mxu1 }
 0x19f   :  { %v224_v43 = vadd.f32 %v614_v41, %v223_v42 }
 0x1a0   :  { %v687_v44 = vpop.f32.mrf.mxu1 }
 0x1a1   :  { %228 = vst.msk [vmem:[%s1014_s14] sm:$0xff] %vm227_vm3, %v224_v43 }
 0x1a6   :  { %v306_v47 = vpop.f32.mrf.mxu1 }
 0x1a7   :  { %v307_v48 = vadd.f32 %v616_v45, %v306_v47  ;;  %v575_v49 = vpop.f32.mrf.mxu0 }
 0x1a8   :  { %v576_v50 = vadd.f32 %v622_v46, %v575_v49  ;;  %v698_v51 = vpop.f32.mrf.mxu1 }
 0x1a9   :  { %v311_v52 = vand.u32 2147483647, %v307_v48  ;;  %v731_v53 = vpop.f32.mrf.mxu0  ;;  %v310_v13 = vmax.f32 %v307_v48, 0.0 }
 0x1aa   :  { %v580_v54 = vand.u32 2147483647, %v576_v50  ;;  %v579_v17 = vmax.f32 %v576_v50, 0.0 }
 0x1ab   :  { %v312_v55 = vsub.f32 0.0, %v311_v52 }
 0x1ac   :  { %v581_v56 = vsub.f32 0.0, %v580_v54 }
 0x1ad   :  { %v313_v58 = vmul.f32 1.442695, %v312_v55 }
 0x1ae   :  { %v582_v59 = vmul.f32 1.442695, %v581_v56  ;;  %v493_v60 = vpop.f32.mrf.mxu1 }
 0x1af   :  { %734 = vpow2.f32 %v313_v58  ;;  %v494_v61 = vadd.f32 %v620_v57, %v493_v60 }
 0x1b0   :  { %736 = vpow2.f32 %v582_v59  ;;  %v720_v62 = vpop.f32.mrf.mxu1 }
 0x1b1   :  { %497 = vst.msk [vmem:[%s1018_s16] sm:$0xff] %vm227_vm3, %v494_v61 }
 0x1bc   :  { %v735_v63 = vpop.eup %734 }
 0x1bd   :  { %v737_v0 = vpop.eup %736  ;;  %v315_v1 = vadd.f32 1.0, %v735_v63  ;;  %v318_v3 = vmul.f32 -0.5, %v735_v63  ;;  %v321_v6 = vand.u32 2147483647, %v735_v63 }
 0x1be   :  { %v584_v2 = vadd.f32 1.0, %v737_v0  ;;  %v587_v4 = vmul.f32 -0.5, %v737_v0  ;;  %v590_v8 = vand.u32 2147483647, %v737_v0 }
 0x1bf   :  { %738 = vlog2.f32 %v315_v1  ;;  %v319_v5 = vadd.f32 1.0, %v318_v3  ;;  %vm322_vm4 = vcmp.lt.f32.partialorder %v321_v6, 0.0004427343 }
 0x1c0   :  { %740 = vlog2.f32 %v584_v2  ;;  %v588_v7 = vadd.f32 1.0, %v587_v4  ;;  %vm591_vm5 = vcmp.lt.f32.partialorder %v590_v8, 0.0004427343 }
 0x1c1   :  { %v320_v12 = vmul.f32 %v735_v63, %v319_v5 }
 0x1c2   :  { %v589_v15 = vmul.f32 %v737_v0, %v588_v7 }
 0x1cc   :  { %v739_v9 = vpop.eup %738 }
 0x1cd   :  { %v741_v10 = vpop.eup %740  ;;  %v317_v11 = vmul.f32 0.6931472, %v739_v9 }
 0x1ce   :  { %v586_v14 = vmul.f32 0.6931472, %v741_v10 }
 0x1cf   :  { %v323_v16 = vsel %vm322_vm4, %v320_v12, %v317_v11 }
 0x1d0   :  { %v324_v18 = vadd.f32 %v323_v16, %v310_v13  ;;  %v592_v19 = vsel %vm591_vm5, %v589_v15, %v586_v14 }
 0x1d1   :  { %v593_v20 = vadd.f32 %v592_v19, %v579_v17 }
 0x1d2   :  { %v325_v21 = vsub.f32 0.0, %v324_v18 }
 0x1d3   :  { %v594_v22 = vsub.f32 0.0, %v593_v20 }
 0x1d4   :  { %326 = vst.msk [vmem:[%s1019_s15] sm:$0xff] %vm227_vm3, %v325_v21 }
 0x1d5   :  { %595 = vst.msk [vmem:[%s1020_s17] sm:$0xff] %vm227_vm3, %v594_v22 }

// kernel: poisevae_forward.7
= control target key start
LH: loop header
LB: loop body
LE: loop exit
PB: predicated region body
PF: predicated region fallthrough
CT: control target
= control target key end

     0   :  { %17 = vsyncpa [#allocation3], 0  ;;  %s1489_s0 = inlined_call_operand.vmem [shape: f32[120,16], index: 0, kind: input, shape index: {}]   ;;  %s1490_s1 = inlined_call_operand.vmem [shape: f32[16,64], index: 1, kind: input, shape index: {}]   ;;  %s1491_s2 = inlined_call_operand.vmem [shape: f32[1,64], index: 2, kind: input, shape index: {}]   ;;  %s1492_s3 = inlined_call_operand.vmem [shape: f32[120,64], index: 3, kind: input, shape index: {}]   ;;  %s1493_s4 = inlined_call_operand.vmem [shape: f32[120,16], index: 4, kind: input, shape index: {}]   ;;  %s1494_s5 = inlined_call_operand.vmem [shape: f32[16,32], index: 5, kind: input, shape index: {}]   ;;  %s1495_s6 = inlined_call_operand.vmem [shape: f32[1,32], index: 6, kind: input, shape index: {}]   ;;  %s1496_s7 = inlined_call_operand.vmem [shape: f32[120,32], index: 7, kind: input, shape index: {}]   ;;  %s1497_s8 = inlined_call_operand.hbm [shape: f32[8,64], index: 8, kind: output, shape index: {0}]   ;;  %s1498_s9 = inlined_call_operand.hbm [shape: f32[1,1], index: 9, kind: output, shape index: {1}]   ;;  %s1499_s10 = inlined_call_operand.hbm [shape: f32[8,32], index: 10, kind: output, shape index: {2}]   ;;  %s1500_s11 = inlined_call_operand.hbm [shape: f32[1,1], index: 11, kind: output, shape index: {3}]  }
   0x1   :  { %18 = vsyncpa [#allocation5], 0  ;;  %v52_v0 = vld [vmem:[%s1490_s1 + $0x8] sm:$0xff]  ;;  %v1053_v2 = vmov 0.0   ;;  %v51_v3 = vld [vmem:[%s1490_s1] sm:$0xff]  ;;  %vm60_vm0 = vcmask 130048  }
   0x2   :  { %v406_v1 = vld [vmem:[%s1494_s5 + $0x8] sm:$0xff]  ;;  %863 = vmatprep.subr.mxu0 %v1053_v2  ;;  %912 = vmatprep.subr.mxu1 %v1053_v2  ;;  %v405_v4 = vld [vmem:[%s1494_s5] sm:$0xff]  ;;  %vm1054_vm1 = vmmov 0   ;;  %v38_v9 = vld [vmem:[%s1489_s0 + $0x10] sm:$0xff] }
   0x3   :  { %864 = vmatpush3.msra.mxu0 %v52_v0  ;;  %913 = vmatpush3.msra.mxu1 %v406_v1  ;;  %v36_v5 = vld [vmem:[%s1489_s0] sm:$0xff]  ;;  %v37_v7 = vld [vmem:[%s1489_s0 + $0x8] sm:$0xff]  ;;  %v392_v10 = vld [vmem:[%s1493_s4 + $0x10] sm:$0xff] }
   0x4   :  { %865 = vmatprep.subr.mxu0 %v1053_v2  ;;  %914 = vmatprep.subr.mxu1 %v1053_v2  ;;  %v390_v6 = vld [vmem:[%s1493_s4] sm:$0xff]  ;;  %v391_v8 = vld [vmem:[%s1493_s4 + $0x8] sm:$0xff] }
   0x5   :  { %866 = vmatpush3.msra.mxu0 %v51_v3  ;;  %867 = vmatprep.mubr.msk.f32.mxu0 %vm1054_vm1, %v1053_v2 }
   0x6   :  { %915 = vmatpush3.msra.mxu1 %v405_v4  ;;  %916 = vmatprep.mubr.msk.f32.mxu1 %vm1054_vm1, %v1053_v2 }
   0x7   :  { %868 = vmatmul.mubr.msk.f32.vlgmr.msra.gmra.mxu0 %vm60_vm0, %v36_v5  ;;  %917 = vmatmul.mubr.msk.f32.vlgmr.msra.gmra.mxu1 %vm60_vm0, %v390_v6 }
   0x8   :  { %870 = vmatprep.mubr.msk.f32.mxu0 %vm1054_vm1, %v1053_v2  ;;  %919 = vmatprep.mubr.msk.f32.mxu1 %vm1054_vm1, %v1053_v2 }
   0xb   :  { %871 = vmatmul.mubr.msk.f32.gmra.mxu0 %vm60_vm0, %v37_v7  ;;  %920 = vmatmul.mubr.msk.f32.gmra.mxu1 %vm60_vm0, %v391_v8 }
   0xc   :  { %873 = vmatprep.mubr.msk.f32.mxu0 %vm1054_vm1, %v1053_v2  ;;  %922 = vmatprep.mubr.msk.f32.mxu1 %vm1054_vm1, %v1053_v2 }
   0xd   :  { %19 = vsyncpa [#allocation8], 0  ;;  %v39_v11 = vld [vmem:[%s1489_s0 + $0x18] sm:$0xff]  ;;  %v40_v13 = vld [vmem:[%s1489_s0 + $0x20] sm:$0xff]  ;;  %vm644_vm2 = vcmask 261120   ;;  %vm291_vm3 = vcmask 523264  }
   0xe   :  { %v393_v12 = vld [vmem:[%s1493_s4 + $0x18] sm:$0xff]  ;;  %v394_v14 = vld [vmem:[%s1493_s4 + $0x20] sm:$0xff]  ;;  %v41_v15 = vld [vmem:[%s1489_s0 + $0x28] sm:$0xff] }
   0xf   :  { %874 = vmatmul.mubr.msk.f32.gmra.mxu0 %vm60_vm0, %v38_v9  ;;  %923 = vmatmul.mubr.msk.f32.gmra.mxu1 %vm60_vm0, %v392_v10  ;;  %v395_v16 = vld [vmem:[%s1493_s4 + $0x28] sm:$0xff]  ;;  %v42_v17 = vld [vmem:[%s1489_s0 + $0x30] sm:$0xff]  ;;  %v43_v19 = vld [vmem:[%s1489_s0 + $0x38] sm:$0xff] }
  0x10   :  { %876 = vmatprep.mubr.msk.f32.mxu0 %vm1054_vm1, %v1053_v2  ;;  %925 = vmatprep.mubr.msk.f32.mxu1 %vm1054_vm1, %v1053_v2  ;;  %v396_v18 = vld [vmem:[%s1493_s4 + $0x30] sm:$0xff]  ;;  %v397_v20 = vld [vmem:[%s1493_s4 + $0x38] sm:$0xff]  ;;  %v44_v21 = vld [vmem:[%s1489_s0 + $0x40] sm:$0xff] }
  0x11   :  { %v398_v22 = vld [vmem:[%s1493_s4 + $0x40] sm:$0xff]  ;;  %v45_v23 = vld [vmem:[%s1489_s0 + $0x48] sm:$0xff]  ;;  %v46_v25 = vld [vmem:[%s1489_s0 + $0x50] sm:$0xff] }
  0x12   :  { %v399_v24 = vld [vmem:[%s1493_s4 + $0x48] sm:$0xff]  ;;  %v400_v26 = vld [vmem:[%s1493_s4 + $0x50] sm:$0xff]  ;;  %v47_v27 = vld [vmem:[%s1489_s0 + $0x58] sm:$0xff] }
  0x13   :  { %877 = vmatmul.mubr.msk.f32.gmra.mxu0 %vm60_vm0, %v39_v11  ;;  %926 = vmatmul.mubr.msk.f32.gmra.mxu1 %vm60_vm0, %v393_v12  ;;  %v401_v28 = vld [vmem:[%s1493_s4 + $0x58] sm:$0xff]  ;;  %v48_v29 = vld [vmem:[%s1489_s0 + $0x60] sm:$0xff]  ;;  %v49_v31 = vld [vmem:[%s1489_s0 + $0x68] sm:$0xff] }
  0x14   :  { %879 = vmatprep.mubr.msk.f32.mxu0 %vm1054_vm1, %v1053_v2  ;;  %928 = vmatprep.mubr.msk.f32.mxu1 %vm1054_vm1, %v1053_v2  ;;  %v402_v30 = vld [vmem:[%s1493_s4 + $0x60] sm:$0xff]  ;;  %v403_v32 = vld [vmem:[%s1493_s4 + $0x68] sm:$0xff]  ;;  %v50_v33 = vld [vmem:[%s1489_s0 + $0x70] sm:$0xff] }
  0x15   :  { %v404_v34 = vld [vmem:[%s1493_s4 + $0x70] sm:$0xff]  ;;  %v1318_v35 = vld [vmem:[%s1491_s2] ss:$0 sm:$0xff]  ;;  %v247_v48 = vld [vmem:[%s1492_s3 + $0x8] sm:$0xff] }
  0x16   :  { %v1323_v36 = vld [vmem:[%s1495_s6] ss:$0 sm:$0xff]  ;;  %v600_v50 = vld [vmem:[%s1496_s7 + $0x8] sm:$0xff]  ;;  %v601_v62 = vld [vmem:[%s1496_s7 + $0x10] sm:$0xff] }
  0x17   :  { %880 = vmatmul.mubr.msk.f32.gmra.mxu0 %vm60_vm0, %v40_v13  ;;  %929 = vmatmul.mubr.msk.f32.gmra.mxu1 %vm60_vm0, %v394_v14  ;;  %v599_v39 = vld [vmem:[%s1496_s7] sm:$0xff]  ;;  %v248_v0 = vld [vmem:[%s1492_s3 + $0x10] sm:$0xff]  ;;  %v602_v12 = vld [vmem:[%s1496_s7 + $0x18] sm:$0xff] }
  0x18   :  { %882 = vmatprep.mubr.msk.f32.mxu0 %vm1054_vm1, %v1053_v2  ;;  %931 = vmatprep.mubr.msk.f32.mxu1 %vm1054_vm1, %v1053_v2  ;;  %v246_v40 = vld [vmem:[%s1492_s3] sm:$0xff]  ;;  %v249_v14 = vld [vmem:[%s1492_s3 + $0x18] sm:$0xff] }
  0x1b   :  { %883 = vmatmul.mubr.msk.f32.gmra.mxu0 %vm60_vm0, %v41_v15  ;;  %932 = vmatmul.mubr.msk.f32.gmra.mxu1 %vm60_vm0, %v395_v16 }
  0x1c   :  { %885 = vmatprep.mubr.msk.f32.mxu0 %vm1054_vm1, %v1053_v2  ;;  %934 = vmatprep.mubr.msk.f32.mxu1 %vm1054_vm1, %v1053_v2 }
  0x1f   :  { %886 = vmatmul.mubr.msk.f32.gmra.mxu0 %vm60_vm0, %v42_v17  ;;  %935 = vmatmul.mubr.msk.f32.gmra.mxu1 %vm60_vm0, %v396_v18 }
  0x20   :  { %888 = vmatprep.mubr.msk.f32.mxu0 %vm1054_vm1, %v1053_v2  ;;  %937 = vmatprep.mubr.msk.f32.mxu1 %vm1054_vm1, %v1053_v2 }
  0x23   :  { %889 = vmatmul.mubr.msk.f32.gmra.mxu0 %vm60_vm0, %v43_v19  ;;  %938 = vmatmul.mubr.msk.f32.gmra.mxu1 %vm60_vm0, %v397_v20 }
  0x24   :  { %891 = vmatprep.mubr.msk.f32.mxu0 %vm1054_vm1, %v1053_v2  ;;  %940 = vmatprep.mubr.msk.f32.mxu1 %vm1054_vm1, %v1053_v2 }
  0x27   :  { %892 = vmatmul.mubr.msk.f32.gmra.mxu0 %vm60_vm0, %v44_v21  ;;  %941 = vmatmul.mubr.msk.f32.gmra.mxu1 %vm60_vm0, %v398_v22 }
  0x28   :  { %894 = vmatprep.mubr.msk.f32.mxu0 %vm1054_vm1, %v1053_v2  ;;  %943 = vmatprep.mubr.msk.f32.mxu1 %vm1054_vm1, %v1053_v2 }
  0x2b   :  { %895 = vmatmul.mubr.msk.f32.gmra.mxu0 %vm60_vm0, %v45_v23  ;;  %944 = vmatmul.mubr.msk.f32.gmra.mxu1 %vm60_vm0, %v399_v24 }
  0x2c   :  { %897 = vmatprep.mubr.msk.f32.mxu0 %vm1054_vm1, %v1053_v2  ;;  %946 = vmatprep.mubr.msk.f32.mxu1 %vm1054_vm1, %v1053_v2 }
  0x2f   :  { %898 = vmatmul.mubr.msk.f32.gmra.mxu0 %vm60_vm0, %v46_v25  ;;  %947 = vmatmul.mubr.msk.f32.gmra.mxu1 %vm60_vm0, %v400_v26  ;;  %v603_v26 = vld [vmem:[%s1496_s7 + $0x20] sm:$0xff] }
  0x30   :  { %900 = vmatprep.mubr.msk.f32.mxu0 %vm1054_vm1, %v1053_v2  ;;  %949 = vmatprep.mubr.msk.f32.mxu1 %vm1054_vm1, %v1053_v2 }
  0x33   :  { %901 = vmatmul.mubr.msk.f32.gmra.mxu0 %vm60_vm0, %v47_v27  ;;  %950 = vmatmul.mubr.msk.f32.gmra.mxu1 %vm60_vm0, %v401_v28  ;;  %v250_v28 = vld [vmem:[%s1492_s3 + $0x20] sm:$0xff] }
  0x34   :  { %903 = vmatprep.mubr.msk.f32.mxu0 %vm1054_vm1, %v1053_v2  ;;  %952 = vmatprep.mubr.msk.f32.mxu1 %vm1054_vm1, %v1053_v2 }
  0x37   :  { %904 = vmatmul.mubr.msk.f32.gmra.mxu0 %vm60_vm0, %v48_v29  ;;  %953 = vmatmul.mubr.msk.f32.gmra.mxu1 %vm60_vm0, %v402_v30 }
  0x38   :  { %906 = vmatprep.mubr.msk.f32.mxu0 %vm1054_vm1, %v1053_v2  ;;  %955 = vmatprep.mubr.msk.f32.mxu1 %vm1054_vm1, %v1053_v2 }
  0x3b   :  { %907 = vmatmul.mubr.msk.f32.gmra.mxu0 %vm60_vm0, %v49_v31  ;;  %956 = vmatmul.mubr.msk.f32.gmra.mxu1 %vm60_vm0, %v403_v32 }
  0x3c   :  { %909 = vmatprep.mubr.msk.f32.mxu0 %vm1054_vm1, %v1053_v2  ;;  %958 = vmatprep.mubr.msk.f32.mxu1 %vm1054_vm1, %v1053_v2 }
  0x3f   :  { %910 = vmatmul.mubr.msk.f32.gmra.mxu0 %vm60_vm0, %v50_v33  ;;  %959 = vmatmul.mubr.msk.f32.gmra.mxu1 %vm60_vm0, %v404_v34 }
  0xc7   :  { %v172_v37 = vpop.f32.mrf.mxu0  ;;  %v525_v38 = vpop.f32.mrf.mxu1 }
  0xc8   :  { %v173_v41 = vadd.f32 %v1318_v35, %v172_v37  ;;  %v526_v42 = vadd.f32 %v1323_v36, %v525_v38 }
  0xc9   :  { %v869_v43 = vpop.f32.mrf.mxu0  ;;  %v918_v44 = vpop.f32.mrf.mxu1 }
  0xca   :  { %v614_v45 = vsub.f32 %v599_v39, %v526_v42  ;;  %v261_v46 = vsub.f32 %v246_v40, %v173_v41  ;;  %v604_v42 = vld [vmem:[%s1496_s7 + $0x28] sm:$0xff] }
  0xcb   :  { %v177_v47 = vpop.f32.mrf.mxu0  ;;  %v530_v49 = vpop.f32.mrf.mxu1  ;;  %v251_v44 = vld [vmem:[%s1492_s3 + $0x28] sm:$0xff] }
  0xcc   :  { %v178_v51 = vadd.f32 %v1318_v35, %v177_v47  ;;  %v531_v52 = vadd.f32 %v1323_v36, %v530_v49  ;;  %v629_v53 = vmul.f32 %v614_v45, %v614_v45  ;;  %v276_v54 = vmul.f32 %v261_v46, %v261_v46 }
  0xcd   :  { %v872_v55 = vpop.f32.mrf.mxu0  ;;  %v921_v56 = vpop.f32.mrf.mxu1 }
  0xce   :  { %v262_v57 = vsub.f32 %v247_v48, %v178_v51  ;;  %v615_v58 = vsub.f32 %v600_v50, %v531_v52  ;;  %v645_v59 = vsel %vm644_vm2, %v629_v53, 0.0  ;;  %v292_v60 = vsel %vm291_vm3, %v276_v54, 0.0  ;;  %v605_v56 = vld [vmem:[%s1496_s7 + $0x30] sm:$0xff] }
  0xcf   :  { %646 = vadd.xlane.f32.xlu1 %v645_v59  ;;  %v535_v61 = vpop.f32.mrf.mxu1  ;;  %293 = vadd.xlane.f32.xlu0 %v292_v60  ;;  %v182_v63 = vpop.f32.mrf.mxu0 }
  0xd0   :  { %v536_v1 = vadd.f32 %v1323_v36, %v535_v61  ;;  %v183_v2 = vadd.f32 %v1318_v35, %v182_v63  ;;  %v630_v3 = vmul.f32 %v615_v58, %v615_v58  ;;  %v277_v4 = vmul.f32 %v262_v57, %v262_v57  ;;  %v252_v58 = vld [vmem:[%s1492_s3 + $0x30] sm:$0xff] }
  0xd1   :  { %v875_v5 = vpop.f32.mrf.mxu0  ;;  %v924_v6 = vpop.f32.mrf.mxu1 }
  0xd2   :  { %v616_v7 = vsub.f32 %v601_v62, %v536_v1  ;;  %v263_v8 = vsub.f32 %v248_v0, %v183_v2  ;;  %v648_v9 = vsel %vm644_vm2, %v630_v3, 0.0  ;;  %v295_v10 = vsel %vm291_vm3, %v277_v4, 0.0  ;;  %v606_v6 = vld [vmem:[%s1496_s7 + $0x38] sm:$0xff] }
  0xd3   :  { %649 = vadd.xlane.f32.xlu1 %v648_v9  ;;  %v540_v11 = vpop.f32.mrf.mxu1  ;;  %296 = vadd.xlane.f32.xlu0 %v295_v10  ;;  %v187_v13 = vpop.f32.mrf.mxu0 }
  0xd4   :  { %v541_v15 = vadd.f32 %v1323_v36, %v540_v11  ;;  %v188_v16 = vadd.f32 %v1318_v35, %v187_v13  ;;  %v631_v17 = vmul.f32 %v616_v7, %v616_v7  ;;  %v278_v18 = vmul.f32 %v263_v8, %v263_v8  ;;  %v253_v8 = vld [vmem:[%s1492_s3 + $0x38] sm:$0xff] }
  0xd5   :  { %v878_v19 = vpop.f32.mrf.mxu0  ;;  %v927_v20 = vpop.f32.mrf.mxu1 }
  0xd6   :  { %v617_v21 = vsub.f32 %v602_v12, %v541_v15  ;;  %v264_v22 = vsub.f32 %v249_v14, %v188_v16  ;;  %v651_v23 = vsel %vm644_vm2, %v631_v17, 0.0  ;;  %v298_v24 = vsel %vm291_vm3, %v278_v18, 0.0  ;;  %v607_v20 = vld [vmem:[%s1496_s7 + $0x40] sm:$0xff] }
  0xd7   :  { %652 = vadd.xlane.f32.xlu1 %v651_v23  ;;  %v545_v25 = vpop.f32.mrf.mxu1  ;;  %299 = vadd.xlane.f32.xlu0 %v298_v24  ;;  %v192_v27 = vpop.f32.mrf.mxu0 }
  0xd8   :  { %v546_v29 = vadd.f32 %v1323_v36, %v545_v25  ;;  %v193_v30 = vadd.f32 %v1318_v35, %v192_v27  ;;  %v632_v31 = vmul.f32 %v617_v21, %v617_v21  ;;  %v279_v32 = vmul.f32 %v264_v22, %v264_v22  ;;  %v254_v22 = vld [vmem:[%s1492_s3 + $0x40] sm:$0xff] }
  0xd9   :  { %v881_v33 = vpop.f32.mrf.mxu0  ;;  %v930_v34 = vpop.f32.mrf.mxu1 }
  0xda   :  { %v618_v37 = vsub.f32 %v603_v26, %v546_v29  ;;  %v265_v38 = vsub.f32 %v250_v28, %v193_v30  ;;  %v654_v39 = vsel %vm644_vm2, %v632_v31, 0.0  ;;  %v301_v40 = vsel %vm291_vm3, %v279_v32, 0.0  ;;  %v608_v34 = vld [vmem:[%s1496_s7 + $0x48] sm:$0xff] }
  0xdb   :  { %655 = vadd.xlane.f32.xlu1 %v654_v39  ;;  %v550_v41 = vpop.f32.mrf.mxu1  ;;  %302 = vadd.xlane.f32.xlu0 %v301_v40  ;;  %v197_v43 = vpop.f32.mrf.mxu0 }
  0xdc   :  { %v551_v45 = vadd.f32 %v1323_v36, %v550_v41  ;;  %v198_v46 = vadd.f32 %v1318_v35, %v197_v43  ;;  %v633_v47 = vmul.f32 %v618_v37, %v618_v37  ;;  %v280_v48 = vmul.f32 %v265_v38, %v265_v38  ;;  %v255_v38 = vld [vmem:[%s1492_s3 + $0x48] sm:$0xff] }
  0xdd   :  { %v884_v49 = vpop.f32.mrf.mxu0  ;;  %v933_v50 = vpop.f32.mrf.mxu1 }
  0xde   :  { %v619_v51 = vsub.f32 %v604_v42, %v551_v45  ;;  %v266_v52 = vsub.f32 %v251_v44, %v198_v46  ;;  %v657_v53 = vsel %vm644_vm2, %v633_v47, 0.0  ;;  %v304_v54 = vsel %vm291_vm3, %v280_v48, 0.0  ;;  %v609_v50 = vld [vmem:[%s1496_s7 + $0x50] sm:$0xff] }
  0xdf   :  { %658 = vadd.xlane.f32.xlu1 %v657_v53  ;;  %v555_v55 = vpop.f32.mrf.mxu1  ;;  %305 = vadd.xlane.f32.xlu0 %v304_v54  ;;  %v202_v57 = vpop.f32.mrf.mxu0 }
  0xe0   :  { %v556_v59 = vadd.f32 %v1323_v36, %v555_v55  ;;  %v203_v60 = vadd.f32 %v1318_v35, %v202_v57  ;;  %v634_v61 = vmul.f32 %v619_v51, %v619_v51  ;;  %v281_v62 = vmul.f32 %v266_v52, %v266_v52  ;;  %v256_v52 = vld [vmem:[%s1492_s3 + $0x50] sm:$0xff] }
  0xe1   :  { %v887_v63 = vpop.f32.mrf.mxu0  ;;  %v936_v0 = vpop.f32.mrf.mxu1 }
  0xe2   :  { %v620_v1 = vsub.f32 %v605_v56, %v556_v59  ;;  %v267_v2 = vsub.f32 %v252_v58, %v203_v60  ;;  %v660_v3 = vsel %vm644_vm2, %v634_v61, 0.0  ;;  %v307_v4 = vsel %vm291_vm3, %v281_v62, 0.0  ;;  %v610_v0 = vld [vmem:[%s1496_s7 + $0x58] sm:$0xff] }
  0xe3   :  { %661 = vadd.xlane.f32.xlu1 %v660_v3  ;;  %v560_v5 = vpop.f32.mrf.mxu1  ;;  %308 = vadd.xlane.f32.xlu0 %v307_v4  ;;  %v207_v7 = vpop.f32.mrf.mxu0 }
  0xe4   :  { %v561_v9 = vadd.f32 %v1323_v36, %v560_v5  ;;  %v208_v10 = vadd.f32 %v1318_v35, %v207_v7  ;;  %v635_v11 = vmul.f32 %v620_v1, %v620_v1  ;;  %v282_v12 = vmul.f32 %v267_v2, %v267_v2  ;;  %v257_v2 = vld [vmem:[%s1492_s3 + $0x58] sm:$0xff] }
  0xe5   :  { %v890_v13 = vpop.f32.mrf.mxu0  ;;  %v939_v14 = vpop.f32.mrf.mxu1 }
  0xe6   :  { %v621_v15 = vsub.f32 %v606_v6, %v561_v9  ;;  %v268_v16 = vsub.f32 %v253_v8, %v208_v10  ;;  %v663_v17 = vsel %vm644_vm2, %v635_v11, 0.0  ;;  %v310_v18 = vsel %vm291_vm3, %v282_v12, 0.0  ;;  %v611_v14 = vld [vmem:[%s1496_s7 + $0x60] sm:$0xff] }
  0xe7   :  { %664 = vadd.xlane.f32.xlu1 %v663_v17  ;;  %v565_v19 = vpop.f32.mrf.mxu1  ;;  %311 = vadd.xlane.f32.xlu0 %v310_v18  ;;  %v212_v21 = vpop.f32.mrf.mxu0 }
  0xe8   :  { %v566_v23 = vadd.f32 %v1323_v36, %v565_v19  ;;  %v213_v24 = vadd.f32 %v1318_v35, %v212_v21  ;;  %v636_v25 = vmul.f32 %v621_v15, %v621_v15  ;;  %v283_v26 = vmul.f32 %v268_v16, %v268_v16  ;;  %v258_v16 = vld [vmem:[%s1492_s3 + $0x60] sm:$0xff] }
  0xe9   :  { %v893_v27 = vpop.f32.mrf.mxu0  ;;  %v942_v28 = vpop.f32.mrf.mxu1 }
  0xea   :  { %v622_v29 = vsub.f32 %v607_v20, %v566_v23  ;;  %v269_v30 = vsub.f32 %v254_v22, %v213_v24  ;;  %v666_v31 = vsel %vm644_vm2, %v636_v25, 0.0  ;;  %v313_v32 = vsel %vm291_vm3, %v283_v26, 0.0  ;;  %v612_v28 = vld [vmem:[%s1496_s7 + $0x68] sm:$0xff] }
  0xeb   :  { %667 = vadd.xlane.f32.xlu1 %v666_v31  ;;  %v570_v33 = vpop.f32.mrf.mxu1  ;;  %314 = vadd.xlane.f32.xlu0 %v313_v32  ;;  %v217_v37 = vpop.f32.mrf.mxu0 }
  0xec   :  { %v571_v39 = vadd.f32 %v1323_v36, %v570_v33  ;;  %v218_v40 = vadd.f32 %v1318_v35, %v217_v37  ;;  %v637_v41 = vmul.f32 %v622_v29, %v622_v29  ;;  %v284_v42 = vmul.f32 %v269_v30, %v269_v30  ;;  %v259_v30 = vld [vmem:[%s1492_s3 + $0x68] sm:$0xff] }
  0xed   :  { %v896_v43 = vpop.f32.mrf.mxu0  ;;  %v945_v44 = vpop.f32.mrf.mxu1 }
  0xee   :  { %v623_v45 = vsub.f32 %v608_v34, %v571_v39  ;;  %v270_v46 = vsub.f32 %v255_v38, %v218_v40  ;;  %v669_v47 = vsel %vm644_vm2, %v637_v41, 0.0  ;;  %v316_v48 = vsel %vm291_vm3, %v284_v42, 0.0  ;;  %v613_v44 = vld [vmem:[%s1496_s7 + $0x70] sm:$0xff] }
  0xef   :  { %670 = vadd.xlane.f32.xlu1 %v669_v47  ;;  %v575_v49 = vpop.f32.mrf.mxu1  ;;  %317 = vadd.xlane.f32.xlu0 %v316_v48  ;;  %v222_v51 = vpop.f32.mrf.mxu0 }
  0xf0   :  { %v576_v53 = vadd.f32 %v1323_v36, %v575_v49  ;;  %v223_v54 = vadd.f32 %v1318_v35, %v222_v51  ;;  %v638_v55 = vmul.f32 %v623_v45, %v623_v45  ;;  %v285_v56 = vmul.f32 %v270_v46, %v270_v46  ;;  %v260_v46 = vld [vmem:[%s1492_s3 + $0x70] sm:$0xff]  ;;  %s1055_s3 = smov [#allocation2]  }
  0xf1   :  { %v899_v57 = vpop.f32.mrf.mxu0  ;;  %v948_v58 = vpop.f32.mrf.mxu1  ;;  %s748_s7 = sshll.u32 %s1055_s3, 4  ;;  %s749_s7 = int_to_ptr.vmem [resolvable:$true] %s748_s7 }
  0xf2   :  { %v624_v59 = vsub.f32 %v609_v50, %v576_v53  ;;  %v271_v60 = vsub.f32 %v256_v52, %v223_v54  ;;  %v672_v61 = vsel %vm644_vm2, %v638_v55, 0.0  ;;  %v319_v62 = vsel %vm291_vm3, %v285_v56, 0.0  ;;  %s967_s30 = scalar_lea.vmem %s749_s7, 128  ;;  %p972_p1 = scmp.lt.s32.totalorder %s749_s7, %s749_s7 }
  0xf3   :  { %673 = vadd.xlane.f32.xlu1 %v672_v61  ;;  %v580_v63 = vpop.f32.mrf.mxu1  ;;  %320 = vadd.xlane.f32.xlu0 %v319_v62  ;;  %v227_v1 = vpop.f32.mrf.mxu0  ;;  %p968_p0 = scmp.ne.s32.totalorder %s749_s7, %s967_s30  ;;  %p973_p2 = scmp.lt.s32.totalorder %s967_s30, %s967_s30 }
  0xf4   :  { %v581_v3 = vadd.f32 %v1323_v36, %v580_v63  ;;  %v228_v4 = vadd.f32 %v1318_v35, %v227_v1  ;;  %v639_v5 = vmul.f32 %v624_v59, %v624_v59  ;;  %v286_v6 = vmul.f32 %v271_v60, %v271_v60 }
  0xf5   :  { %v902_v7 = vpop.f32.mrf.mxu0  ;;  %v951_v8 = vpop.f32.mrf.mxu1  ;;  %p974_p3 = por %p973_p2, %p972_p1 }
  0xf6   :  { %v625_v9 = vsub.f32 %v610_v0, %v581_v3  ;;  %v272_v10 = vsub.f32 %v257_v2, %v228_v4  ;;  %v675_v11 = vsel %vm644_vm2, %v639_v5, 0.0  ;;  %v322_v12 = vsel %vm291_vm3, %v286_v6, 0.0 }
  0xf7   :  { %676 = vadd.xlane.f32.xlu1 %v675_v11  ;;  %v585_v13 = vpop.f32.mrf.mxu1  ;;  %323 = vadd.xlane.f32.xlu0 %v322_v12  ;;  %v232_v15 = vpop.f32.mrf.mxu0  ;;  %p975_p4 = pnand %p974_p3, %p968_p0 }
  0xf8   :  { %v586_v17 = vadd.f32 %v1323_v36, %v585_v13  ;;  %v233_v18 = vadd.f32 %v1318_v35, %v232_v15  ;;  %v640_v19 = vmul.f32 %v625_v9, %v625_v9  ;;  %v287_v20 = vmul.f32 %v272_v10, %v272_v10 }
  0xf9   :  { %v905_v21 = vpop.f32.mrf.mxu0  ;;  %v954_v22 = vpop.f32.mrf.mxu1 }
  0xfa   :  { %v626_v23 = vsub.f32 %v611_v14, %v586_v17  ;;  %v273_v24 = vsub.f32 %v258_v16, %v233_v18  ;;  %v678_v25 = vsel %vm644_vm2, %v640_v19, 0.0  ;;  %v325_v26 = vsel %vm291_vm3, %v287_v20, 0.0 }
  0xfb   :  { %679 = vadd.xlane.f32.xlu1 %v678_v25  ;;  %v590_v27 = vpop.f32.mrf.mxu1  ;;  %326 = vadd.xlane.f32.xlu0 %v325_v26  ;;  %v237_v29 = vpop.f32.mrf.mxu0 }
  0xfc   :  { %v591_v31 = vadd.f32 %v1323_v36, %v590_v27  ;;  %v238_v32 = vadd.f32 %v1318_v35, %v237_v29  ;;  %v641_v33 = vmul.f32 %v626_v23, %v626_v23  ;;  %v288_v34 = vmul.f32 %v273_v24, %v273_v24 }
  0xfd   :  { %v908_v37 = vpop.f32.mrf.mxu0  ;;  %v957_v38 = vpop.f32.mrf.mxu1 }
  0xfe   :  { %v627_v39 = vsub.f32 %v612_v28, %v591_v31  ;;  %v274_v40 = vsub.f32 %v259_v30, %v238_v32  ;;  %v681_v41 = vsel %vm644_vm2, %v641_v33, 0.0  ;;  %v328_v42 = vsel %vm291_vm3, %v288_v34, 0.0 }
  0xff   :  { %682 = vadd.xlane.f32.xlu1 %v681_v41  ;;  %v595_v43 = vpop.f32.mrf.mxu1  ;;  %329 = vadd.xlane.f32.xlu0 %v328_v42  ;;  %v242_v45 = vpop.f32.mrf.mxu0 }
 0x100   :  { %v596_v47 = vadd.f32 %v1323_v36, %v595_v43  ;;  %v243_v48 = vadd.f32 %v1318_v35, %v242_v45  ;;  %v642_v49 = vmul.f32 %v627_v39, %v627_v39  ;;  %v289_v50 = vmul.f32 %v274_v40, %v274_v40 }
 0x101   :  { %v911_v51 = vpop.f32.mrf.mxu0  ;;  %v960_v52 = vpop.f32.mrf.mxu1 }
 0x102   :  { %v628_v53 = vsub.f32 %v613_v44, %v596_v47  ;;  %720 = vst.msk [vmem:[#allocation6] sm:$0xff] %vm644_vm2, %v596_v47  ;;  %v275_v54 = vsub.f32 %v260_v46, %v243_v48  ;;  %v684_v55 = vsel %vm644_vm2, %v642_v49, 0.0  ;;  %v331_v56 = vsel %vm291_vm3, %v289_v50, 0.0 }
 0x103   :  { %367 = vst.msk [vmem:[#allocation2] sm:$0xff] %vm291_vm3, %v243_v48  ;;  %685 = vadd.xlane.f32.xlu1 %v684_v55  ;;  %332 = vadd.xlane.f32.xlu0 %v331_v56 }
 0x104   :  { %v643_v57 = vmul.f32 %v628_v53, %v628_v53  ;;  %v290_v36 = vmul.f32 %v275_v54, %v275_v54 }
 0x106   :  { %v687_v35 = vsel %vm644_vm2, %v643_v57, 0.0  ;;  %v334_v58 = vsel %vm291_vm3, %v290_v36, 0.0 }
 0x107   :  { %688 = vadd.xlane.f32.xlu1 %v687_v35  ;;  %335 = vadd.xlane.f32.xlu0 %v334_v58 }
 0x108   :  { %978 = shalt.err (!%p975_p4)
}
 0x109   :  { %751 = dma.vmem_to_hbm [thread:$0]  %s749_s7, 128, %s1497_s8, [#allocation3]   ;;  %vm388_vm4 = vcmask 0  }
 0x10a   :  { %s1056_s8 = smov [#allocation4]   ;;  %s1057_s15 = smov [#allocation6]  }
 0x10b   :  { %s758_s14 = sshll.u32 %s1056_s8, 4  ;;  %s768_s16 = sshll.u32 %s1057_s15, 4  ;;  %s759_s14 = int_to_ptr.vmem [resolvable:$true] %s758_s14  ;;  %s769_s16 = int_to_ptr.vmem [resolvable:$true] %s768_s16 }
 0x10c   :  { %s1058_s17 = smov [#allocation7]   ;;  %s987_s19 = scalar_lea.vmem %s759_s14, 16 }
 0x10d   :  { %s778_s18 = sshll.u32 %s1058_s17, 4  ;;  %p988_p5 = scmp.ne.s32.totalorder %s759_s14, %s987_s19  ;;  %s779_s18 = int_to_ptr.vmem [resolvable:$true] %s778_s18 }
 0x10e   :  { %s991_s20 = scalar_lea.vmem %s759_s14, 32  ;;  %p992_p6 = scmp.lt.s32.totalorder %s759_s14, %s759_s14 }
 0x10f   :  { %p993_p7 = scmp.lt.s32.totalorder %s991_s20, %s987_s19 }
 0x111   :  { %p994_p8 = por %p993_p7, %p992_p6 }
 0x113   :  { %p995_p9 = pnand %p994_p8, %p988_p5 }
 0x158   :  { %v647_v59 = vpop.xlane.xlu1 %646  ;;  %v294_v60 = vpop.xlane.xlu0 %293 }
 0x159   :  { %v690_v11 = vmul.f32 0.5, %v647_v59  ;;  %v337_v12 = vmul.f32 0.5, %v294_v60 }
 0x15b   :  { %v705_v19 = vadd.f32 29.406033, %v690_v11  ;;  %v352_v22 = vadd.f32 58.812065, %v337_v12 }
 0x15c   :  { %v650_v61 = vpop.xlane.xlu1 %649  ;;  %v297_v62 = vpop.xlane.xlu0 %296 }
 0x15d   :  { %v691_v7 = vmul.f32 0.5, %v650_v61  ;;  %v338_v8 = vmul.f32 0.5, %v297_v62 }
 0x15f   :  { %v706_v15 = vadd.f32 29.406033, %v691_v7  ;;  %v353_v16 = vadd.f32 58.812065, %v338_v8 }
 0x160   :  { %v653_v63 = vpop.xlane.xlu1 %652  ;;  %v300_v0 = vpop.xlane.xlu0 %299 }
 0x161   :  { %v692_v13 = vmul.f32 0.5, %v653_v63  ;;  %v339_v14 = vmul.f32 0.5, %v300_v0  ;;  %v721_v27 = vadd.f32 %v706_v15, %v705_v19  ;;  %v368_v28 = vadd.f32 %v353_v16, %v352_v22 }
 0x163   :  { %v707_v23 = vadd.f32 29.406033, %v692_v13  ;;  %v354_v24 = vadd.f32 58.812065, %v339_v14 }
 0x164   :  { %v656_v1 = vpop.xlane.xlu1 %655  ;;  %v303_v2 = vpop.xlane.xlu0 %302 }
 0x165   :  { %v693_v20 = vmul.f32 0.5, %v656_v1  ;;  %v340_v21 = vmul.f32 0.5, %v303_v2  ;;  %v722_v37 = vadd.f32 %v721_v27, %v707_v23  ;;  %v369_v38 = vadd.f32 %v368_v28, %v354_v24 }
 0x167   :  { %v708_v31 = vadd.f32 29.406033, %v693_v20  ;;  %v355_v32 = vadd.f32 58.812065, %v340_v21 }
 0x168   :  { %v659_v3 = vpop.xlane.xlu1 %658  ;;  %v306_v4 = vpop.xlane.xlu0 %305 }
 0x169   :  { %v694_v25 = vmul.f32 0.5, %v659_v3  ;;  %v341_v26 = vmul.f32 0.5, %v306_v4  ;;  %v723_v45 = vadd.f32 %v722_v37, %v708_v31  ;;  %v370_v46 = vadd.f32 %v369_v38, %v355_v32 }
 0x16b   :  { %v709_v39 = vadd.f32 29.406033, %v694_v25  ;;  %v356_v40 = vadd.f32 58.812065, %v341_v26 }
 0x16c   :  { %v662_v5 = vpop.xlane.xlu1 %661  ;;  %v309_v6 = vpop.xlane.xlu0 %308 }
 0x16d   :  { %v695_v33 = vmul.f32 0.5, %v662_v5  ;;  %v342_v34 = vmul.f32 0.5, %v309_v6  ;;  %v724_v51 = vadd.f32 %v723_v45, %v709_v39  ;;  %v371_v52 = vadd.f32 %v370_v46, %v356_v40 }
 0x16f   :  { %v710_v47 = vadd.f32 29.406033, %v695_v33  ;;  %v357_v48 = vadd.f32 58.812065, %v342_v34 }
 0x170   :  { %v665_v9 = vpop.xlane.xlu1 %664  ;;  %v312_v10 = vpop.xlane.xlu0 %311 }
 0x171   :  { %v696_v41 = vmul.f32 0.5, %v665_v9  ;;  %v343_v42 = vmul.f32 0.5, %v312_v10  ;;  %v725_v35 = vadd.f32 %v724_v51, %v710_v47  ;;  %v372_v58 = vadd.f32 %v371_v52, %v357_v48 }
 0x173   :  { %v711_v53 = vadd.f32 29.406033, %v696_v41  ;;  %v358_v54 = vadd.f32 58.812065, %v343_v42 }
 0x174   :  { %v668_v17 = vpop.xlane.xlu1 %667  ;;  %v315_v18 = vpop.xlane.xlu0 %314 }
 0x175   :  { %v697_v49 = vmul.f32 0.5, %v668_v17  ;;  %v344_v50 = vmul.f32 0.5, %v315_v18  ;;  %v726_v63 = vadd.f32 %v725_v35, %v711_v53  ;;  %v373_v0 = vadd.f32 %v372_v58, %v358_v54 }
 0x177   :  { %v712_v59 = vadd.f32 29.406033, %v697_v49  ;;  %v359_v60 = vadd.f32 58.812065, %v344_v50 }
 0x178   :  { %v671_v29 = vpop.xlane.xlu1 %670  ;;  %v318_v30 = vpop.xlane.xlu0 %317 }
 0x179   :  { %v698_v55 = vmul.f32 0.5, %v671_v29  ;;  %v345_v56 = vmul.f32 0.5, %v318_v30  ;;  %v727_v7 = vadd.f32 %v726_v63, %v712_v59  ;;  %v374_v8 = vadd.f32 %v373_v0, %v359_v60 }
 0x17b   :  { %v713_v1 = vadd.f32 29.406033, %v698_v55  ;;  %v360_v2 = vadd.f32 58.812065, %v345_v56 }
 0x17c   :  { %v674_v43 = vpop.xlane.xlu1 %673  ;;  %v321_v44 = vpop.xlane.xlu0 %320 }
 0x17d   :  { %v699_v61 = vmul.f32 0.5, %v674_v43  ;;  %v346_v62 = vmul.f32 0.5, %v321_v44  ;;  %v728_v13 = vadd.f32 %v727_v7, %v713_v1  ;;  %v375_v14 = vadd.f32 %v374_v8, %v360_v2 }
 0x17f   :  { %v714_v9 = vadd.f32 29.406033, %v699_v61  ;;  %v361_v10 = vadd.f32 58.812065, %v346_v62 }
 0x180   :  { %v677_v57 = vpop.xlane.xlu1 %676  ;;  %v324_v36 = vpop.xlane.xlu0 %323 }
 0x181   :  { %v700_v3 = vmul.f32 0.5, %v677_v57  ;;  %v347_v4 = vmul.f32 0.5, %v324_v36  ;;  %v729_v21 = vadd.f32 %v728_v13, %v714_v9  ;;  %v376_v22 = vadd.f32 %v375_v14, %v361_v10 }
 0x183   :  { %v715_v15 = vadd.f32 29.406033, %v700_v3  ;;  %v362_v16 = vadd.f32 58.812065, %v347_v4 }
 0x184   :  { %v680_v5 = vpop.xlane.xlu1 %679  ;;  %v327_v6 = vpop.xlane.xlu0 %326 }
 0x185   :  { %v701_v11 = vmul.f32 0.5, %v680_v5  ;;  %v348_v12 = vmul.f32 0.5, %v327_v6  ;;  %v730_v25 = vadd.f32 %v729_v21, %v715_v15  ;;  %v377_v26 = vadd.f32 %v376_v22, %v362_v16 }
 0x187   :  { %v716_v23 = vadd.f32 29.406033, %v701_v11  ;;  %v363_v24 = vadd.f32 58.812065, %v348_v12 }
 0x188   :  { %v683_v17 = vpop.xlane.xlu1 %682  ;;  %v330_v18 = vpop.xlane.xlu0 %329 }
 0x189   :  { %v702_v19 = vmul.f32 0.5, %v683_v17  ;;  %v349_v20 = vmul.f32 0.5, %v330_v18  ;;  %v731_v33 = vadd.f32 %v730_v25, %v716_v23  ;;  %v378_v34 = vadd.f32 %v377_v26, %v363_v24 }
 0x18b   :  { %v717_v29 = vadd.f32 29.406033, %v702_v19  ;;  %v364_v30 = vadd.f32 58.812065, %v349_v20 }
 0x18c   :  { %v686_v27 = vpop.xlane.xlu1 %685  ;;  %v333_v28 = vpop.xlane.xlu0 %332 }
 0x18d   :  { %v703_v31 = vmul.f32 0.5, %v686_v27  ;;  %v350_v32 = vmul.f32 0.5, %v333_v28  ;;  %v732_v41 = vadd.f32 %v731_v33, %v717_v29  ;;  %v379_v42 = vadd.f32 %v378_v34, %v364_v30 }
 0x18f   :  { %v718_v37 = vadd.f32 29.406033, %v703_v31  ;;  %v365_v38 = vadd.f32 58.812065, %v350_v32 }
 0x190   :  { %v689_v39 = vpop.xlane.xlu1 %688  ;;  %v336_v40 = vpop.xlane.xlu0 %335 }
 0x191   :  { %v704_v43 = vmul.f32 0.5, %v689_v39  ;;  %v351_v44 = vmul.f32 0.5, %v336_v40  ;;  %v733_v45 = vadd.f32 %v732_v41, %v718_v37  ;;  %v380_v46 = vadd.f32 %v379_v42, %v365_v38 }
 0x193   :  { %v719_v47 = vadd.f32 29.406033, %v704_v43  ;;  %v366_v48 = vadd.f32 58.812065, %v351_v44 }
 0x195   :  { %v734_v49 = vadd.f32 %v733_v45, %v719_v47  ;;  %v381_v50 = vadd.f32 %v380_v46, %v366_v48 }
 0x197   :  { %v735_v51 = vrot.slane %v734_v49, 4  ;;  %v382_v52 = vrot.slane %v381_v50, 4 }
 0x199   :  { %v736_v53 = vadd.f32 %v735_v51, %v734_v49  ;;  %v383_v54 = vadd.f32 %v382_v52, %v381_v50 }
 0x19b   :  { %v737_v55 = vrot.slane %v736_v53, 2  ;;  %v384_v56 = vrot.slane %v383_v54, 2 }
 0x19d   :  { %v385_v57 = vadd.f32 %v384_v56, %v383_v54  ;;  %v738_v36 = vadd.f32 %v737_v55, %v736_v53 }
 0x19f   :  { %v386_v35 = vrot.slane %v385_v57, 1  ;;  %v739_v58 = vrot.slane %v738_v36, 1 }
 0x1a1   :  { %v387_v59 = vadd.f32 %v386_v35, %v385_v57  ;;  %v740_v60 = vadd.f32 %v739_v58, %v738_v36 }
 0x1a3   :  { %389 = vst.msk [vmem:[#allocation4] sm:$0x1] %vm388_vm4, %v387_v59  ;;  %741 = vst.msk [vmem:[#allocation7] sm:$0x1] %vm388_vm4, %v740_v60 }
 0x1a4   :  { %998 = shalt.err (!%p995_p9)
}
 0x1a5   :  { %761 = dma.vmem_to_hbm [thread:$0]  %s759_s14, 16, %s1498_s9, [#allocation5]  }
 0x1a6   :  { %s1007_s23 = scalar_lea.vmem %s769_s16, 128  ;;  %p1012_p11 = scmp.lt.s32.totalorder %s769_s16, %s769_s16 }
 0x1a7   :  { %p1008_p10 = scmp.ne.s32.totalorder %s769_s16, %s1007_s23  ;;  %p1013_p12 = scmp.lt.s32.totalorder %s1007_s23, %s1007_s23 }
 0x1a9   :  { %p1014_p13 = por %p1013_p12, %p1012_p11 }
 0x1ab   :  { %p1015_p0 = pnand %p1014_p13, %p1008_p10 }
 0x1ad   :  { %1018 = shalt.err (!%p1015_p0)
}
 0x1ae   :  { %771 = dma.vmem_to_hbm [thread:$0]  %s769_s16, 128, %s1499_s10, [#allocation5]  }
 0x1af   :  { %s1027_s0 = scalar_lea.vmem %s779_s18, 16  ;;  %s1031_s26 = scalar_lea.vmem %s779_s18, 32 }
 0x1b0   :  { %p1028_p1 = scmp.ne.s32.totalorder %s779_s18, %s1027_s0  ;;  %p1032_p2 = scmp.lt.s32.totalorder %s779_s18, %s779_s18 }
 0x1b1   :  { %p1033_p3 = scmp.lt.s32.totalorder %s1031_s26, %s1027_s0 }
 0x1b3   :  { %p1034_p4 = por %p1033_p3, %p1032_p2 }
 0x1b5   :  { %p1035_p5 = pnand %p1034_p4, %p1028_p1 }
 0x1b7   :  { %1038 = shalt.err (!%p1035_p5)
}
 0x1b8   :  { %781 = dma.vmem_to_hbm [thread:$0]  %s779_s18, 16, %s1500_s11, [#allocation8]  }
 0x1b9   :  { %1047 = dma.done.wait [#allocation3], 128  }
 0x1ba   :  { %1048 = vsyncadd [#allocation3], 4294967168 }
 0x1bb   :  { %1049 = dma.done.wait [#allocation5], 144  }
 0x1bc   :  { %1050 = vsyncadd [#allocation5], 4294967152 }
 0x1bd   :  { %1051 = dma.done.wait [#allocation8], 16  }
 0x1be   :  { %1052 = vsyncadd [#allocation8], 4294967280 }
 0x1bf   :  { %794 = vsyncpa [#allocation3], 1 }
 0x1c0   :  { %795 = vsyncpa [#allocation5], 1 }
 0x1c1   :  { %796 = vsyncpa [#allocation8], 1 }

// kernel: poisevae_forward.6
= control target key start
LH: loop header
LB: loop body
LE: loop exit
PB: predicated region body
PF: predicated region fallthrough
CT: control target
= control target key end

     0   :  { %s5198_s22 = smov 16   ;;  %s7003_s0 = inlined_call_operand.vmem [shape: f32[32,32], index: 0, kind: input, shape index: {}]   ;;  %s7004_s1 = inlined_call_operand.vmem [shape: f32[32,32], index: 1, kind: input, shape index: {}]   ;;  %s7005_s2 = inlined_call_operand.vmem [shape: f32[16,32], index: 2, kind: input, shape index: {}]   ;;  %s7006_s3 = inlined_call_operand.vmem [shape: f32[16,32], index: 3, kind: input, shape index: {}]   ;;  %s7007_s4 = inlined_call_operand.vmem [shape: f32[16,16], index: 4, kind: input, shape index: {}]   ;;  %s7008_s5 = inlined_call_operand.vmem [shape: f32[16,16], index: 5, kind: input, shape index: {}]   ;;  %s7009_s6 = inlined_call_operand.vmem [shape: f32[15,16,16], index: 6, kind: input, shape index: {}]   ;;  %s7010_s7 = inlined_call_operand.vmem [shape: f32[15,16,16], index: 7, kind: input, shape index: {}]   ;;  %s7011_s8 = inlined_call_operand.vmem [shape: f32[8,16], index: 8, kind: input, shape index: {}]   ;;  %s7012_s9 = inlined_call_operand.vmem [shape: f32[8,16], index: 9, kind: input, shape index: {}]   ;;  %s7013_s10 = inlined_call_operand.vmem [shape: f32[8,16], index: 10, kind: input, shape index: {}]   ;;  %s7014_s11 = inlined_call_operand.vmem [shape: f32[8,16], index: 11, kind: input, shape index: {}]   ;;  %s7015_s12 = inlined_call_operand.vmem [shape: f32[15,8,16], index: 12, kind: output, shape index: {0}]   ;;  %s7016_s13 = inlined_call_operand.vmem [shape: f32[15,8,16], index: 13, kind: output, shape index: {1}]   ;;  %s7017_s14 = inlined_call_operand.hbm [shape: f32[1,1], index: 14, kind: output, shape index: {2}]  }
   0x1   :  { %v57_v0 = vld [vmem:[%s7008_s5] sm:$0xff]  ;;  %v58_v1 = vld [vmem:[%s7008_s5 + $0x8] sm:$0xff]  ;;  %v5285_v2 = vld [vmem:[%s7003_s0 + $0x18] sm:$0xff] }
   0x2   :  { %v59_v3 = vmul.f32 %v57_v0, %v57_v0  ;;  %4699 = vmatprep.subr.mxu0 %v5285_v2  ;;  %v5291_v4 = vld [vmem:[%s7003_s0 + $0x10] sm:$0xff]  ;;  %v5297_v5 = vld [vmem:[%s7003_s0 + $0x8] sm:$0xff]  ;;  %v174_v6 = vld [vmem:[%s7009_s6] sm:$0xff]  ;;  %v60_v7 = vmul.f32 %v58_v1, %v58_v1 }
   0x3   :  { %4700 = vmatpush3.msra.mxu0 %v5285_v2 }
   0x4   :  { %63 = vrot.lane.b32.xlu0 %v59_v3, %s5198_s22  ;;  %4701 = vmatprep.subr.mxu0 %v5291_v4 }
   0x5   :  { %20 = vsyncpa [#allocation3], 0  ;;  %4702 = vmatpush3.msra.mxu0 %v5291_v4  ;;  %v5308_v8 = vld [vmem:[%s7003_s0] sm:$0xff]  ;;  %178 = vrot.lane.b32.xlu1 %v174_v6, %s5198_s22  ;;  %v175_v9 = vld [vmem:[%s7009_s6 + $0x8] sm:$0xff]  ;;  %vm69_vm0 = vcmask 130048   ;;  %vm72_vm1 = vcmask 261120  }
   0x6   :  { %4703 = vmatprep.subr.mxu0 %v5297_v5  ;;  %v5336_v14 = vld [vmem:[%s7005_s2 + $0x8] sm:$0xff]  ;;  %v5341_v16 = vld [vmem:[%s7005_s2] sm:$0xff]  ;;  %v5348_v26 = vld [vmem:[%s7004_s1 + $0x18] sm:$0xff]  ;;  %s5199_s19 = smov 112   ;;  %vm4351_vm2 = vcmask 0  }
   0x7   :  { %4704 = vmatpush3.msra.mxu0 %v5297_v5  ;;  %v5353_v27 = vld [vmem:[%s7004_s1 + $0x10] sm:$0xff]  ;;  %4710 = vmatprep.subr.mxu1 %v5348_v26  ;;  %v5366_v34 = vld [vmem:[%s7004_s1 + $0x8] sm:$0xff]  ;;  %v5373_v35 = vld [vmem:[%s7004_s1] sm:$0xff] }
   0x8   :  { %65 = vrot.lane.b32.xlu0 %v60_v7, %s5198_s22  ;;  %4705 = vmatprep.subr.mxu0 %v5308_v8  ;;  %v310_v46 = vld [vmem:[%s7010_s7 + $0x8] sm:$0xff]  ;;  %v309_v47 = vld [vmem:[%s7010_s7] sm:$0xff] }
   0x9   :  { %4706 = vmatpush3.msra.mxu0 %v5308_v8  ;;  %180 = vrot.lane.b32.xlu1 %v175_v9, %s5198_s22  ;;  %v5424_v52 = vld [vmem:[%s7006_s3 + $0x8] sm:$0xff]  ;;  %v5429_v54 = vld [vmem:[%s7006_s3] sm:$0xff] }
   0xa   :  { %4721 = vmatprep.subr.mxu0 %v5285_v2  ;;  %4711 = vmatpush3.msra.mxu1 %v5348_v26 }
   0xb   :  { %4712 = vmatprep.subr.mxu1 %v5353_v27 }
   0xc   :  { %4713 = vmatpush3.msra.mxu1 %v5353_v27 }
   0xd   :  { %4714 = vmatprep.subr.mxu1 %v5366_v34 }
   0xe   :  { %4715 = vmatpush3.msra.mxu1 %v5366_v34 }
   0xf   :  { %4716 = vmatprep.subr.mxu1 %v5373_v35 }
  0x10   :  { %4717 = vmatpush3.msra.mxu1 %v5373_v35 }
  0x11   :  { %4732 = vmatprep.subr.mxu1 %v5348_v26 }
  0x76   :  { %v64_v10 = vpop.permute.xlu0 %63 }
  0x77   :  { %v70_v11 = vsel %vm69_vm0, %v57_v0, %v64_v10  ;;  %v179_v24 = vpop.permute.xlu1 %178 }
  0x78   :  { %4707 = vmatprep.mubr.msk.f32.mxu0 %vm72_vm1, %v70_v11 }
  0x7a   :  { %v66_v12 = vpop.permute.xlu0 %65 }
  0x7b   :  { %v71_v13 = vsel %vm69_vm0, %v58_v1, %v66_v12  ;;  %v181_v30 = vpop.permute.xlu1 %180 }
  0x7c   :  { %4708 = vmatmul.mubr.msk.f32.vlgmr.msra.gmra.mxu0 %vm72_vm1, %v71_v13 }
  0x7d   :  { %4722 = vmatpush3.msra.mxu0 %v5285_v2 }
  0x7e   :  { %4723 = vmatprep.subr.mxu0 %v5291_v4 }
  0x7f   :  { %4724 = vmatpush3.msra.mxu0 %v5291_v4 }
  0x80   :  { %4725 = vmatprep.subr.mxu0 %v5297_v5 }
  0x81   :  { %4726 = vmatpush3.msra.mxu0 %v5297_v5 }
  0x82   :  { %4727 = vmatprep.subr.mxu0 %v5308_v8 }
  0x83   :  { %4728 = vmatpush3.msra.mxu0 %v5308_v8 }
  0x84   :  { %4743 = vmatprep.subr.mxu0 %v5285_v2 }
 0x13c   :  { %v4709_v15 = vpop.f32.mrf.mxu0 }
 0x13d   :  { %v155_v17 = vadd.f32 %v4709_v15, %v5336_v14 }
 0x13e   :  { %v145_v18 = vpop.f32.mrf.mxu0 }
 0x13f   :  { %v157_v19 = vmin.f32 %v155_v17, -1e-06  ;;  %v154_v20 = vadd.f32 %v145_v18, %v5341_v16 }
 0x141   :  { %v159_v21 = vmul.f32 -2.0, %v157_v19  ;;  %v156_v22 = vmin.f32 %v154_v20, -1e-06 }
 0x143   :  { %5032 = vrsqrt.f32 %v159_v21  ;;  %v158_v23 = vmul.f32 -2.0, %v156_v22  ;;  %v4382_v22 = vld [vmem:[%s7009_s6 + $0x18] sm:$0xff] }
 0x145   :  { %5034 = vrsqrt.f32 %v158_v23  ;;  %v4381_v23 = vld [vmem:[%s7009_s6 + $0x10] sm:$0xff] }
 0x150   :  { %v5033_v25 = vpop.eup %5032 }
 0x151   :  { %v163_v28 = vmul.f32 %v5033_v25, %v5033_v25  ;;  %v185_v32 = vmul.f32 %v5033_v25, %v181_v30 }
 0x152   :  { %v5035_v29 = vpop.eup %5034 }
 0x153   :  { %168 = vrot.lane.b32.xlu1 %v163_v28, %s5199_s19  ;;  %v162_v31 = vmul.f32 %v5035_v29, %v5035_v29  ;;  %v184_v33 = vmul.f32 %v5035_v29, %v179_v24 }
 0x155   :  { %166 = vrot.lane.b32.xlu0 %v162_v31, %s5199_s19 }
 0x157   :  { %190 = vrot.lane.b32.xlu1 %v185_v32, %s5199_s19 }
 0x159   :  { %188 = vrot.lane.b32.xlu0 %v184_v33, %s5199_s19 }
 0x1c5   :  { %v169_v36 = vpop.permute.xlu1 %168 }
 0x1c6   :  { %v173_v38 = vmul.f32 %v169_v36, %v155_v17 }
 0x1c7   :  { %v167_v37 = vpop.permute.xlu0 %166 }
 0x1c8   :  { %v172_v40 = vmul.f32 %v167_v37, %v154_v20 }
 0x1c9   :  { %v191_v39 = vpop.permute.xlu1 %190 }
 0x1ca   :  { %v5378_v41 = vadd.f32 %v191_v39, %v173_v38 }
 0x1cb   :  { %v189_v42 = vpop.permute.xlu0 %188 }
 0x1cc   :  { %v5380_v43 = vadd.f32 %v189_v42, %v172_v40  ;;  %v5384_v44 = vmul.f32 %v5378_v41, %v5378_v41 }
 0x1ce   :  { %331 = vst.msk [vmem:[%s7015_s12] sm:$0xff] %vm69_vm0, %v5380_v43  ;;  %202 = vrot.lane.b32.xlu1 %v5384_v44, %s5198_s22  ;;  %v5395_v45 = vmul.f32 %v5380_v43, %v5380_v43 }
 0x1d0   :  { %200 = vrot.lane.b32.xlu0 %v5395_v45, %s5198_s22 }
 0x1d2   :  { %315 = vrot.lane.b32.xlu1 %v310_v46, %s5198_s22 }
 0x1d4   :  { %313 = vrot.lane.b32.xlu0 %v309_v47, %s5198_s22 }
 0x240   :  { %v203_v48 = vpop.permute.xlu1 %202 }
 0x241   :  { %v207_v51 = vsel %vm69_vm0, %v5378_v41, %v203_v48 }
 0x242   :  { %v201_v49 = vpop.permute.xlu0 %200 }
 0x243   :  { %v206_v50 = vsel %vm69_vm0, %v5380_v43, %v201_v49 }
 0x244   :  { %4718 = vmatprep.mubr.msk.f32.mxu1 %vm72_vm1, %v206_v50  ;;  %v316_v1 = vpop.permute.xlu1 %315 }
 0x245   :  { %4719 = vmatmul.mubr.msk.f32.vlgmr.msra.gmra.mxu1 %vm72_vm1, %v207_v51 }
 0x246   :  { %4733 = vmatpush3.msra.mxu1 %v5348_v26  ;;  %v314_v6 = vpop.permute.xlu0 %313 }
 0x247   :  { %4734 = vmatprep.subr.mxu1 %v5353_v27 }
 0x248   :  { %4735 = vmatpush3.msra.mxu1 %v5353_v27 }
 0x249   :  { %4736 = vmatprep.subr.mxu1 %v5366_v34 }
 0x24a   :  { %4737 = vmatpush3.msra.mxu1 %v5366_v34 }
 0x24b   :  { %4738 = vmatprep.subr.mxu1 %v5373_v35 }
 0x24c   :  { %4739 = vmatpush3.msra.mxu1 %v5373_v35 }
 0x24d   :  { %4754 = vmatprep.subr.mxu1 %v5348_v26 }
 0x305   :  { %v4720_v53 = vpop.f32.mrf.mxu1 }
 0x306   :  { %v290_v55 = vadd.f32 %v4720_v53, %v5424_v52 }
 0x307   :  { %v280_v56 = vpop.f32.mrf.mxu1 }
 0x308   :  { %v292_v57 = vmin.f32 %v290_v55, -1e-06  ;;  %v289_v58 = vadd.f32 %v280_v56, %v5429_v54 }
 0x30a   :  { %v294_v59 = vmul.f32 -2.0, %v292_v57  ;;  %v291_v60 = vmin.f32 %v289_v58, -1e-06 }
 0x30c   :  { %5036 = vrsqrt.f32 %v294_v59  ;;  %v293_v61 = vmul.f32 -2.0, %v291_v60 }
 0x30e   :  { %5038 = vrsqrt.f32 %v293_v61 }
 0x319   :  { %v5037_v62 = vpop.eup %5036 }
 0x31a   :  { %v298_v63 = vmul.f32 %v5037_v62, %v5037_v62  ;;  %v320_v7 = vmul.f32 %v5037_v62, %v316_v1  ;;  %v4385_v1 = vld [vmem:[%s7010_s7 + $0x10] sm:$0xff] }
 0x31b   :  { %v5039_v0 = vpop.eup %5038 }
 0x31c   :  { %303 = vrot.lane.b32.xlu1 %v298_v63, %s5199_s19  ;;  %v297_v3 = vmul.f32 %v5039_v0, %v5039_v0  ;;  %v319_v9 = vmul.f32 %v5039_v0, %v314_v6  ;;  %v4386_v0 = vld [vmem:[%s7010_s7 + $0x18] sm:$0xff] }
 0x31e   :  { %301 = vrot.lane.b32.xlu0 %v297_v3, %s5199_s19 }
 0x320   :  { %325 = vrot.lane.b32.xlu1 %v320_v7, %s5199_s19 }
 0x322   :  { %323 = vrot.lane.b32.xlu0 %v319_v9, %s5199_s19 }
 0x38e   :  { %v304_v10 = vpop.permute.xlu1 %303 }
 0x38f   :  { %v308_v12 = vmul.f32 %v304_v10, %v290_v55 }
 0x390   :  { %v302_v11 = vpop.permute.xlu0 %301 }
 0x391   :  { %v307_v15 = vmul.f32 %v302_v11, %v289_v58 }
 0x392   :  { %v326_v13 = vpop.permute.xlu1 %325 }
 0x393   :  { %v5437_v17 = vadd.f32 %v326_v13, %v308_v12 }
 0x394   :  { %v324_v18 = vpop.permute.xlu0 %323 }
 0x395   :  { %v5439_v19 = vadd.f32 %v324_v18, %v307_v15  ;;  %v5443_v20 = vmul.f32 %v5437_v17, %v5437_v17 }
 0x397   :  { %332 = vst.msk [vmem:[%s7016_s13] sm:$0xff] %vm69_vm0, %v5439_v19  ;;  %347 = vrot.lane.b32.xlu1 %v5443_v20, %s5198_s22  ;;  %v5454_v21 = vmul.f32 %v5439_v19, %v5439_v19 }
 0x399   :  { %345 = vrot.lane.b32.xlu0 %v5454_v21, %s5198_s22 }
 0x39b   :  { %461 = vrot.lane.b32.xlu1 %v4382_v22, %s5198_s22 }
 0x39d   :  { %459 = vrot.lane.b32.xlu0 %v4381_v23, %s5198_s22 }
 0x409   :  { %v348_v24 = vpop.permute.xlu1 %347 }
 0x40a   :  { %v352_v29 = vsel %vm69_vm0, %v5437_v17, %v348_v24 }
 0x40b   :  { %v346_v25 = vpop.permute.xlu0 %345 }
 0x40c   :  { %v351_v28 = vsel %vm69_vm0, %v5439_v19, %v346_v25 }
 0x40d   :  { %4729 = vmatprep.mubr.msk.f32.mxu0 %vm72_vm1, %v351_v28  ;;  %v462_v47 = vpop.permute.xlu1 %461 }
 0x40e   :  { %4730 = vmatmul.mubr.msk.f32.vlgmr.msra.gmra.mxu0 %vm72_vm1, %v352_v29 }
 0x40f   :  { %4744 = vmatpush3.msra.mxu0 %v5285_v2  ;;  %v460_v49 = vpop.permute.xlu0 %459 }
 0x410   :  { %4745 = vmatprep.subr.mxu0 %v5291_v4 }
 0x411   :  { %4746 = vmatpush3.msra.mxu0 %v5291_v4 }
 0x412   :  { %4747 = vmatprep.subr.mxu0 %v5297_v5 }
 0x413   :  { %4748 = vmatpush3.msra.mxu0 %v5297_v5 }
 0x414   :  { %4749 = vmatprep.subr.mxu0 %v5308_v8 }
 0x415   :  { %4750 = vmatpush3.msra.mxu0 %v5308_v8 }
 0x416   :  { %4765 = vmatprep.subr.mxu0 %v5285_v2 }
 0x4ce   :  { %v4731_v30 = vpop.f32.mrf.mxu0 }
 0x4cf   :  { %v435_v31 = vadd.f32 %v4731_v30, %v5336_v14 }
 0x4d0   :  { %v425_v32 = vpop.f32.mrf.mxu0 }
 0x4d1   :  { %v437_v33 = vmin.f32 %v435_v31, -1e-06  ;;  %v434_v36 = vadd.f32 %v425_v32, %v5341_v16 }
 0x4d3   :  { %v439_v37 = vmul.f32 -2.0, %v437_v33  ;;  %v436_v38 = vmin.f32 %v434_v36, -1e-06 }
 0x4d5   :  { %5040 = vrsqrt.f32 %v439_v37  ;;  %v438_v39 = vmul.f32 -2.0, %v436_v38 }
 0x4d7   :  { %5042 = vrsqrt.f32 %v438_v39 }
 0x4e2   :  { %v5041_v40 = vpop.eup %5040 }
 0x4e3   :  { %v443_v42 = vmul.f32 %v5041_v40, %v5041_v40  ;;  %v466_v50 = vmul.f32 %v5041_v40, %v462_v47 }
 0x4e4   :  { %v5043_v46 = vpop.eup %5042 }
 0x4e5   :  { %448 = vrot.lane.b32.xlu1 %v443_v42, %s5199_s19  ;;  %v442_v48 = vmul.f32 %v5043_v46, %v5043_v46  ;;  %v465_v51 = vmul.f32 %v5043_v46, %v460_v49 }
 0x4e7   :  { %446 = vrot.lane.b32.xlu0 %v442_v48, %s5199_s19 }
 0x4e9   :  { %471 = vrot.lane.b32.xlu1 %v466_v50, %s5199_s19  ;;  %v4392_v50 = vld [vmem:[%s7009_s6 + $0x28] sm:$0xff] }
 0x4eb   :  { %469 = vrot.lane.b32.xlu0 %v465_v51, %s5199_s19  ;;  %v4391_v51 = vld [vmem:[%s7009_s6 + $0x20] sm:$0xff] }
 0x557   :  { %v449_v53 = vpop.permute.xlu1 %448 }
 0x558   :  { %v453_v56 = vmul.f32 %v449_v53, %v435_v31 }
 0x559   :  { %v447_v55 = vpop.permute.xlu0 %446 }
 0x55a   :  { %v452_v58 = vmul.f32 %v447_v55, %v434_v36 }
 0x55b   :  { %v472_v57 = vpop.permute.xlu1 %471 }
 0x55c   :  { %v5486_v59 = vadd.f32 %v472_v57, %v453_v56 }
 0x55d   :  { %v470_v60 = vpop.permute.xlu0 %469 }
 0x55e   :  { %v5488_v61 = vadd.f32 %v470_v60, %v452_v58  ;;  %v5492_v62 = vmul.f32 %v5486_v59, %v5486_v59 }
 0x560   :  { %4387 = vst.msk [vmem:[%s7015_s12 + $0x8] sm:$0xff] %vm69_vm0, %v5488_v61  ;;  %483 = vrot.lane.b32.xlu1 %v5492_v62, %s5198_s22  ;;  %v5503_v63 = vmul.f32 %v5488_v61, %v5488_v61 }
 0x562   :  { %481 = vrot.lane.b32.xlu0 %v5503_v63, %s5198_s22 }
 0x564   :  { %597 = vrot.lane.b32.xlu1 %v4386_v0, %s5198_s22 }
 0x566   :  { %595 = vrot.lane.b32.xlu0 %v4385_v1, %s5198_s22 }
 0x5d2   :  { %v484_v3 = vpop.permute.xlu1 %483 }
 0x5d3   :  { %v488_v9 = vsel %vm69_vm0, %v5486_v59, %v484_v3 }
 0x5d4   :  { %v482_v6 = vpop.permute.xlu0 %481 }
 0x5d5   :  { %v487_v7 = vsel %vm69_vm0, %v5488_v61, %v482_v6 }
 0x5d6   :  { %4740 = vmatprep.mubr.msk.f32.mxu1 %vm72_vm1, %v487_v7  ;;  %v598_v29 = vpop.permute.xlu1 %597 }
 0x5d7   :  { %4741 = vmatmul.mubr.msk.f32.vlgmr.msra.gmra.mxu1 %vm72_vm1, %v488_v9 }
 0x5d8   :  { %4755 = vmatpush3.msra.mxu1 %v5348_v26  ;;  %v596_v31 = vpop.permute.xlu0 %595 }
 0x5d9   :  { %4756 = vmatprep.subr.mxu1 %v5353_v27 }
 0x5da   :  { %4757 = vmatpush3.msra.mxu1 %v5353_v27 }
 0x5db   :  { %4758 = vmatprep.subr.mxu1 %v5366_v34 }
 0x5dc   :  { %4759 = vmatpush3.msra.mxu1 %v5366_v34 }
 0x5dd   :  { %4760 = vmatprep.subr.mxu1 %v5373_v35 }
 0x5de   :  { %4761 = vmatpush3.msra.mxu1 %v5373_v35 }
 0x5df   :  { %4776 = vmatprep.subr.mxu1 %v5348_v26 }
 0x697   :  { %v4742_v10 = vpop.f32.mrf.mxu1 }
 0x698   :  { %v571_v11 = vadd.f32 %v4742_v10, %v5424_v52 }
 0x699   :  { %v561_v12 = vpop.f32.mrf.mxu1 }
 0x69a   :  { %v573_v13 = vmin.f32 %v571_v11, -1e-06  ;;  %v570_v15 = vadd.f32 %v561_v12, %v5429_v54 }
 0x69c   :  { %v575_v18 = vmul.f32 -2.0, %v573_v13  ;;  %v572_v22 = vmin.f32 %v570_v15, -1e-06 }
 0x69e   :  { %5044 = vrsqrt.f32 %v575_v18  ;;  %v574_v23 = vmul.f32 -2.0, %v572_v22 }
 0x6a0   :  { %5046 = vrsqrt.f32 %v574_v23 }
 0x6ab   :  { %v5045_v24 = vpop.eup %5044 }
 0x6ac   :  { %v579_v25 = vmul.f32 %v5045_v24, %v5045_v24  ;;  %v602_v32 = vmul.f32 %v5045_v24, %v598_v29 }
 0x6ad   :  { %v5047_v28 = vpop.eup %5046 }
 0x6ae   :  { %584 = vrot.lane.b32.xlu1 %v579_v25, %s5199_s19  ;;  %v578_v30 = vmul.f32 %v5047_v28, %v5047_v28  ;;  %v601_v33 = vmul.f32 %v5047_v28, %v596_v31 }
 0x6b0   :  { %582 = vrot.lane.b32.xlu0 %v578_v30, %s5199_s19 }
 0x6b2   :  { %607 = vrot.lane.b32.xlu1 %v602_v32, %s5199_s19 }
 0x6b4   :  { %605 = vrot.lane.b32.xlu0 %v601_v33, %s5199_s19  ;;  %v620_v33 = vadd.f32 %v5492_v62, %v5384_v44  ;;  %v4396_v62 = vld [vmem:[%s7010_s7 + $0x28] sm:$0xff] }
 0x720   :  { %v585_v36 = vpop.permute.xlu1 %584 }
 0x721   :  { %v589_v38 = vmul.f32 %v585_v36, %v571_v11 }
 0x722   :  { %v583_v37 = vpop.permute.xlu0 %582 }
 0x723   :  { %v588_v40 = vmul.f32 %v583_v37, %v570_v15 }
 0x724   :  { %v608_v39 = vpop.permute.xlu1 %607 }
 0x725   :  { %v5535_v42 = vadd.f32 %v608_v39, %v589_v38  ;;  %v619_v38 = vadd.f32 %v5503_v63, %v5395_v45  ;;  %v4395_v63 = vld [vmem:[%s7010_s7 + $0x20] sm:$0xff] }
 0x726   :  { %v606_v46 = vpop.permute.xlu0 %605 }
 0x727   :  { %v5537_v47 = vadd.f32 %v606_v46, %v588_v40  ;;  %v5541_v48 = vmul.f32 %v5535_v42, %v5535_v42 }
 0x729   :  { %4388 = vst.msk [vmem:[%s7016_s13 + $0x8] sm:$0xff] %vm69_vm0, %v5537_v47  ;;  %631 = vrot.lane.b32.xlu1 %v5541_v48, %s5198_s22  ;;  %v5552_v49 = vmul.f32 %v5537_v47, %v5537_v47 }
 0x72b   :  { %629 = vrot.lane.b32.xlu0 %v5552_v49, %s5198_s22 }
 0x72d   :  { %745 = vrot.lane.b32.xlu1 %v4392_v50, %s5198_s22 }
 0x72f   :  { %743 = vrot.lane.b32.xlu0 %v4391_v51, %s5198_s22 }
 0x79b   :  { %v632_v53 = vpop.permute.xlu1 %631 }
 0x79c   :  { %v636_v57 = vsel %vm69_vm0, %v5535_v42, %v632_v53 }
 0x79d   :  { %v630_v55 = vpop.permute.xlu0 %629 }
 0x79e   :  { %v635_v56 = vsel %vm69_vm0, %v5537_v47, %v630_v55 }
 0x79f   :  { %4751 = vmatprep.mubr.msk.f32.mxu0 %vm72_vm1, %v635_v56  ;;  %v746_v13 = vpop.permute.xlu1 %745 }
 0x7a0   :  { %4752 = vmatmul.mubr.msk.f32.vlgmr.msra.gmra.mxu0 %vm72_vm1, %v636_v57 }
 0x7a1   :  { %4766 = vmatpush3.msra.mxu0 %v5285_v2  ;;  %v744_v18 = vpop.permute.xlu0 %743 }
 0x7a2   :  { %4767 = vmatprep.subr.mxu0 %v5291_v4 }
 0x7a3   :  { %4768 = vmatpush3.msra.mxu0 %v5291_v4 }
 0x7a4   :  { %4769 = vmatprep.subr.mxu0 %v5297_v5 }
 0x7a5   :  { %4770 = vmatpush3.msra.mxu0 %v5297_v5 }
 0x7a6   :  { %4771 = vmatprep.subr.mxu0 %v5308_v8 }
 0x7a7   :  { %4772 = vmatpush3.msra.mxu0 %v5308_v8 }
 0x7a8   :  { %4787 = vmatprep.subr.mxu0 %v5285_v2 }
 0x860   :  { %v4753_v58 = vpop.f32.mrf.mxu0 }
 0x861   :  { %v719_v60 = vadd.f32 %v4753_v58, %v5336_v14 }
 0x862   :  { %v709_v0 = vpop.f32.mrf.mxu0 }
 0x863   :  { %v721_v1 = vmin.f32 %v719_v60, -1e-06  ;;  %v718_v3 = vadd.f32 %v709_v0, %v5341_v16 }
 0x865   :  { %v723_v6 = vmul.f32 -2.0, %v721_v1  ;;  %v720_v7 = vmin.f32 %v718_v3, -1e-06 }
 0x867   :  { %5048 = vrsqrt.f32 %v723_v6  ;;  %v722_v9 = vmul.f32 -2.0, %v720_v7 }
 0x869   :  { %5050 = vrsqrt.f32 %v722_v9 }
 0x874   :  { %v5049_v10 = vpop.eup %5048 }
 0x875   :  { %v727_v11 = vmul.f32 %v5049_v10, %v5049_v10  ;;  %v750_v22 = vmul.f32 %v5049_v10, %v746_v13 }
 0x876   :  { %v5051_v12 = vpop.eup %5050 }
 0x877   :  { %732 = vrot.lane.b32.xlu1 %v727_v11, %s5199_s19  ;;  %v726_v15 = vmul.f32 %v5051_v12, %v5051_v12  ;;  %v749_v23 = vmul.f32 %v5051_v12, %v744_v18 }
 0x879   :  { %730 = vrot.lane.b32.xlu0 %v726_v15, %s5199_s19 }
 0x87b   :  { %755 = vrot.lane.b32.xlu1 %v750_v22, %s5199_s19 }
 0x87d   :  { %753 = vrot.lane.b32.xlu0 %v749_v23, %s5199_s19 }
 0x8e9   :  { %v733_v24 = vpop.permute.xlu1 %732 }
 0x8ea   :  { %v737_v28 = vmul.f32 %v733_v24, %v719_v60 }
 0x8eb   :  { %v731_v25 = vpop.permute.xlu0 %730 }
 0x8ec   :  { %v736_v30 = vmul.f32 %v731_v25, %v718_v3 }
 0x8ed   :  { %v756_v29 = vpop.permute.xlu1 %755 }
 0x8ee   :  { %v5584_v31 = vadd.f32 %v756_v29, %v737_v28  ;;  %v626_v29 = vadd.f32 %v5541_v48, %v5443_v20  ;;  %v4402_v48 = vld [vmem:[%s7009_s6 + $0x38] sm:$0xff] }
 0x8ef   :  { %v754_v32 = vpop.permute.xlu0 %753 }
 0x8f0   :  { %v5588_v36 = vadd.f32 %v754_v32, %v736_v30  ;;  %v762_v37 = vmul.f32 %v5584_v31, %v5584_v31 }
 0x8f2   :  { %4397 = vst.msk [vmem:[%s7015_s12 + $0x10] sm:$0xff] %vm69_vm0, %v5588_v36  ;;  %767 = vrot.lane.b32.xlu1 %v762_v37, %s5198_s22  ;;  %v5600_v39 = vadd.f32 %v762_v37, %v620_v33  ;;  %v761_v44 = vmul.f32 %v5588_v36, %v5588_v36  ;;  %v625_v33 = vadd.f32 %v5552_v49, %v5454_v21  ;;  %v4401_v49 = vld [vmem:[%s7009_s6 + $0x30] sm:$0xff] }
 0x8f4   :  { %765 = vrot.lane.b32.xlu0 %v761_v44, %s5198_s22  ;;  %v5608_v45 = vadd.f32 %v761_v44, %v619_v38 }
 0x8f6   :  { %881 = vrot.lane.b32.xlu1 %v4396_v62, %s5198_s22 }
 0x8f8   :  { %879 = vrot.lane.b32.xlu0 %v4395_v63, %s5198_s22 }
 0x964   :  { %v768_v40 = vpop.permute.xlu1 %767 }
 0x965   :  { %v772_v51 = vsel %vm69_vm0, %v5584_v31, %v768_v40 }
 0x966   :  { %v766_v46 = vpop.permute.xlu0 %765 }
 0x967   :  { %v771_v50 = vsel %vm69_vm0, %v5588_v36, %v766_v46 }
 0x968   :  { %4762 = vmatprep.mubr.msk.f32.mxu1 %vm72_vm1, %v771_v50  ;;  %v882_v9 = vpop.permute.xlu1 %881 }
 0x969   :  { %4763 = vmatmul.mubr.msk.f32.vlgmr.msra.gmra.mxu1 %vm72_vm1, %v772_v51 }
 0x96a   :  { %4777 = vmatpush3.msra.mxu1 %v5348_v26  ;;  %v880_v11 = vpop.permute.xlu0 %879 }
 0x96b   :  { %4778 = vmatprep.subr.mxu1 %v5353_v27 }
 0x96c   :  { %4779 = vmatpush3.msra.mxu1 %v5353_v27 }
 0x96d   :  { %4780 = vmatprep.subr.mxu1 %v5366_v34 }
 0x96e   :  { %4781 = vmatpush3.msra.mxu1 %v5366_v34 }
 0x96f   :  { %4782 = vmatprep.subr.mxu1 %v5373_v35 }
 0x970   :  { %4783 = vmatpush3.msra.mxu1 %v5373_v35 }
 0x971   :  { %4798 = vmatprep.subr.mxu1 %v5348_v26 }
 0xa29   :  { %v4764_v53 = vpop.f32.mrf.mxu1 }
 0xa2a   :  { %v855_v55 = vadd.f32 %v4764_v53, %v5424_v52 }
 0xa2b   :  { %v845_v56 = vpop.f32.mrf.mxu1 }
 0xa2c   :  { %v857_v57 = vmin.f32 %v855_v55, -1e-06  ;;  %v854_v58 = vadd.f32 %v845_v56, %v5429_v54 }
 0xa2e   :  { %v859_v60 = vmul.f32 -2.0, %v857_v57  ;;  %v856_v0 = vmin.f32 %v854_v58, -1e-06 }
 0xa30   :  { %5052 = vrsqrt.f32 %v859_v60  ;;  %v858_v1 = vmul.f32 -2.0, %v856_v0 }
 0xa32   :  { %5054 = vrsqrt.f32 %v858_v1 }
 0xa3d   :  { %v5053_v3 = vpop.eup %5052 }
 0xa3e   :  { %v863_v6 = vmul.f32 %v5053_v3, %v5053_v3  ;;  %v886_v12 = vmul.f32 %v5053_v3, %v882_v9 }
 0xa3f   :  { %v5055_v7 = vpop.eup %5054 }
 0xa40   :  { %868 = vrot.lane.b32.xlu1 %v863_v6, %s5199_s19  ;;  %v862_v10 = vmul.f32 %v5055_v7, %v5055_v7  ;;  %v885_v13 = vmul.f32 %v5055_v7, %v880_v11 }
 0xa42   :  { %866 = vrot.lane.b32.xlu0 %v862_v10, %s5199_s19 }
 0xa44   :  { %891 = vrot.lane.b32.xlu1 %v886_v12, %s5199_s19 }
 0xa46   :  { %889 = vrot.lane.b32.xlu0 %v885_v13, %s5199_s19 }
 0xab2   :  { %v869_v15 = vpop.permute.xlu1 %868 }
 0xab3   :  { %v873_v22 = vmul.f32 %v869_v15, %v855_v55 }
 0xab4   :  { %v867_v18 = vpop.permute.xlu0 %866 }
 0xab5   :  { %v872_v24 = vmul.f32 %v867_v18, %v854_v58 }
 0xab6   :  { %v892_v23 = vpop.permute.xlu1 %891 }
 0xab7   :  { %v5635_v25 = vadd.f32 %v892_v23, %v873_v22 }
 0xab8   :  { %v890_v28 = vpop.permute.xlu0 %889 }
 0xab9   :  { %7038 = vst [vmem:[#allocation5_spill] sm:$0xff] %v5635_v25  ;;  %v5639_v30 = vadd.f32 %v890_v28, %v872_v24  ;;  %v908_v32 = vmul.f32 %v5635_v25, %v5635_v25 }
 0xabb   :  { %7039 = vst [vmem:[#allocation6_spill] sm:$0xff] %v5639_v30  ;;  %4398 = vst.msk [vmem:[%s7016_s13 + $0x10] sm:$0xff] %vm69_vm0, %v5639_v30  ;;  %915 = vrot.lane.b32.xlu1 %v908_v32, %s5198_s22  ;;  %v5651_v37 = vadd.f32 %v908_v32, %v626_v29  ;;  %v907_v20 = vmul.f32 %v5639_v30, %v5639_v30  ;;  %v4406_v32 = vld [vmem:[%s7010_s7 + $0x38] sm:$0xff] }
 0xabd   :  { %913 = vrot.lane.b32.xlu0 %v907_v20, %s5198_s22  ;;  %v5659_v21 = vadd.f32 %v907_v20, %v625_v33  ;;  %v4405_v20 = vld [vmem:[%s7010_s7 + $0x30] sm:$0xff] }
 0xabf   :  { %1029 = vrot.lane.b32.xlu1 %v4402_v48, %s5198_s22 }
 0xac1   :  { %1027 = vrot.lane.b32.xlu0 %v4401_v49, %s5198_s22 }
 0xb2d   :  { %v916_v38 = vpop.permute.xlu1 %915 }
 0xb2e   :  { %v920_v63 = vsel %vm69_vm0, %v5635_v25, %v916_v38 }
 0xb2f   :  { %v914_v44 = vpop.permute.xlu0 %913 }
 0xb30   :  { %v919_v62 = vsel %vm69_vm0, %v5639_v30, %v914_v44 }
 0xb31   :  { %4773 = vmatprep.mubr.msk.f32.mxu0 %vm72_vm1, %v919_v62  ;;  %v1030_v1 = vpop.permute.xlu1 %1029 }
 0xb32   :  { %4774 = vmatmul.mubr.msk.f32.vlgmr.msra.gmra.mxu0 %vm72_vm1, %v920_v63 }
 0xb33   :  { %4788 = vmatpush3.msra.mxu0 %v5285_v2  ;;  %v1028_v6 = vpop.permute.xlu0 %1027 }
 0xb34   :  { %4789 = vmatprep.subr.mxu0 %v5291_v4 }
 0xb35   :  { %4790 = vmatpush3.msra.mxu0 %v5291_v4 }
 0xb36   :  { %4791 = vmatprep.subr.mxu0 %v5297_v5 }
 0xb37   :  { %4792 = vmatpush3.msra.mxu0 %v5297_v5 }
 0xb38   :  { %4793 = vmatprep.subr.mxu0 %v5308_v8 }
 0xb39   :  { %4794 = vmatpush3.msra.mxu0 %v5308_v8 }
 0xb3a   :  { %4809 = vmatprep.subr.mxu0 %v5285_v2 }
 0xbf2   :  { %v4775_v40 = vpop.f32.mrf.mxu0 }
 0xbf3   :  { %v1003_v46 = vadd.f32 %v4775_v40, %v5336_v14 }
 0xbf4   :  { %v993_v50 = vpop.f32.mrf.mxu0 }
 0xbf5   :  { %v1005_v51 = vmin.f32 %v1003_v46, -1e-06  ;;  %v1002_v53 = vadd.f32 %v993_v50, %v5341_v16 }
 0xbf7   :  { %v1007_v55 = vmul.f32 -2.0, %v1005_v51  ;;  %v1004_v56 = vmin.f32 %v1002_v53, -1e-06 }
 0xbf9   :  { %5056 = vrsqrt.f32 %v1007_v55  ;;  %v1006_v57 = vmul.f32 -2.0, %v1004_v56 }
 0xbfb   :  { %5058 = vrsqrt.f32 %v1006_v57 }
 0xc06   :  { %v5057_v58 = vpop.eup %5056 }
 0xc07   :  { %v1011_v60 = vmul.f32 %v5057_v58, %v5057_v58  ;;  %v1034_v7 = vmul.f32 %v5057_v58, %v1030_v1 }
 0xc08   :  { %v5059_v0 = vpop.eup %5058 }
 0xc09   :  { %1016 = vrot.lane.b32.xlu1 %v1011_v60, %s5199_s19  ;;  %v1010_v3 = vmul.f32 %v5059_v0, %v5059_v0  ;;  %v1033_v9 = vmul.f32 %v5059_v0, %v1028_v6 }
 0xc0b   :  { %1014 = vrot.lane.b32.xlu0 %v1010_v3, %s5199_s19 }
 0xc0d   :  { %1039 = vrot.lane.b32.xlu1 %v1034_v7, %s5199_s19 }
 0xc0f   :  { %1037 = vrot.lane.b32.xlu0 %v1033_v9, %s5199_s19 }
 0xc7b   :  { %v1017_v10 = vpop.permute.xlu1 %1016 }
 0xc7c   :  { %v1021_v12 = vmul.f32 %v1017_v10, %v1003_v46 }
 0xc7d   :  { %v1015_v11 = vpop.permute.xlu0 %1014 }
 0xc7e   :  { %v1020_v15 = vmul.f32 %v1015_v11, %v1002_v53 }
 0xc7f   :  { %v1040_v13 = vpop.permute.xlu1 %1039 }
 0xc80   :  { %v5686_v18 = vadd.f32 %v1040_v13, %v1021_v12 }
 0xc81   :  { %v1038_v22 = vpop.permute.xlu0 %1037 }
 0xc82   :  { %v5688_v23 = vadd.f32 %v1038_v22, %v1020_v15  ;;  %v1046_v24 = vmul.f32 %v5686_v18, %v5686_v18 }
 0xc84   :  { %4407 = vst.msk [vmem:[%s7015_s12 + $0x18] sm:$0xff] %vm69_vm0, %v5688_v23  ;;  %1051 = vrot.lane.b32.xlu1 %v1046_v24, %s5198_s22  ;;  %v5699_v28 = vadd.f32 %v1046_v24, %v5600_v39  ;;  %v1045_v29 = vmul.f32 %v5688_v23, %v5688_v23 }
 0xc86   :  { %1049 = vrot.lane.b32.xlu0 %v1045_v29, %s5198_s22  ;;  %v5708_v33 = vadd.f32 %v1045_v29, %v5608_v45  ;;  %v4412_v29 = vld [vmem:[%s7009_s6 + $0x48] sm:$0xff] }
 0xc88   :  { %1165 = vrot.lane.b32.xlu1 %v4406_v32, %s5198_s22 }
 0xc8a   :  { %1163 = vrot.lane.b32.xlu0 %v4405_v20, %s5198_s22  ;;  %v4411_v20 = vld [vmem:[%s7009_s6 + $0x40] sm:$0xff] }
 0xcf6   :  { %v1052_v39 = vpop.permute.xlu1 %1051 }
 0xcf7   :  { %v1056_v38 = vsel %vm69_vm0, %v5686_v18, %v1052_v39 }
 0xcf8   :  { %v1050_v48 = vpop.permute.xlu0 %1049 }
 0xcf9   :  { %v1055_v49 = vsel %vm69_vm0, %v5688_v23, %v1050_v48 }
 0xcfa   :  { %4784 = vmatprep.mubr.msk.f32.mxu1 %vm72_vm1, %v1055_v49  ;;  %v1166_v57 = vpop.permute.xlu1 %1165 }
 0xcfb   :  { %4785 = vmatmul.mubr.msk.f32.vlgmr.msra.gmra.mxu1 %vm72_vm1, %v1056_v38 }
 0xcfc   :  { %4799 = vmatpush3.msra.mxu1 %v5348_v26  ;;  %v1164_v60 = vpop.permute.xlu0 %1163 }
 0xcfd   :  { %4800 = vmatprep.subr.mxu1 %v5353_v27 }
 0xcfe   :  { %4801 = vmatpush3.msra.mxu1 %v5353_v27 }
 0xcff   :  { %4802 = vmatprep.subr.mxu1 %v5366_v34 }
 0xd00   :  { %4803 = vmatpush3.msra.mxu1 %v5366_v34 }
 0xd01   :  { %4804 = vmatprep.subr.mxu1 %v5373_v35 }
 0xd02   :  { %4805 = vmatpush3.msra.mxu1 %v5373_v35 }
 0xd03   :  { %4820 = vmatprep.subr.mxu1 %v5348_v26 }
 0xdbb   :  { %v4786_v45 = vpop.f32.mrf.mxu1 }
 0xdbc   :  { %v1139_v44 = vadd.f32 %v4786_v45, %v5424_v52 }
 0xdbd   :  { %v1129_v62 = vpop.f32.mrf.mxu1 }
 0xdbe   :  { %v1141_v63 = vmin.f32 %v1139_v44, -1e-06  ;;  %v1138_v40 = vadd.f32 %v1129_v62, %v5429_v54 }
 0xdc0   :  { %v1143_v46 = vmul.f32 -2.0, %v1141_v63  ;;  %v1140_v50 = vmin.f32 %v1138_v40, -1e-06 }
 0xdc2   :  { %5060 = vrsqrt.f32 %v1143_v46  ;;  %v1142_v51 = vmul.f32 -2.0, %v1140_v50 }
 0xdc4   :  { %5062 = vrsqrt.f32 %v1142_v51 }
 0xdcf   :  { %v5061_v53 = vpop.eup %5060 }
 0xdd0   :  { %v1147_v55 = vmul.f32 %v5061_v53, %v5061_v53  ;;  %v1170_v0 = vmul.f32 %v5061_v53, %v1166_v57 }
 0xdd1   :  { %v5063_v56 = vpop.eup %5062 }
 0xdd2   :  { %1152 = vrot.lane.b32.xlu1 %v1147_v55, %s5199_s19  ;;  %v1146_v58 = vmul.f32 %v5063_v56, %v5063_v56  ;;  %v1169_v1 = vmul.f32 %v5063_v56, %v1164_v60 }
 0xdd4   :  { %1150 = vrot.lane.b32.xlu0 %v1146_v58, %s5199_s19 }
 0xdd6   :  { %1175 = vrot.lane.b32.xlu1 %v1170_v0, %s5199_s19 }
 0xdd8   :  { %1173 = vrot.lane.b32.xlu0 %v1169_v1, %s5199_s19 }
 0xe44   :  { %v1153_v3 = vpop.permute.xlu1 %1152 }
 0xe45   :  { %v1157_v7 = vmul.f32 %v1153_v3, %v1139_v44 }
 0xe46   :  { %v1151_v6 = vpop.permute.xlu0 %1150 }
 0xe47   :  { %v1156_v10 = vmul.f32 %v1151_v6, %v1138_v40 }
 0xe48   :  { %v1176_v9 = vpop.permute.xlu1 %1175 }
 0xe49   :  { %v5735_v11 = vadd.f32 %v1176_v9, %v1157_v7  ;;  %v4416_v9 = vld [vmem:[%s7010_s7 + $0x48] sm:$0xff] }
 0xe4a   :  { %v1174_v12 = vpop.permute.xlu0 %1173 }
 0xe4b   :  { %7040 = vst [vmem:[#allocation7_spill] sm:$0xff] %v5735_v11  ;;  %v5737_v13 = vadd.f32 %v1174_v12, %v1156_v10  ;;  %v1192_v15 = vmul.f32 %v5735_v11, %v5735_v11  ;;  %v4415_v12 = vld [vmem:[%s7010_s7 + $0x40] sm:$0xff] }
 0xe4d   :  { %7041 = vst [vmem:[#allocation8_spill] sm:$0xff] %v5737_v13  ;;  %4408 = vst.msk [vmem:[%s7016_s13 + $0x18] sm:$0xff] %vm69_vm0, %v5737_v13  ;;  %1199 = vrot.lane.b32.xlu1 %v1192_v15, %s5198_s22  ;;  %v5748_v22 = vadd.f32 %v1192_v15, %v5651_v37  ;;  %v1191_v24 = vmul.f32 %v5737_v13, %v5737_v13 }
 0xe4f   :  { %1197 = vrot.lane.b32.xlu0 %v1191_v24, %s5198_s22  ;;  %v5757_v32 = vadd.f32 %v1191_v24, %v5659_v21 }
 0xe51   :  { %1313 = vrot.lane.b32.xlu1 %v4412_v29, %s5198_s22 }
 0xe53   :  { %1311 = vrot.lane.b32.xlu0 %v4411_v20, %s5198_s22 }
 0xebf   :  { %v1200_v37 = vpop.permute.xlu1 %1199 }
 0xec0   :  { %v1204_v49 = vsel %vm69_vm0, %v5735_v11, %v1200_v37 }
 0xec1   :  { %v1198_v39 = vpop.permute.xlu0 %1197 }
 0xec2   :  { %v1203_v48 = vsel %vm69_vm0, %v5737_v13, %v1198_v39 }
 0xec3   :  { %4795 = vmatprep.mubr.msk.f32.mxu0 %vm72_vm1, %v1203_v48  ;;  %v1314_v51 = vpop.permute.xlu1 %1313 }
 0xec4   :  { %4796 = vmatmul.mubr.msk.f32.vlgmr.msra.gmra.mxu0 %vm72_vm1, %v1204_v49 }
 0xec5   :  { %4810 = vmatpush3.msra.mxu0 %v5285_v2 }
 0xec6   :  { %4811 = vmatprep.subr.mxu0 %v5291_v4 }
 0xec7   :  { %4812 = vmatpush3.msra.mxu0 %v5291_v4 }
 0xec8   :  { %4813 = vmatprep.subr.mxu0 %v5297_v5 }
 0xec9   :  { %4814 = vmatpush3.msra.mxu0 %v5297_v5 }
 0xeca   :  { %4815 = vmatprep.subr.mxu0 %v5308_v8 }
 0xecb   :  { %4816 = vmatpush3.msra.mxu0 %v5308_v8 }
 0xecc   :  { %4831 = vmatprep.subr.mxu0 %v5285_v2  ;;  %v1312_v2 = vpop.permute.xlu0 %1311 }
 0xf84   :  { %v4797_v21 = vpop.f32.mrf.mxu0 }
 0xf85   :  { %v1287_v38 = vadd.f32 %v4797_v21, %v5336_v14 }
 0xf86   :  { %v1277_v45 = vpop.f32.mrf.mxu0 }
 0xf87   :  { %v1289_v44 = vmin.f32 %v1287_v38, -1e-06  ;;  %v1286_v62 = vadd.f32 %v1277_v45, %v5341_v16 }
 0xf89   :  { %v1291_v63 = vmul.f32 -2.0, %v1289_v44  ;;  %v1288_v40 = vmin.f32 %v1286_v62, -1e-06 }
 0xf8b   :  { %5064 = vrsqrt.f32 %v1291_v63  ;;  %v1290_v4 = vmul.f32 -2.0, %v1288_v40 }
 0xf8d   :  { %5066 = vrsqrt.f32 %v1290_v4 }
 0xf98   :  { %v5065_v46 = vpop.eup %5064 }
 0xf99   :  { %v1295_v5 = vmul.f32 %v5065_v46, %v5065_v46  ;;  %v1318_v53 = vmul.f32 %v5065_v46, %v1314_v51 }
 0xf9a   :  { %v5067_v50 = vpop.eup %5066 }
 0xf9b   :  { %1300 = vrot.lane.b32.xlu1 %v1295_v5, %s5199_s19  ;;  %v1294_v8 = vmul.f32 %v5067_v50, %v5067_v50  ;;  %v1317_v14 = vmul.f32 %v5067_v50, %v1312_v2 }
 0xf9d   :  { %1298 = vrot.lane.b32.xlu0 %v1294_v8, %s5199_s19 }
 0xf9f   :  { %1323 = vrot.lane.b32.xlu1 %v1318_v53, %s5199_s19 }
 0xfa1   :  { %1321 = vrot.lane.b32.xlu0 %v1317_v14, %s5199_s19  ;;  %v4422_v14 = vld [vmem:[%s7009_s6 + $0x58] sm:$0xff] }
0x100d   :  { %v1301_v16 = vpop.permute.xlu1 %1300 }
0x100e   :  { %v1305_v56 = vmul.f32 %v1301_v16, %v1287_v38 }
0x100f   :  { %v1299_v55 = vpop.permute.xlu0 %1298 }
0x1010   :  { %v1304_v58 = vmul.f32 %v1299_v55, %v1286_v62  ;;  %v4421_v55 = vld [vmem:[%s7009_s6 + $0x50] sm:$0xff] }
0x1011   :  { %v1324_v57 = vpop.permute.xlu1 %1323 }
0x1012   :  { %v5784_v60 = vadd.f32 %v1324_v57, %v1305_v56 }
0x1013   :  { %v1322_v0 = vpop.permute.xlu0 %1321 }
0x1014   :  { %v5786_v1 = vadd.f32 %v1322_v0, %v1304_v58  ;;  %v1330_v3 = vmul.f32 %v5784_v60, %v5784_v60  ;;  %v5877_v0 = vld [vmem:[%s7003_s0 + $0x10] sm:$0xff] }
0x1016   :  { %4417 = vst.msk [vmem:[%s7015_s12 + $0x20] sm:$0xff] %vm69_vm0, %v5786_v1  ;;  %1335 = vrot.lane.b32.xlu1 %v1330_v3, %s5198_s22  ;;  %v5797_v6 = vadd.f32 %v1330_v3, %v5699_v28  ;;  %v1329_v7 = vmul.f32 %v5786_v1, %v5786_v1  ;;  %v5884_v3 = vld [vmem:[%s7003_s0 + $0x8] sm:$0xff] }
0x1018   :  { %1333 = vrot.lane.b32.xlu0 %v1329_v7, %s5198_s22  ;;  %v5806_v10 = vadd.f32 %v1329_v7, %v5708_v33  ;;  %v5891_v7 = vld [vmem:[%s7003_s0] sm:$0xff] }
0x101a   :  { %1449 = vrot.lane.b32.xlu1 %v4416_v9, %s5198_s22 }
0x101c   :  { %1447 = vrot.lane.b32.xlu0 %v4415_v12, %s5198_s22  ;;  %v5899_v12 = vld [vmem:[%s7005_s2 + $0x8] sm:$0xff] }
0x1088   :  { %v1336_v28 = vpop.permute.xlu1 %1335 }
0x1089   :  { %v1340_v29 = vsel %vm69_vm0, %v5784_v60, %v1336_v28 }
0x108a   :  { %v1334_v15 = vpop.permute.xlu0 %1333 }
0x108b   :  { %v1339_v24 = vsel %vm69_vm0, %v5786_v1, %v1334_v15 }
0x108c   :  { %4806 = vmatprep.mubr.msk.f32.mxu1 %vm72_vm1, %v1339_v24  ;;  %v1450_v44 = vpop.permute.xlu1 %1449 }
0x108d   :  { %4807 = vmatmul.mubr.msk.f32.vlgmr.msra.gmra.mxu1 %vm72_vm1, %v1340_v29  ;;  %v5905_v29 = vld [vmem:[%s7005_s2] sm:$0xff] }
0x108e   :  { %4821 = vmatpush3.msra.mxu1 %v5348_v26 }
0x108f   :  { %4822 = vmatprep.subr.mxu1 %v5353_v27 }
0x1090   :  { %4823 = vmatpush3.msra.mxu1 %v5353_v27 }
0x1091   :  { %4824 = vmatprep.subr.mxu1 %v5366_v34 }
0x1092   :  { %4825 = vmatpush3.msra.mxu1 %v5366_v34 }
0x1093   :  { %4826 = vmatprep.subr.mxu1 %v5373_v35 }
0x1094   :  { %4827 = vmatpush3.msra.mxu1 %v5373_v35 }
0x1095   :  { %4842 = vmatprep.subr.mxu1 %v5348_v26  ;;  %v1448_v26 = vpop.permute.xlu0 %1447 }
0x114d   :  { %v4808_v33 = vpop.f32.mrf.mxu1 }
0x114e   :  { %v1423_v20 = vadd.f32 %v4808_v33, %v5424_v52 }
0x114f   :  { %v1413_v37 = vpop.f32.mrf.mxu1 }
0x1150   :  { %v1425_v39 = vmin.f32 %v1423_v20, -1e-06  ;;  %v1422_v48 = vadd.f32 %v1413_v37, %v5429_v54 }
0x1152   :  { %v1427_v49 = vmul.f32 -2.0, %v1425_v39  ;;  %v1424_v21 = vmin.f32 %v1422_v48, -1e-06 }
0x1154   :  { %5068 = vrsqrt.f32 %v1427_v49  ;;  %v1426_v27 = vmul.f32 -2.0, %v1424_v21 }
0x1156   :  { %5070 = vrsqrt.f32 %v1426_v27 }
0x1161   :  { %v5069_v38 = vpop.eup %5068 }
0x1162   :  { %v1431_v34 = vmul.f32 %v5069_v38, %v5069_v38  ;;  %v1454_v62 = vmul.f32 %v5069_v38, %v1450_v44 }
0x1163   :  { %v5071_v45 = vpop.eup %5070 }
0x1164   :  { %1436 = vrot.lane.b32.xlu1 %v1431_v34, %s5199_s19  ;;  %v1430_v35 = vmul.f32 %v5071_v45, %v5071_v45  ;;  %v1453_v52 = vmul.f32 %v5071_v45, %v1448_v26 }
0x1166   :  { %1434 = vrot.lane.b32.xlu0 %v1430_v35, %s5199_s19 }
0x1168   :  { %1459 = vrot.lane.b32.xlu1 %v1454_v62, %s5199_s19 }
0x116a   :  { %1457 = vrot.lane.b32.xlu0 %v1453_v52, %s5199_s19 }
0x11d6   :  { %v1437_v54 = vpop.permute.xlu1 %1436 }
0x11d7   :  { %v1441_v40 = vmul.f32 %v1437_v54, %v1423_v20 }
0x11d8   :  { %v1435_v63 = vpop.permute.xlu0 %1434 }
0x11d9   :  { %v1440_v46 = vmul.f32 %v1435_v63, %v1422_v48 }
0x11da   :  { %v1460_v4 = vpop.permute.xlu1 %1459 }
0x11db   :  { %v5833_v5 = vadd.f32 %v1460_v4, %v1441_v40 }
0x11dc   :  { %v1458_v50 = vpop.permute.xlu0 %1457 }
0x11dd   :  { %7042 = vst [vmem:[#allocation9_spill] sm:$0xff] %v5833_v5  ;;  %v5835_v51 = vadd.f32 %v1458_v50, %v1440_v46  ;;  %v1476_v8 = vmul.f32 %v5833_v5, %v5833_v5 }
0x11df   :  { %7043 = vst [vmem:[#allocation10_spill] sm:$0xff] %v5835_v51  ;;  %4418 = vst.msk [vmem:[%s7016_s13 + $0x20] sm:$0xff] %vm69_vm0, %v5835_v51  ;;  %1483 = vrot.lane.b32.xlu1 %v1476_v8, %s5198_s22  ;;  %v5846_v2 = vadd.f32 %v1476_v8, %v5748_v22  ;;  %v1475_v53 = vmul.f32 %v5835_v51, %v5835_v51 }
0x11e1   :  { %1481 = vrot.lane.b32.xlu0 %v1475_v53, %s5198_s22  ;;  %v5855_v16 = vadd.f32 %v1475_v53, %v5757_v32  ;;  %v5871_v32 = vld [vmem:[%s7003_s0 + $0x18] sm:$0xff] }
0x11e2   :  { %v4426_v53 = vld [vmem:[%s7010_s7 + $0x58] sm:$0xff] }
0x11e3   :  { %1597 = vrot.lane.b32.xlu1 %v4422_v14, %s5198_s22 }
0x11e5   :  { %1595 = vrot.lane.b32.xlu0 %v4421_v55, %s5198_s22  ;;  %v4425_v55 = vld [vmem:[%s7010_s7 + $0x50] sm:$0xff] }
0x1251   :  { %v1484_v22 = vpop.permute.xlu1 %1483 }
0x1252   :  { %v1488_v58 = vsel %vm69_vm0, %v5833_v5, %v1484_v22 }
0x1253   :  { %v1482_v56 = vpop.permute.xlu0 %1481 }
0x1254   :  { %v1487_v57 = vsel %vm69_vm0, %v5835_v51, %v1482_v56 }
0x1255   :  { %4817 = vmatprep.mubr.msk.f32.mxu0 %vm72_vm1, %v1487_v57  ;;  %v1598_v27 = vpop.permute.xlu1 %1597 }
0x1256   :  { %4818 = vmatmul.mubr.msk.f32.vlgmr.msra.gmra.mxu0 %vm72_vm1, %v1488_v58  ;;  %v5956_v58 = vld [vmem:[%s7004_s1 + $0x10] sm:$0xff] }
0x1257   :  { %4832 = vmatpush3.msra.mxu0 %v5871_v32  ;;  %v1596_v34 = vpop.permute.xlu0 %1595 }
0x1258   :  { %4833 = vmatprep.subr.mxu0 %v5877_v0 }
0x1259   :  { %4834 = vmatpush3.msra.mxu0 %v5877_v0 }
0x125a   :  { %4835 = vmatprep.subr.mxu0 %v5884_v3 }
0x125b   :  { %4836 = vmatpush3.msra.mxu0 %v5884_v3 }
0x125c   :  { %4837 = vmatprep.subr.mxu0 %v5891_v7 }
0x125d   :  { %4838 = vmatpush3.msra.mxu0 %v5891_v7 }
0x125e   :  { %4853 = vmatprep.subr.mxu0 %v5871_v32 }
0x1316   :  { %v4819_v9 = vpop.f32.mrf.mxu0 }
0x1317   :  { %v1571_v28 = vadd.f32 %v5899_v12, %v4819_v9  ;;  %v5963_v9 = vld [vmem:[%s7004_s1 + $0x8] sm:$0xff] }
0x1318   :  { %v1561_v15 = vpop.f32.mrf.mxu0 }
0x1319   :  { %v1573_v24 = vmin.f32 %v1571_v28, -1e-06  ;;  %v1570_v33 = vadd.f32 %v5905_v29, %v1561_v15 }
0x131b   :  { %v1575_v20 = vmul.f32 -2.0, %v1573_v24  ;;  %v1572_v37 = vmin.f32 %v1570_v33, -1e-06  ;;  %v5978_v24 = vld [vmem:[%s7006_s3 + $0x8] sm:$0xff] }
0x131d   :  { %5072 = vrsqrt.f32 %v1575_v20  ;;  %v1574_v39 = vmul.f32 -2.0, %v1572_v37 }
0x131f   :  { %5074 = vrsqrt.f32 %v1574_v39  ;;  %v5984_v39 = vld [vmem:[%s7006_s3] sm:$0xff] }
0x132a   :  { %v5073_v48 = vpop.eup %5072 }
0x132b   :  { %v1579_v49 = vmul.f32 %v5073_v48, %v5073_v48  ;;  %v1602_v45 = vmul.f32 %v5073_v48, %v1598_v27 }
0x132c   :  { %v5075_v21 = vpop.eup %5074 }
0x132d   :  { %1584 = vrot.lane.b32.xlu1 %v1579_v49, %s5199_s19  ;;  %v1578_v38 = vmul.f32 %v5075_v21, %v5075_v21  ;;  %v1601_v44 = vmul.f32 %v5075_v21, %v1596_v34 }
0x132f   :  { %1582 = vrot.lane.b32.xlu0 %v1578_v38, %s5199_s19 }
0x1331   :  { %1607 = vrot.lane.b32.xlu1 %v1602_v45, %s5199_s19 }
0x1333   :  { %1605 = vrot.lane.b32.xlu0 %v1601_v44, %s5199_s19 }
0x139f   :  { %v1585_v35 = vpop.permute.xlu1 %1584 }
0x13a0   :  { %v1589_v62 = vmul.f32 %v1585_v35, %v1571_v28  ;;  %v5970_v28 = vld [vmem:[%s7004_s1] sm:$0xff] }
0x13a1   :  { %v1583_v26 = vpop.permute.xlu0 %1582 }
0x13a2   :  { %v1588_v54 = vmul.f32 %v1583_v26, %v1570_v33 }
0x13a3   :  { %v1608_v52 = vpop.permute.xlu1 %1607 }
0x13a4   :  { %v5912_v63 = vadd.f32 %v1608_v52, %v1589_v62 }
0x13a5   :  { %v1606_v40 = vpop.permute.xlu0 %1605 }
0x13a6   :  { %v5914_v4 = vadd.f32 %v1606_v40, %v1588_v54  ;;  %v1614_v46 = vmul.f32 %v5912_v63, %v5912_v63 }
0x13a8   :  { %4427 = vst.msk [vmem:[%s7015_s12 + $0x28] sm:$0xff] %vm69_vm0, %v5914_v4  ;;  %1619 = vrot.lane.b32.xlu1 %v1614_v46, %s5198_s22  ;;  %v5925_v50 = vadd.f32 %v1614_v46, %v5797_v6  ;;  %v1613_v8 = vmul.f32 %v5914_v4, %v5914_v4 }
0x13aa   :  { %1617 = vrot.lane.b32.xlu0 %v1613_v8, %s5198_s22  ;;  %v5934_v14 = vadd.f32 %v1613_v8, %v5806_v10  ;;  %v5950_v10 = vld [vmem:[%s7004_s1 + $0x18] sm:$0xff] }
0x13ac   :  { %1733 = vrot.lane.b32.xlu1 %v4426_v53, %s5198_s22 }
0x13ae   :  { %1731 = vrot.lane.b32.xlu0 %v4425_v55, %s5198_s22 }
0x141a   :  { %v1620_v6 = vpop.permute.xlu1 %1619 }
0x141b   :  { %v1624_v57 = vsel %vm69_vm0, %v5912_v63, %v1620_v6 }
0x141c   :  { %v1618_v22 = vpop.permute.xlu0 %1617 }
0x141d   :  { %v1623_v56 = vsel %vm69_vm0, %v5914_v4, %v1618_v22 }
0x141e   :  { %4828 = vmatprep.mubr.msk.f32.mxu1 %vm72_vm1, %v1623_v56  ;;  %v1734_v44 = vpop.permute.xlu1 %1733 }
0x141f   :  { %4829 = vmatmul.mubr.msk.f32.vlgmr.msra.gmra.mxu1 %vm72_vm1, %v1624_v57 }
0x1420   :  { %4843 = vmatpush3.msra.mxu1 %v5950_v10  ;;  %v1732_v26 = vpop.permute.xlu0 %1731 }
0x1421   :  { %4844 = vmatprep.subr.mxu1 %v5956_v58 }
0x1422   :  { %4845 = vmatpush3.msra.mxu1 %v5956_v58 }
0x1423   :  { %4846 = vmatprep.subr.mxu1 %v5963_v9 }
0x1424   :  { %4847 = vmatpush3.msra.mxu1 %v5963_v9 }
0x1425   :  { %4848 = vmatprep.subr.mxu1 %v5970_v28 }
0x1426   :  { %4849 = vmatpush3.msra.mxu1 %v5970_v28 }
0x1427   :  { %4864 = vmatprep.subr.mxu1 %v5950_v10 }
0x14df   :  { %v4830_v15 = vpop.f32.mrf.mxu1 }
0x14e0   :  { %v1707_v33 = vadd.f32 %v5978_v24, %v4830_v15 }
0x14e1   :  { %v1697_v20 = vpop.f32.mrf.mxu1 }
0x14e2   :  { %v1709_v37 = vmin.f32 %v1707_v33, -1e-06  ;;  %v1706_v48 = vadd.f32 %v5984_v39, %v1697_v20 }
0x14e4   :  { %v1711_v49 = vmul.f32 -2.0, %v1709_v37  ;;  %v1708_v21 = vmin.f32 %v1706_v48, -1e-06  ;;  %v4431_v37 = vld [vmem:[%s7009_s6 + $0x60] sm:$0xff] }
0x14e6   :  { %5076 = vrsqrt.f32 %v1711_v49  ;;  %v1710_v27 = vmul.f32 -2.0, %v1708_v21 }
0x14e8   :  { %5078 = vrsqrt.f32 %v1710_v27 }
0x14f3   :  { %v5077_v38 = vpop.eup %5076 }
0x14f4   :  { %v1715_v34 = vmul.f32 %v5077_v38, %v5077_v38  ;;  %v1738_v62 = vmul.f32 %v5077_v38, %v1734_v44 }
0x14f5   :  { %v5079_v45 = vpop.eup %5078 }
0x14f6   :  { %1720 = vrot.lane.b32.xlu1 %v1715_v34, %s5199_s19  ;;  %v1714_v35 = vmul.f32 %v5079_v45, %v5079_v45  ;;  %v1737_v52 = vmul.f32 %v5079_v45, %v1732_v26 }
0x14f8   :  { %1718 = vrot.lane.b32.xlu0 %v1714_v35, %s5199_s19 }
0x14fa   :  { %1743 = vrot.lane.b32.xlu1 %v1738_v62, %s5199_s19 }
0x14fc   :  { %1741 = vrot.lane.b32.xlu0 %v1737_v52, %s5199_s19 }
0x1568   :  { %v1721_v54 = vpop.permute.xlu1 %1720 }
0x1569   :  { %v1725_v46 = vmul.f32 %v1721_v54, %v1707_v33  ;;  %v4432_v33 = vld [vmem:[%s7009_s6 + $0x68] sm:$0xff] }
0x156a   :  { %v1719_v40 = vpop.permute.xlu0 %1718 }
0x156b   :  { %v1724_v53 = vmul.f32 %v1719_v40, %v1706_v48 }
0x156c   :  { %v1744_v8 = vpop.permute.xlu1 %1743 }
0x156d   :  { %v5991_v55 = vadd.f32 %v1744_v8, %v1725_v46 }
0x156e   :  { %v1742_v6 = vpop.permute.xlu0 %1741 }
0x156f   :  { %7044 = vst [vmem:[#allocation11_spill] sm:$0xff] %v5991_v55  ;;  %v5993_v22 = vadd.f32 %v1742_v6, %v1724_v53  ;;  %v1760_v56 = vmul.f32 %v5991_v55, %v5991_v55 }
0x1571   :  { %7045 = vst [vmem:[#allocation12_spill] sm:$0xff] %v5993_v22  ;;  %4428 = vst.msk [vmem:[%s7016_s13 + $0x28] sm:$0xff] %vm69_vm0, %v5993_v22  ;;  %1767 = vrot.lane.b32.xlu1 %v1760_v56, %s5198_s22  ;;  %v6004_v57 = vadd.f32 %v1760_v56, %v5846_v2  ;;  %v1759_v15 = vmul.f32 %v5993_v22, %v5993_v22 }
0x1573   :  { %1765 = vrot.lane.b32.xlu0 %v1759_v15, %s5198_s22  ;;  %v6013_v20 = vadd.f32 %v1759_v15, %v5855_v16 }
0x1575   :  { %1881 = vrot.lane.b32.xlu1 %v4432_v33, %s5198_s22 }
0x1577   :  { %1879 = vrot.lane.b32.xlu0 %v4431_v37, %s5198_s22 }
0x15e3   :  { %v1768_v2 = vpop.permute.xlu1 %1767 }
0x15e4   :  { %v1772_v21 = vsel %vm69_vm0, %v5991_v55, %v1768_v2 }
0x15e5   :  { %v1766_v48 = vpop.permute.xlu0 %1765 }
0x15e6   :  { %v1771_v49 = vsel %vm69_vm0, %v5993_v22, %v1766_v48 }
0x15e7   :  { %4839 = vmatprep.mubr.msk.f32.mxu0 %vm72_vm1, %v1771_v49  ;;  %v1882_v40 = vpop.permute.xlu1 %1881 }
0x15e8   :  { %4840 = vmatmul.mubr.msk.f32.vlgmr.msra.gmra.mxu0 %vm72_vm1, %v1772_v21 }
0x15e9   :  { %4854 = vmatpush3.msra.mxu0 %v5871_v32  ;;  %v1880_v8 = vpop.permute.xlu0 %1879 }
0x15ea   :  { %4855 = vmatprep.subr.mxu0 %v5877_v0 }
0x15eb   :  { %4856 = vmatpush3.msra.mxu0 %v5877_v0 }
0x15ec   :  { %4857 = vmatprep.subr.mxu0 %v5884_v3 }
0x15ed   :  { %4858 = vmatpush3.msra.mxu0 %v5884_v3 }
0x15ee   :  { %4859 = vmatprep.subr.mxu0 %v5891_v7 }
0x15ef   :  { %4860 = vmatpush3.msra.mxu0 %v5891_v7 }
0x15f0   :  { %4875 = vmatprep.subr.mxu0 %v5871_v32 }
0x16a8   :  { %v4841_v16 = vpop.f32.mrf.mxu0 }
0x16a9   :  { %v1855_v27 = vadd.f32 %v5899_v12, %v4841_v16 }
0x16aa   :  { %v1845_v38 = vpop.f32.mrf.mxu0 }
0x16ab   :  { %v1857_v34 = vmin.f32 %v1855_v27, -1e-06  ;;  %v1854_v45 = vadd.f32 %v5905_v29, %v1845_v38 }
0x16ad   :  { %v1859_v44 = vmul.f32 -2.0, %v1857_v34  ;;  %v1856_v35 = vmin.f32 %v1854_v45, -1e-06  ;;  %v4436_v34 = vld [vmem:[%s7010_s7 + $0x68] sm:$0xff] }
0x16af   :  { %5080 = vrsqrt.f32 %v1859_v44  ;;  %v1858_v26 = vmul.f32 -2.0, %v1856_v35 }
0x16b1   :  { %5082 = vrsqrt.f32 %v1858_v26 }
0x16bc   :  { %v5081_v62 = vpop.eup %5080 }
0x16bd   :  { %v1863_v52 = vmul.f32 %v5081_v62, %v5081_v62  ;;  %v1886_v53 = vmul.f32 %v5081_v62, %v1882_v40 }
0x16be   :  { %v5083_v54 = vpop.eup %5082 }
0x16bf   :  { %1868 = vrot.lane.b32.xlu1 %v1863_v52, %s5199_s19  ;;  %v1862_v46 = vmul.f32 %v5083_v54, %v5083_v54  ;;  %v1885_v6 = vmul.f32 %v5083_v54, %v1880_v8 }
0x16c1   :  { %1866 = vrot.lane.b32.xlu0 %v1862_v46, %s5199_s19 }
0x16c3   :  { %1891 = vrot.lane.b32.xlu1 %v1886_v53, %s5199_s19 }
0x16c5   :  { %1889 = vrot.lane.b32.xlu0 %v1885_v6, %s5199_s19 }
0x1731   :  { %v1869_v56 = vpop.permute.xlu1 %1868 }
0x1732   :  { %v1873_v33 = vmul.f32 %v1869_v56, %v1855_v27 }
0x1733   :  { %v1867_v15 = vpop.permute.xlu0 %1866 }
0x1734   :  { %v1872_v2 = vmul.f32 %v1867_v15, %v1854_v45  ;;  %v4435_v45 = vld [vmem:[%s7010_s7 + $0x60] sm:$0xff] }
0x1735   :  { %v1892_v37 = vpop.permute.xlu1 %1891 }
0x1736   :  { %v6040_v48 = vadd.f32 %v1892_v37, %v1873_v33 }
0x1737   :  { %v1890_v49 = vpop.permute.xlu0 %1889 }
0x1738   :  { %v1898_v21 = vmul.f32 %v6040_v48, %v6040_v48  ;;  %v6044_v16 = vadd.f32 %v1890_v49, %v1872_v2 }
0x173a   :  { %v6047_v38 = vadd.f32 %v1898_v21, %v5925_v50  ;;  %4437 = vst.msk [vmem:[%s7015_s12 + $0x30] sm:$0xff] %vm69_vm0, %v6044_v16  ;;  %1903 = vrot.lane.b32.xlu1 %v1898_v21, %s5198_s22  ;;  %v1897_v27 = vmul.f32 %v6044_v16, %v6044_v16 }
0x173c   :  { %1901 = vrot.lane.b32.xlu0 %v1897_v27, %s5198_s22  ;;  %v6062_v50 = vadd.f32 %v1897_v27, %v5934_v14 }
0x173e   :  { %2017 = vrot.lane.b32.xlu1 %v4436_v34, %s5198_s22 }
0x1740   :  { %2015 = vrot.lane.b32.xlu0 %v4435_v45, %s5198_s22 }
0x17ac   :  { %v1904_v44 = vpop.permute.xlu1 %1903 }
0x17ad   :  { %v1908_v62 = vsel %vm69_vm0, %v6040_v48, %v1904_v44 }
0x17ae   :  { %v1902_v35 = vpop.permute.xlu0 %1901 }
0x17af   :  { %v1907_v26 = vsel %vm69_vm0, %v6044_v16, %v1902_v35 }
0x17b0   :  { %4850 = vmatprep.mubr.msk.f32.mxu1 %vm72_vm1, %v1907_v26  ;;  %v2018_v37 = vpop.permute.xlu1 %2017 }
0x17b1   :  { %4851 = vmatmul.mubr.msk.f32.vlgmr.msra.gmra.mxu1 %vm72_vm1, %v1908_v62 }
0x17b2   :  { %4865 = vmatpush3.msra.mxu1 %v5950_v10  ;;  %v2016_v49 = vpop.permute.xlu0 %2015 }
0x17b3   :  { %4866 = vmatprep.subr.mxu1 %v5956_v58 }
0x17b4   :  { %4867 = vmatpush3.msra.mxu1 %v5956_v58 }
0x17b5   :  { %4868 = vmatprep.subr.mxu1 %v5963_v9 }
0x17b6   :  { %4869 = vmatpush3.msra.mxu1 %v5963_v9 }
0x17b7   :  { %4870 = vmatprep.subr.mxu1 %v5970_v28 }
0x17b8   :  { %4871 = vmatpush3.msra.mxu1 %v5970_v28 }
0x17b9   :  { %4886 = vmatprep.subr.mxu1 %v5950_v10 }
0x1871   :  { %v4852_v14 = vpop.f32.mrf.mxu1 }
0x1872   :  { %v1991_v52 = vadd.f32 %v5978_v24, %v4852_v14 }
0x1873   :  { %v1981_v54 = vpop.f32.mrf.mxu1 }
0x1874   :  { %v1993_v40 = vmin.f32 %v1991_v52, -1e-06  ;;  %v1990_v46 = vadd.f32 %v5984_v39, %v1981_v54 }
0x1876   :  { %v1995_v8 = vmul.f32 -2.0, %v1993_v40  ;;  %v1992_v53 = vmin.f32 %v1990_v46, -1e-06 }
0x1878   :  { %5084 = vrsqrt.f32 %v1995_v8  ;;  %v1994_v6 = vmul.f32 -2.0, %v1992_v53  ;;  %v4441_v53 = vld [vmem:[%s7009_s6 + $0x70] sm:$0xff] }
0x187a   :  { %5086 = vrsqrt.f32 %v1994_v6 }
0x1885   :  { %v5085_v56 = vpop.eup %5084 }
0x1886   :  { %v1999_v15 = vmul.f32 %v5085_v56, %v5085_v56  ;;  %v2022_v21 = vmul.f32 %v5085_v56, %v2018_v37 }
0x1887   :  { %v5087_v33 = vpop.eup %5086 }
0x1888   :  { %2004 = vrot.lane.b32.xlu1 %v1999_v15, %s5199_s19  ;;  %v1998_v2 = vmul.f32 %v5087_v33, %v5087_v33  ;;  %v2021_v27 = vmul.f32 %v5087_v33, %v2016_v49 }
0x188a   :  { %2002 = vrot.lane.b32.xlu0 %v1998_v2, %s5199_s19 }
0x188c   :  { %2027 = vrot.lane.b32.xlu1 %v2022_v21, %s5199_s19 }
0x188e   :  { %2025 = vrot.lane.b32.xlu0 %v2021_v27, %s5199_s19 }
0x18fa   :  { %v2005_v34 = vpop.permute.xlu1 %2004 }
0x18fb   :  { %v2009_v44 = vmul.f32 %v2005_v34, %v1991_v52 }
0x18fc   :  { %v2003_v45 = vpop.permute.xlu0 %2002 }
0x18fd   :  { %v2008_v26 = vmul.f32 %v2003_v45, %v1990_v46  ;;  %v4442_v46 = vld [vmem:[%s7009_s6 + $0x78] sm:$0xff] }
0x18fe   :  { %v2028_v35 = vpop.permute.xlu1 %2027 }
0x18ff   :  { %v6089_v62 = vadd.f32 %v2028_v35, %v2009_v44 }
0x1900   :  { %v2026_v14 = vpop.permute.xlu0 %2025 }
0x1901   :  { %7046 = vst [vmem:[#allocation13_spill] sm:$0xff] %v6089_v62  ;;  %v2044_v54 = vmul.f32 %v6089_v62, %v6089_v62  ;;  %v6093_v40 = vadd.f32 %v2026_v14, %v2008_v26 }
0x1903   :  { %7047 = vst [vmem:[#allocation14_spill] sm:$0xff] %v6093_v40  ;;  %v6096_v8 = vadd.f32 %v2044_v54, %v6004_v57  ;;  %4438 = vst.msk [vmem:[%s7016_s13 + $0x30] sm:$0xff] %vm69_vm0, %v6093_v40  ;;  %2051 = vrot.lane.b32.xlu1 %v2044_v54, %s5198_s22  ;;  %v2043_v52 = vmul.f32 %v6093_v40, %v6093_v40 }
0x1905   :  { %2049 = vrot.lane.b32.xlu0 %v2043_v52, %s5198_s22  ;;  %v6111_v57 = vadd.f32 %v2043_v52, %v6013_v20 }
0x1907   :  { %2165 = vrot.lane.b32.xlu1 %v4442_v46, %s5198_s22 }
0x1909   :  { %2163 = vrot.lane.b32.xlu0 %v4441_v53, %s5198_s22 }
0x1975   :  { %v2052_v6 = vpop.permute.xlu1 %2051 }
0x1976   :  { %v2056_v33 = vsel %vm69_vm0, %v6089_v62, %v2052_v6 }
0x1977   :  { %v2050_v56 = vpop.permute.xlu0 %2049 }
0x1978   :  { %v2055_v15 = vsel %vm69_vm0, %v6093_v40, %v2050_v56 }
0x1979   :  { %4861 = vmatprep.mubr.msk.f32.mxu0 %vm72_vm1, %v2055_v15  ;;  %v2166_v14 = vpop.permute.xlu1 %2165 }
0x197a   :  { %4862 = vmatmul.mubr.msk.f32.vlgmr.msra.gmra.mxu0 %vm72_vm1, %v2056_v33 }
0x197b   :  { %4876 = vmatpush3.msra.mxu0 %v5871_v32  ;;  %v2164_v52 = vpop.permute.xlu0 %2163 }
0x197c   :  { %4877 = vmatprep.subr.mxu0 %v5877_v0 }
0x197d   :  { %4878 = vmatpush3.msra.mxu0 %v5877_v0 }
0x197e   :  { %4879 = vmatprep.subr.mxu0 %v5884_v3 }
0x197f   :  { %4880 = vmatpush3.msra.mxu0 %v5884_v3 }
0x1980   :  { %4881 = vmatprep.subr.mxu0 %v5891_v7 }
0x1981   :  { %4882 = vmatpush3.msra.mxu0 %v5891_v7 }
0x1982   :  { %4897 = vmatprep.subr.mxu0 %v5871_v32 }
0x1a3a   :  { %v4863_v20 = vpop.f32.mrf.mxu0 }
0x1a3b   :  { %v2139_v37 = vadd.f32 %v5899_v12, %v4863_v20 }
0x1a3c   :  { %v2129_v2 = vpop.f32.mrf.mxu0 }
0x1a3d   :  { %v2141_v49 = vmin.f32 %v2139_v37, -1e-06  ;;  %v2138_v21 = vadd.f32 %v5905_v29, %v2129_v2 }
0x1a3f   :  { %v2143_v27 = vmul.f32 -2.0, %v2141_v49  ;;  %v2140_v34 = vmin.f32 %v2138_v21, -1e-06 }
0x1a41   :  { %5088 = vrsqrt.f32 %v2143_v27  ;;  %v2142_v45 = vmul.f32 -2.0, %v2140_v34 }
0x1a43   :  { %5090 = vrsqrt.f32 %v2142_v45 }
0x1a4e   :  { %v5089_v44 = vpop.eup %5088 }
0x1a4f   :  { %v2147_v35 = vmul.f32 %v5089_v44, %v5089_v44  ;;  %v2170_v46 = vmul.f32 %v5089_v44, %v2166_v14  ;;  %v4445_v44 = vld [vmem:[%s7010_s7 + $0x70] sm:$0xff] }
0x1a50   :  { %v5091_v26 = vpop.eup %5090 }
0x1a51   :  { %2152 = vrot.lane.b32.xlu1 %v2147_v35, %s5199_s19  ;;  %v2146_v54 = vmul.f32 %v5091_v26, %v5091_v26  ;;  %v2169_v53 = vmul.f32 %v5091_v26, %v2164_v52 }
0x1a53   :  { %2150 = vrot.lane.b32.xlu0 %v2146_v54, %s5199_s19 }
0x1a55   :  { %2175 = vrot.lane.b32.xlu1 %v2170_v46, %s5199_s19 }
0x1a57   :  { %2173 = vrot.lane.b32.xlu0 %v2169_v53, %s5199_s19 }
0x1ac3   :  { %v2153_v6 = vpop.permute.xlu1 %2152 }
0x1ac4   :  { %v2157_v15 = vmul.f32 %v2153_v6, %v2139_v37 }
0x1ac5   :  { %v2151_v56 = vpop.permute.xlu0 %2150 }
0x1ac6   :  { %v2156_v20 = vmul.f32 %v2151_v56, %v2138_v21  ;;  %v4446_v21 = vld [vmem:[%s7010_s7 + $0x78] sm:$0xff] }
0x1ac7   :  { %v2176_v33 = vpop.permute.xlu1 %2175 }
0x1ac8   :  { %v6138_v2 = vadd.f32 %v2176_v33, %v2157_v15 }
0x1ac9   :  { %v2174_v49 = vpop.permute.xlu0 %2173 }
0x1aca   :  { %v2182_v27 = vmul.f32 %v6138_v2, %v6138_v2  ;;  %v6142_v34 = vadd.f32 %v2174_v49, %v2156_v20 }
0x1acc   :  { %v6145_v45 = vadd.f32 %v2182_v27, %v6047_v38  ;;  %4447 = vst.msk [vmem:[%s7015_s12 + $0x38] sm:$0xff] %vm69_vm0, %v6142_v34  ;;  %2187 = vrot.lane.b32.xlu1 %v2182_v27, %s5198_s22  ;;  %v2181_v37 = vmul.f32 %v6142_v34, %v6142_v34 }
0x1ace   :  { %2185 = vrot.lane.b32.xlu0 %v2181_v37, %s5198_s22  ;;  %v6160_v38 = vadd.f32 %v2181_v37, %v6062_v50 }
0x1ad0   :  { %2301 = vrot.lane.b32.xlu1 %v4446_v21, %s5198_s22 }
0x1ad2   :  { %2299 = vrot.lane.b32.xlu0 %v4445_v44, %s5198_s22 }
0x1b3e   :  { %v2188_v35 = vpop.permute.xlu1 %2187 }
0x1b3f   :  { %v2192_v54 = vsel %vm69_vm0, %v6138_v2, %v2188_v35 }
0x1b40   :  { %v2186_v26 = vpop.permute.xlu0 %2185 }
0x1b41   :  { %v2191_v14 = vsel %vm69_vm0, %v6142_v34, %v2186_v26 }
0x1b42   :  { %4872 = vmatprep.mubr.msk.f32.mxu1 %vm72_vm1, %v2191_v14  ;;  %v2302_v37 = vpop.permute.xlu1 %2301 }
0x1b43   :  { %4873 = vmatmul.mubr.msk.f32.vlgmr.msra.gmra.mxu1 %vm72_vm1, %v2192_v54 }
0x1b44   :  { %4887 = vmatpush3.msra.mxu1 %v5950_v10  ;;  %v2300_v44 = vpop.permute.xlu0 %2299 }
0x1b45   :  { %4888 = vmatprep.subr.mxu1 %v5956_v58 }
0x1b46   :  { %4889 = vmatpush3.msra.mxu1 %v5956_v58 }
0x1b47   :  { %4890 = vmatprep.subr.mxu1 %v5963_v9 }
0x1b48   :  { %4891 = vmatpush3.msra.mxu1 %v5963_v9 }
0x1b49   :  { %4892 = vmatprep.subr.mxu1 %v5970_v28 }
0x1b4a   :  { %4893 = vmatpush3.msra.mxu1 %v5970_v28 }
0x1b4b   :  { %4908 = vmatprep.subr.mxu1 %v5950_v10 }
0x1c03   :  { %v4874_v50 = vpop.f32.mrf.mxu1 }
0x1c04   :  { %v2275_v52 = vadd.f32 %v5978_v24, %v4874_v50 }
0x1c05   :  { %v2265_v46 = vpop.f32.mrf.mxu1 }
0x1c06   :  { %v2277_v53 = vmin.f32 %v2275_v52, -1e-06  ;;  %v2274_v6 = vadd.f32 %v5984_v39, %v2265_v46 }
0x1c08   :  { %v2279_v56 = vmul.f32 -2.0, %v2277_v53  ;;  %v2276_v15 = vmin.f32 %v2274_v6, -1e-06 }
0x1c0a   :  { %5092 = vrsqrt.f32 %v2279_v56  ;;  %v2278_v33 = vmul.f32 -2.0, %v2276_v15 }
0x1c0c   :  { %5094 = vrsqrt.f32 %v2278_v33 }
0x1c17   :  { %v5093_v20 = vpop.eup %5092 }
0x1c18   :  { %v2283_v49 = vmul.f32 %v5093_v20, %v5093_v20  ;;  %v2306_v35 = vmul.f32 %v5093_v20, %v2302_v37 }
0x1c19   :  { %v5095_v27 = vpop.eup %5094 }
0x1c1a   :  { %2288 = vrot.lane.b32.xlu1 %v2283_v49, %s5199_s19  ;;  %v2282_v21 = vmul.f32 %v5095_v27, %v5095_v27  ;;  %v2305_v26 = vmul.f32 %v5095_v27, %v2300_v44  ;;  %v4451_v27 = vld [vmem:[%s7009_s6 + $0x80] sm:$0xff] }
0x1c1c   :  { %2286 = vrot.lane.b32.xlu0 %v2282_v21, %s5199_s19 }
0x1c1e   :  { %2311 = vrot.lane.b32.xlu1 %v2306_v35, %s5199_s19 }
0x1c20   :  { %2309 = vrot.lane.b32.xlu0 %v2305_v26, %s5199_s19 }
0x1c8c   :  { %v2289_v14 = vpop.permute.xlu1 %2288 }
0x1c8d   :  { %v2293_v50 = vmul.f32 %v2289_v14, %v2275_v52 }
0x1c8e   :  { %v2287_v54 = vpop.permute.xlu0 %2286 }
0x1c8f   :  { %v2292_v53 = vmul.f32 %v2287_v54, %v2274_v6  ;;  %v4452_v6 = vld [vmem:[%s7009_s6 + $0x88] sm:$0xff] }
0x1c90   :  { %v2312_v46 = vpop.permute.xlu1 %2311 }
0x1c91   :  { %v6187_v56 = vadd.f32 %v2312_v46, %v2293_v50 }
0x1c92   :  { %v2310_v15 = vpop.permute.xlu0 %2309 }
0x1c93   :  { %7048 = vst [vmem:[#allocation15_spill] sm:$0xff] %v6187_v56  ;;  %v2328_v33 = vmul.f32 %v6187_v56, %v6187_v56  ;;  %v6191_v49 = vadd.f32 %v2310_v15, %v2292_v53 }
0x1c95   :  { %7049 = vst [vmem:[#allocation16_spill] sm:$0xff] %v6191_v49  ;;  %v6194_v20 = vadd.f32 %v2328_v33, %v6096_v8  ;;  %4448 = vst.msk [vmem:[%s7016_s13 + $0x38] sm:$0xff] %vm69_vm0, %v6191_v49  ;;  %2335 = vrot.lane.b32.xlu1 %v2328_v33, %s5198_s22  ;;  %v2327_v52 = vmul.f32 %v6191_v49, %v6191_v49 }
0x1c97   :  { %2333 = vrot.lane.b32.xlu0 %v2327_v52, %s5198_s22  ;;  %v6209_v8 = vadd.f32 %v2327_v52, %v6111_v57 }
0x1c99   :  { %2449 = vrot.lane.b32.xlu1 %v4452_v6, %s5198_s22 }
0x1c9b   :  { %2447 = vrot.lane.b32.xlu0 %v4451_v27, %s5198_s22 }
0x1d07   :  { %v2336_v37 = vpop.permute.xlu1 %2335 }
0x1d08   :  { %v2340_v35 = vsel %vm69_vm0, %v6187_v56, %v2336_v37 }
0x1d09   :  { %v2334_v21 = vpop.permute.xlu0 %2333 }
0x1d0a   :  { %v2339_v44 = vsel %vm69_vm0, %v6191_v49, %v2334_v21 }
0x1d0b   :  { %4883 = vmatprep.mubr.msk.f32.mxu0 %vm72_vm1, %v2339_v44  ;;  %v2450_v27 = vpop.permute.xlu1 %2449 }
0x1d0c   :  { %4884 = vmatmul.mubr.msk.f32.vlgmr.msra.gmra.mxu0 %vm72_vm1, %v2340_v35 }
0x1d0d   :  { %4898 = vmatpush3.msra.mxu0 %v5871_v32  ;;  %v2448_v21 = vpop.permute.xlu0 %2447 }
0x1d0e   :  { %4899 = vmatprep.subr.mxu0 %v5877_v0 }
0x1d0f   :  { %4900 = vmatpush3.msra.mxu0 %v5877_v0 }
0x1d10   :  { %4901 = vmatprep.subr.mxu0 %v5884_v3 }
0x1d11   :  { %4902 = vmatpush3.msra.mxu0 %v5884_v3 }
0x1d12   :  { %4903 = vmatprep.subr.mxu0 %v5891_v7 }
0x1d13   :  { %4904 = vmatpush3.msra.mxu0 %v5891_v7 }
0x1d14   :  { %4919 = vmatprep.subr.mxu0 %v5871_v32 }
0x1dcc   :  { %v4885_v57 = vpop.f32.mrf.mxu0 }
0x1dcd   :  { %v2423_v26 = vadd.f32 %v5899_v12, %v4885_v57 }
0x1dce   :  { %v2413_v14 = vpop.f32.mrf.mxu0 }
0x1dcf   :  { %v2425_v54 = vmin.f32 %v2423_v26, -1e-06  ;;  %v2422_v50 = vadd.f32 %v5905_v29, %v2413_v14 }
0x1dd1   :  { %v2427_v46 = vmul.f32 -2.0, %v2425_v54  ;;  %v2424_v53 = vmin.f32 %v2422_v50, -1e-06 }
0x1dd3   :  { %5096 = vrsqrt.f32 %v2427_v46  ;;  %v2426_v15 = vmul.f32 -2.0, %v2424_v53 }
0x1dd5   :  { %5098 = vrsqrt.f32 %v2426_v15 }
0x1de0   :  { %v5097_v33 = vpop.eup %5096 }
0x1de1   :  { %v2431_v52 = vmul.f32 %v5097_v33, %v5097_v33  ;;  %v2454_v44 = vmul.f32 %v5097_v33, %v2450_v27 }
0x1de2   :  { %v5099_v6 = vpop.eup %5098 }
0x1de3   :  { %2436 = vrot.lane.b32.xlu1 %v2431_v52, %s5199_s19  ;;  %v2430_v37 = vmul.f32 %v5099_v6, %v5099_v6  ;;  %v2453_v35 = vmul.f32 %v5099_v6, %v2448_v21 }
0x1de5   :  { %2434 = vrot.lane.b32.xlu0 %v2430_v37, %s5199_s19 }
0x1de7   :  { %2459 = vrot.lane.b32.xlu1 %v2454_v44, %s5199_s19 }
0x1de9   :  { %2457 = vrot.lane.b32.xlu0 %v2453_v35, %s5199_s19 }
0x1e55   :  { %v2437_v57 = vpop.permute.xlu1 %2436 }
0x1e56   :  { %v2441_v54 = vmul.f32 %v2437_v57, %v2423_v26 }
0x1e57   :  { %v2435_v14 = vpop.permute.xlu0 %2434 }
0x1e58   :  { %v2440_v53 = vmul.f32 %v2435_v14, %v2422_v50  ;;  %v4456_v50 = vld [vmem:[%s7010_s7 + $0x88] sm:$0xff] }
0x1e59   :  { %v2460_v46 = vpop.permute.xlu1 %2459 }
0x1e5a   :  { %v6236_v15 = vadd.f32 %v2460_v46, %v2441_v54 }
0x1e5b   :  { %v2458_v49 = vpop.permute.xlu0 %2457 }
0x1e5c   :  { %v2466_v52 = vmul.f32 %v6236_v15, %v6236_v15  ;;  %v6240_v56 = vadd.f32 %v2458_v49, %v2440_v53  ;;  %v4455_v49 = vld [vmem:[%s7010_s7 + $0x80] sm:$0xff] }
0x1e5e   :  { %v6243_v33 = vadd.f32 %v2466_v52, %v6145_v45  ;;  %4457 = vst.msk [vmem:[%s7015_s12 + $0x40] sm:$0xff] %vm69_vm0, %v6240_v56  ;;  %2471 = vrot.lane.b32.xlu1 %v2466_v52, %s5198_s22  ;;  %v2465_v26 = vmul.f32 %v6240_v56, %v6240_v56 }
0x1e60   :  { %2469 = vrot.lane.b32.xlu0 %v2465_v26, %s5198_s22  ;;  %v6258_v45 = vadd.f32 %v2465_v26, %v6160_v38 }
0x1e62   :  { %2585 = vrot.lane.b32.xlu1 %v4456_v50, %s5198_s22 }
0x1e64   :  { %2583 = vrot.lane.b32.xlu0 %v4455_v49, %s5198_s22 }
0x1ed0   :  { %v2472_v6 = vpop.permute.xlu1 %2471 }
0x1ed1   :  { %v2476_v21 = vsel %vm69_vm0, %v6236_v15, %v2472_v6 }
0x1ed2   :  { %v2470_v27 = vpop.permute.xlu0 %2469 }
0x1ed3   :  { %v2475_v37 = vsel %vm69_vm0, %v6240_v56, %v2470_v27 }
0x1ed4   :  { %4894 = vmatprep.mubr.msk.f32.mxu1 %vm72_vm1, %v2475_v37  ;;  %v2586_v49 = vpop.permute.xlu1 %2585 }
0x1ed5   :  { %4895 = vmatmul.mubr.msk.f32.vlgmr.msra.gmra.mxu1 %vm72_vm1, %v2476_v21 }
0x1ed6   :  { %4909 = vmatpush3.msra.mxu1 %v5950_v10  ;;  %v2584_v27 = vpop.permute.xlu0 %2583 }
0x1ed7   :  { %4910 = vmatprep.subr.mxu1 %v5956_v58 }
0x1ed8   :  { %4911 = vmatpush3.msra.mxu1 %v5956_v58 }
0x1ed9   :  { %4912 = vmatprep.subr.mxu1 %v5963_v9 }
0x1eda   :  { %4913 = vmatpush3.msra.mxu1 %v5963_v9 }
0x1edb   :  { %4914 = vmatprep.subr.mxu1 %v5970_v28 }
0x1edc   :  { %4915 = vmatpush3.msra.mxu1 %v5970_v28 }
0x1edd   :  { %4930 = vmatprep.subr.mxu1 %v5950_v10 }
0x1f95   :  { %v4896_v38 = vpop.f32.mrf.mxu1 }
0x1f96   :  { %v2559_v44 = vadd.f32 %v5978_v24, %v4896_v38 }
0x1f97   :  { %v2549_v35 = vpop.f32.mrf.mxu1 }
0x1f98   :  { %v2561_v57 = vmin.f32 %v2559_v44, -1e-06  ;;  %v2558_v14 = vadd.f32 %v5984_v39, %v2549_v35 }
0x1f9a   :  { %v2563_v54 = vmul.f32 -2.0, %v2561_v57  ;;  %v2560_v46 = vmin.f32 %v2558_v14, -1e-06 }
0x1f9c   :  { %5100 = vrsqrt.f32 %v2563_v54  ;;  %v2562_v53 = vmul.f32 -2.0, %v2560_v46 }
0x1f9e   :  { %5102 = vrsqrt.f32 %v2562_v53 }
0x1fa9   :  { %v5101_v52 = vpop.eup %5100 }
0x1faa   :  { %v2567_v26 = vmul.f32 %v5101_v52, %v5101_v52  ;;  %v2590_v37 = vmul.f32 %v5101_v52, %v2586_v49 }
0x1fab   :  { %v5103_v50 = vpop.eup %5102 }
0x1fac   :  { %2572 = vrot.lane.b32.xlu1 %v2567_v26, %s5199_s19  ;;  %v2566_v6 = vmul.f32 %v5103_v50, %v5103_v50  ;;  %v2589_v21 = vmul.f32 %v5103_v50, %v2584_v27 }
0x1fae   :  { %2570 = vrot.lane.b32.xlu0 %v2566_v6, %s5199_s19 }
0x1fb0   :  { %2595 = vrot.lane.b32.xlu1 %v2590_v37, %s5199_s19 }
0x1fb2   :  { %2593 = vrot.lane.b32.xlu0 %v2589_v21, %s5199_s19 }
0x201e   :  { %v2573_v38 = vpop.permute.xlu1 %2572 }
0x201f   :  { %v2577_v57 = vmul.f32 %v2573_v38, %v2559_v44 }
0x2020   :  { %v2571_v35 = vpop.permute.xlu0 %2570 }
0x2021   :  { %v2576_v46 = vmul.f32 %v2571_v35, %v2558_v14  ;;  %v4462_v14 = vld [vmem:[%s7009_s6 + $0x98] sm:$0xff] }
0x2022   :  { %v2596_v54 = vpop.permute.xlu1 %2595 }
0x2023   :  { %v6285_v53 = vadd.f32 %v2596_v54, %v2577_v57 }
0x2024   :  { %v2594_v40 = vpop.permute.xlu0 %2593 }
0x2025   :  { %7050 = vst [vmem:[#allocation17_spill] sm:$0xff] %v6285_v53  ;;  %v2612_v26 = vmul.f32 %v6285_v53, %v6285_v53  ;;  %v6289_v62 = vadd.f32 %v2594_v40, %v2576_v46 }
0x2027   :  { %7051 = vst [vmem:[#allocation18_spill] sm:$0xff] %v6289_v62  ;;  %v6292_v52 = vadd.f32 %v2612_v26, %v6194_v20  ;;  %4458 = vst.msk [vmem:[%s7016_s13 + $0x40] sm:$0xff] %vm69_vm0, %v6289_v62  ;;  %2619 = vrot.lane.b32.xlu1 %v2612_v26, %s5198_s22  ;;  %v2611_v44 = vmul.f32 %v6289_v62, %v6289_v62  ;;  %v4461_v20 = vld [vmem:[%s7009_s6 + $0x90] sm:$0xff] }
0x2029   :  { %2617 = vrot.lane.b32.xlu0 %v2611_v44, %s5198_s22  ;;  %v6307_v40 = vadd.f32 %v2611_v44, %v6209_v8 }
0x202b   :  { %2733 = vrot.lane.b32.xlu1 %v4462_v14, %s5198_s22 }
0x202d   :  { %2731 = vrot.lane.b32.xlu0 %v4461_v20, %s5198_s22 }
0x2099   :  { %v2620_v50 = vpop.permute.xlu1 %2619 }
0x209a   :  { %v2624_v27 = vsel %vm69_vm0, %v6285_v53, %v2620_v50 }
0x209b   :  { %v2618_v49 = vpop.permute.xlu0 %2617 }
0x209c   :  { %v2623_v6 = vsel %vm69_vm0, %v6289_v62, %v2618_v49 }
0x209d   :  { %4905 = vmatprep.mubr.msk.f32.mxu0 %vm72_vm1, %v2623_v6  ;;  %v2734_v44 = vpop.permute.xlu1 %2733 }
0x209e   :  { %4906 = vmatmul.mubr.msk.f32.vlgmr.msra.gmra.mxu0 %vm72_vm1, %v2624_v27 }
0x209f   :  { %4920 = vmatpush3.msra.mxu0 %v5871_v32 }
0x20a0   :  { %4921 = vmatprep.subr.mxu0 %v5877_v0 }
0x20a1   :  { %4922 = vmatpush3.msra.mxu0 %v5877_v0 }
0x20a2   :  { %4923 = vmatprep.subr.mxu0 %v5884_v3 }
0x20a3   :  { %4924 = vmatpush3.msra.mxu0 %v5884_v3 }
0x20a4   :  { %4925 = vmatprep.subr.mxu0 %v5891_v7 }
0x20a5   :  { %4926 = vmatpush3.msra.mxu0 %v5891_v7 }
0x20a6   :  { %4941 = vmatprep.subr.mxu0 %v5871_v32  ;;  %v2732_v32 = vpop.permute.xlu0 %2731 }
0x215e   :  { %v4907_v8 = vpop.f32.mrf.mxu0 }
0x215f   :  { %v2707_v37 = vadd.f32 %v5899_v12, %v4907_v8 }
0x2160   :  { %v2697_v21 = vpop.f32.mrf.mxu0 }
0x2161   :  { %v2709_v38 = vmin.f32 %v2707_v37, -1e-06  ;;  %v2706_v35 = vadd.f32 %v5905_v29, %v2697_v21 }
0x2163   :  { %v2711_v57 = vmul.f32 -2.0, %v2709_v38  ;;  %v2708_v54 = vmin.f32 %v2706_v35, -1e-06 }
0x2165   :  { %5104 = vrsqrt.f32 %v2711_v57  ;;  %v2710_v0 = vmul.f32 -2.0, %v2708_v54  ;;  %v4465_v54 = vld [vmem:[%s7010_s7 + $0x90] sm:$0xff] }
0x2167   :  { %5106 = vrsqrt.f32 %v2710_v0 }
0x2172   :  { %v5105_v46 = vpop.eup %5104 }
0x2173   :  { %v2715_v3 = vmul.f32 %v5105_v46, %v5105_v46  ;;  %v2738_v14 = vmul.f32 %v5105_v46, %v2734_v44 }
0x2174   :  { %v5107_v26 = vpop.eup %5106 }
0x2175   :  { %2720 = vrot.lane.b32.xlu1 %v2715_v3, %s5199_s19  ;;  %v2714_v7 = vmul.f32 %v5107_v26, %v5107_v26  ;;  %v2737_v12 = vmul.f32 %v5107_v26, %v2732_v32 }
0x2177   :  { %2718 = vrot.lane.b32.xlu0 %v2714_v7, %s5199_s19 }
0x2179   :  { %2743 = vrot.lane.b32.xlu1 %v2738_v14, %s5199_s19 }
0x217b   :  { %2741 = vrot.lane.b32.xlu0 %v2737_v12, %s5199_s19 }
0x21e7   :  { %v2721_v29 = vpop.permute.xlu1 %2720 }
0x21e8   :  { %v2725_v50 = vmul.f32 %v2721_v29, %v2707_v37 }
0x21e9   :  { %v2719_v20 = vpop.permute.xlu0 %2718 }
0x21ea   :  { %v2724_v6 = vmul.f32 %v2719_v20, %v2706_v35  ;;  %v4466_v35 = vld [vmem:[%s7010_s7 + $0x98] sm:$0xff] }
0x21eb   :  { %v2744_v49 = vpop.permute.xlu1 %2743 }
0x21ec   :  { %v6334_v27 = vadd.f32 %v2744_v49, %v2725_v50 }
0x21ed   :  { %v2742_v8 = vpop.permute.xlu0 %2741 }
0x21ee   :  { %v2750_v21 = vmul.f32 %v6334_v27, %v6334_v27  ;;  %v6338_v38 = vadd.f32 %v2742_v8, %v2724_v6 }
0x21f0   :  { %v6341_v57 = vadd.f32 %v2750_v21, %v6243_v33  ;;  %4467 = vst.msk [vmem:[%s7015_s12 + $0x48] sm:$0xff] %vm69_vm0, %v6338_v38  ;;  %2755 = vrot.lane.b32.xlu1 %v2750_v21, %s5198_s22  ;;  %v2749_v37 = vmul.f32 %v6338_v38, %v6338_v38 }
0x21f2   :  { %2753 = vrot.lane.b32.xlu0 %v2749_v37, %s5198_s22  ;;  %v6356_v33 = vadd.f32 %v2749_v37, %v6258_v45 }
0x21f4   :  { %2869 = vrot.lane.b32.xlu1 %v4466_v35, %s5198_s22 }
0x21f6   :  { %2867 = vrot.lane.b32.xlu0 %v4465_v54, %s5198_s22 }
0x2262   :  { %v2756_v0 = vpop.permute.xlu1 %2755 }
0x2263   :  { %v2760_v26 = vsel %vm69_vm0, %v6334_v27, %v2756_v0 }
0x2264   :  { %v2754_v46 = vpop.permute.xlu0 %2753 }
0x2265   :  { %v2759_v3 = vsel %vm69_vm0, %v6338_v38, %v2754_v46 }
0x2266   :  { %4916 = vmatprep.mubr.msk.f32.mxu1 %vm72_vm1, %v2759_v3  ;;  %v2870_v49 = vpop.permute.xlu1 %2869 }
0x2267   :  { %4917 = vmatmul.mubr.msk.f32.vlgmr.msra.gmra.mxu1 %vm72_vm1, %v2760_v26 }
0x2268   :  { %4931 = vmatpush3.msra.mxu1 %v5950_v10 }
0x2269   :  { %4932 = vmatprep.subr.mxu1 %v5956_v58 }
0x226a   :  { %4933 = vmatpush3.msra.mxu1 %v5956_v58 }
0x226b   :  { %4934 = vmatprep.subr.mxu1 %v5963_v9 }
0x226c   :  { %4935 = vmatpush3.msra.mxu1 %v5963_v9 }
0x226d   :  { %4936 = vmatprep.subr.mxu1 %v5970_v28 }
0x226e   :  { %4937 = vmatpush3.msra.mxu1 %v5970_v28 }
0x226f   :  { %4952 = vmatprep.subr.mxu1 %v5950_v10  ;;  %v2868_v10 = vpop.permute.xlu0 %2867 }
0x2327   :  { %v4918_v45 = vpop.f32.mrf.mxu1 }
0x2328   :  { %v2843_v44 = vadd.f32 %v5978_v24, %v4918_v45 }
0x2329   :  { %v2833_v7 = vpop.f32.mrf.mxu1 }
0x232a   :  { %v2845_v32 = vmin.f32 %v2843_v44, -1e-06  ;;  %v2842_v14 = vadd.f32 %v5984_v39, %v2833_v7  ;;  %v4471_v7 = vld [vmem:[%s7009_s6 + $0xa0] sm:$0xff] }
0x232c   :  { %v2847_v12 = vmul.f32 -2.0, %v2845_v32  ;;  %v2844_v29 = vmin.f32 %v2842_v14, -1e-06 }
0x232e   :  { %5108 = vrsqrt.f32 %v2847_v12  ;;  %v2846_v58 = vmul.f32 -2.0, %v2844_v29 }
0x2330   :  { %5110 = vrsqrt.f32 %v2846_v58  ;;  %v6427_v58 = vld [vmem:[%s7003_s0 + $0x10] sm:$0xff] }
0x233b   :  { %v5109_v20 = vpop.eup %5108 }
0x233c   :  { %v2851_v9 = vmul.f32 %v5109_v20, %v5109_v20  ;;  %v2874_v6 = vmul.f32 %v5109_v20, %v2870_v49  ;;  %v6434_v20 = vld [vmem:[%s7003_s0 + $0x8] sm:$0xff] }
0x233d   :  { %v5111_v50 = vpop.eup %5110  ;;  %v6449_v49 = vld [vmem:[%s7005_s2 + $0x8] sm:$0xff] }
0x233e   :  { %2856 = vrot.lane.b32.xlu1 %v2851_v9, %s5199_s19  ;;  %v2850_v28 = vmul.f32 %v5111_v50, %v5111_v50  ;;  %v2873_v24 = vmul.f32 %v5111_v50, %v2868_v10  ;;  %v6441_v9 = vld [vmem:[%s7003_s0] sm:$0xff] }
0x2340   :  { %2854 = vrot.lane.b32.xlu0 %v2850_v28, %s5199_s19 }
0x2342   :  { %2879 = vrot.lane.b32.xlu1 %v2874_v6, %s5199_s19 }
0x2344   :  { %2877 = vrot.lane.b32.xlu0 %v2873_v24, %s5199_s19  ;;  %v6455_v24 = vld [vmem:[%s7005_s2] sm:$0xff] }
0x23b0   :  { %v2857_v39 = vpop.permute.xlu1 %2856 }
0x23b1   :  { %v2861_v21 = vmul.f32 %v2857_v39, %v2843_v44  ;;  %v4472_v44 = vld [vmem:[%s7009_s6 + $0xa8] sm:$0xff] }
0x23b2   :  { %v2855_v8 = vpop.permute.xlu0 %2854 }
0x23b3   :  { %v2860_v35 = vmul.f32 %v2855_v8, %v2842_v14 }
0x23b4   :  { %v2880_v37 = vpop.permute.xlu1 %2879 }
0x23b5   :  { %v6383_v54 = vadd.f32 %v2880_v37, %v2861_v21 }
0x23b6   :  { %v2878_v0 = vpop.permute.xlu0 %2877 }
0x23b7   :  { %7052 = vst [vmem:[#allocation19_spill] sm:$0xff] %v6383_v54  ;;  %v2896_v46 = vmul.f32 %v6383_v54, %v6383_v54  ;;  %v6387_v3 = vadd.f32 %v2878_v0, %v2860_v35 }
0x23b9   :  { %7053 = vst [vmem:[#allocation20_spill] sm:$0xff] %v6387_v3  ;;  %v6390_v26 = vadd.f32 %v2896_v46, %v6292_v52  ;;  %4468 = vst.msk [vmem:[%s7016_s13 + $0x48] sm:$0xff] %vm69_vm0, %v6387_v3  ;;  %2903 = vrot.lane.b32.xlu1 %v2896_v46, %s5198_s22  ;;  %v2895_v45 = vmul.f32 %v6387_v3, %v6387_v3 }
0x23bb   :  { %2901 = vrot.lane.b32.xlu0 %v2895_v45, %s5198_s22  ;;  %v6405_v52 = vadd.f32 %v2895_v45, %v6307_v40  ;;  %v6421_v40 = vld [vmem:[%s7003_s0 + $0x18] sm:$0xff] }
0x23bd   :  { %3017 = vrot.lane.b32.xlu1 %v4472_v44, %s5198_s22 }
0x23bf   :  { %3015 = vrot.lane.b32.xlu0 %v4471_v7, %s5198_s22 }
0x242b   :  { %v2904_v32 = vpop.permute.xlu1 %2903 }
0x242c   :  { %v2908_v29 = vsel %vm69_vm0, %v6383_v54, %v2904_v32 }
0x242d   :  { %v2902_v14 = vpop.permute.xlu0 %2901 }
0x242e   :  { %v2907_v12 = vsel %vm69_vm0, %v6387_v3, %v2902_v14 }
0x242f   :  { %4927 = vmatprep.mubr.msk.f32.mxu0 %vm72_vm1, %v2907_v12  ;;  %v3018_v45 = vpop.permute.xlu1 %3017 }
0x2430   :  { %4928 = vmatmul.mubr.msk.f32.vlgmr.msra.gmra.mxu0 %vm72_vm1, %v2908_v29 }
0x2431   :  { %4942 = vmatpush3.msra.mxu0 %v6421_v40  ;;  %v3016_v7 = vpop.permute.xlu0 %3015 }
0x2432   :  { %4943 = vmatprep.subr.mxu0 %v6427_v58 }
0x2433   :  { %4944 = vmatpush3.msra.mxu0 %v6427_v58 }
0x2434   :  { %4945 = vmatprep.subr.mxu0 %v6434_v20 }
0x2435   :  { %4946 = vmatpush3.msra.mxu0 %v6434_v20 }
0x2436   :  { %4947 = vmatprep.subr.mxu0 %v6441_v9 }
0x2437   :  { %4948 = vmatpush3.msra.mxu0 %v6441_v9 }
0x2438   :  { %4963 = vmatprep.subr.mxu0 %v6421_v40 }
0x24f0   :  { %v4929_v50 = vpop.f32.mrf.mxu0 }
0x24f1   :  { %v2991_v28 = vadd.f32 %v6449_v49, %v4929_v50 }
0x24f2   :  { %v2981_v10 = vpop.f32.mrf.mxu0 }
0x24f3   :  { %v2993_v6 = vmin.f32 %v2991_v28, -1e-06  ;;  %v2990_v39 = vadd.f32 %v6455_v24, %v2981_v10 }
0x24f5   :  { %v2995_v8 = vmul.f32 -2.0, %v2993_v6  ;;  %v2992_v21 = vmin.f32 %v2990_v39, -1e-06 }
0x24f7   :  { %5112 = vrsqrt.f32 %v2995_v8  ;;  %v2994_v37 = vmul.f32 -2.0, %v2992_v21 }
0x24f9   :  { %5114 = vrsqrt.f32 %v2994_v37 }
0x2504   :  { %v5113_v35 = vpop.eup %5112 }
0x2505   :  { %v2999_v0 = vmul.f32 %v5113_v35, %v5113_v35  ;;  %v3022_v32 = vmul.f32 %v5113_v35, %v3018_v45 }
0x2506   :  { %v5115_v46 = vpop.eup %5114 }
0x2507   :  { %3004 = vrot.lane.b32.xlu1 %v2999_v0, %s5199_s19  ;;  %v2998_v44 = vmul.f32 %v5115_v46, %v5115_v46  ;;  %v3021_v14 = vmul.f32 %v5115_v46, %v3016_v7  ;;  %v4475_v46 = vld [vmem:[%s7010_s7 + $0xa0] sm:$0xff] }
0x2509   :  { %3002 = vrot.lane.b32.xlu0 %v2998_v44, %s5199_s19 }
0x250b   :  { %3027 = vrot.lane.b32.xlu1 %v3022_v32, %s5199_s19 }
0x250d   :  { %3025 = vrot.lane.b32.xlu0 %v3021_v14, %s5199_s19  ;;  %v6506_v14 = vld [vmem:[%s7004_s1 + $0x10] sm:$0xff] }
0x2579   :  { %v3005_v12 = vpop.permute.xlu1 %3004 }
0x257a   :  { %v3009_v50 = vmul.f32 %v3005_v12, %v2991_v28  ;;  %v6513_v12 = vld [vmem:[%s7004_s1 + $0x8] sm:$0xff] }
0x257b   :  { %v3003_v29 = vpop.permute.xlu0 %3002 }
0x257c   :  { %v3008_v6 = vmul.f32 %v3003_v29, %v2990_v39  ;;  %v4476_v39 = vld [vmem:[%s7010_s7 + $0xa8] sm:$0xff]  ;;  %v6520_v29 = vld [vmem:[%s7004_s1] sm:$0xff] }
0x257d   :  { %v3028_v10 = vpop.permute.xlu1 %3027 }
0x257e   :  { %v6462_v8 = vadd.f32 %v3028_v10, %v3009_v50  ;;  %v6528_v10 = vld [vmem:[%s7006_s3 + $0x8] sm:$0xff] }
0x257f   :  { %v3026_v21 = vpop.permute.xlu0 %3025 }
0x2580   :  { %v3034_v37 = vmul.f32 %v6462_v8, %v6462_v8  ;;  %v6466_v0 = vadd.f32 %v3026_v21, %v3008_v6 }
0x2582   :  { %v6469_v35 = vadd.f32 %v3034_v37, %v6341_v57  ;;  %4477 = vst.msk [vmem:[%s7015_s12 + $0x50] sm:$0xff] %vm69_vm0, %v6466_v0  ;;  %3039 = vrot.lane.b32.xlu1 %v3034_v37, %s5198_s22  ;;  %v3033_v28 = vmul.f32 %v6466_v0, %v6466_v0 }
0x2584   :  { %3037 = vrot.lane.b32.xlu0 %v3033_v28, %s5198_s22  ;;  %v6484_v57 = vadd.f32 %v3033_v28, %v6356_v33  ;;  %v6500_v33 = vld [vmem:[%s7004_s1 + $0x18] sm:$0xff]  ;;  %v6534_v28 = vld [vmem:[%s7006_s3] sm:$0xff] }
0x2586   :  { %3153 = vrot.lane.b32.xlu1 %v4476_v39, %s5198_s22 }
0x2588   :  { %3151 = vrot.lane.b32.xlu0 %v4475_v46, %s5198_s22 }
0x25f4   :  { %v3040_v45 = vpop.permute.xlu1 %3039 }
0x25f5   :  { %v3044_v32 = vsel %vm69_vm0, %v6462_v8, %v3040_v45 }
0x25f6   :  { %v3038_v44 = vpop.permute.xlu0 %3037 }
0x25f7   :  { %v3043_v7 = vsel %vm69_vm0, %v6466_v0, %v3038_v44 }
0x25f8   :  { %4938 = vmatprep.mubr.msk.f32.mxu1 %vm72_vm1, %v3043_v7  ;;  %v3154_v54 = vpop.permute.xlu1 %3153 }
0x25f9   :  { %4939 = vmatmul.mubr.msk.f32.vlgmr.msra.gmra.mxu1 %vm72_vm1, %v3044_v32 }
0x25fa   :  { %4953 = vmatpush3.msra.mxu1 %v6500_v33  ;;  %v3152_v62 = vpop.permute.xlu0 %3151 }
0x25fb   :  { %4954 = vmatprep.subr.mxu1 %v6506_v14 }
0x25fc   :  { %4955 = vmatpush3.msra.mxu1 %v6506_v14 }
0x25fd   :  { %4956 = vmatprep.subr.mxu1 %v6513_v12 }
0x25fe   :  { %4957 = vmatpush3.msra.mxu1 %v6513_v12 }
0x25ff   :  { %4958 = vmatprep.subr.mxu1 %v6520_v29 }
0x2600   :  { %4959 = vmatpush3.msra.mxu1 %v6520_v29 }
0x2601   :  { %4974 = vmatprep.subr.mxu1 %v6500_v33 }
0x26b9   :  { %v4940_v50 = vpop.f32.mrf.mxu1 }
0x26ba   :  { %v3127_v6 = vadd.f32 %v6528_v10, %v4940_v50 }
0x26bb   :  { %v3117_v21 = vpop.f32.mrf.mxu1 }
0x26bc   :  { %v3129_v37 = vmin.f32 %v3127_v6, -1e-06  ;;  %v3126_v39 = vadd.f32 %v6534_v28, %v3117_v21 }
0x26be   :  { %v3131_v46 = vmul.f32 -2.0, %v3129_v37  ;;  %v3128_v45 = vmin.f32 %v3126_v39, -1e-06 }
0x26c0   :  { %5116 = vrsqrt.f32 %v3131_v46  ;;  %v3130_v44 = vmul.f32 -2.0, %v3128_v45 }
0x26c2   :  { %5118 = vrsqrt.f32 %v3130_v44 }
0x26cd   :  { %v5117_v7 = vpop.eup %5116 }
0x26ce   :  { %v3135_v32 = vmul.f32 %v5117_v7, %v5117_v7  ;;  %v3158_v53 = vmul.f32 %v5117_v7, %v3154_v54 }
0x26cf   :  { %v5119_v3 = vpop.eup %5118 }
0x26d0   :  { %3140 = vrot.lane.b32.xlu1 %v3135_v32, %s5199_s19  ;;  %v3134_v50 = vmul.f32 %v5119_v3, %v5119_v3  ;;  %v3157_v22 = vmul.f32 %v5119_v3, %v3152_v62  ;;  %v4482_v62 = vld [vmem:[%s7009_s6 + $0xb8] sm:$0xff] }
0x26d2   :  { %3138 = vrot.lane.b32.xlu0 %v3134_v50, %s5199_s19 }
0x26d4   :  { %3163 = vrot.lane.b32.xlu1 %v3158_v53, %s5199_s19  ;;  %v4481_v53 = vld [vmem:[%s7009_s6 + $0xb0] sm:$0xff] }
0x26d6   :  { %3161 = vrot.lane.b32.xlu0 %v3157_v22, %s5199_s19 }
0x2742   :  { %v3141_v21 = vpop.permute.xlu1 %3140 }
0x2743   :  { %v3145_v46 = vmul.f32 %v3141_v21, %v3127_v6 }
0x2744   :  { %v3139_v37 = vpop.permute.xlu0 %3138 }
0x2745   :  { %v3144_v44 = vmul.f32 %v3139_v37, %v3126_v39 }
0x2746   :  { %v3164_v45 = vpop.permute.xlu1 %3163 }
0x2747   :  { %v6541_v55 = vadd.f32 %v3164_v45, %v3145_v46 }
0x2748   :  { %v3162_v51 = vpop.permute.xlu0 %3161 }
0x2749   :  { %7054 = vst [vmem:[#allocation21_spill] sm:$0xff] %v6541_v55  ;;  %v3180_v32 = vmul.f32 %v6541_v55, %v6541_v55  ;;  %v6545_v5 = vadd.f32 %v3162_v51, %v3144_v44 }
0x274b   :  { %7055 = vst [vmem:[#allocation22_spill] sm:$0xff] %v6545_v5  ;;  %v6548_v54 = vadd.f32 %v3180_v32, %v6390_v26  ;;  %4478 = vst.msk [vmem:[%s7016_s13 + $0x50] sm:$0xff] %vm69_vm0, %v6545_v5  ;;  %3187 = vrot.lane.b32.xlu1 %v3180_v32, %s5198_s22  ;;  %v3179_v22 = vmul.f32 %v6545_v5, %v6545_v5 }
0x274d   :  { %3185 = vrot.lane.b32.xlu0 %v3179_v22, %s5198_s22  ;;  %v6563_v51 = vadd.f32 %v3179_v22, %v6405_v52 }
0x274f   :  { %3301 = vrot.lane.b32.xlu1 %v4482_v62, %s5198_s22 }
0x2751   :  { %3299 = vrot.lane.b32.xlu0 %v4481_v53, %s5198_s22 }
0x27bd   :  { %v3188_v3 = vpop.permute.xlu1 %3187 }
0x27be   :  { %v3192_v39 = vsel %vm69_vm0, %v6541_v55, %v3188_v3 }
0x27bf   :  { %v3186_v26 = vpop.permute.xlu0 %3185 }
0x27c0   :  { %v3191_v6 = vsel %vm69_vm0, %v6545_v5, %v3186_v26 }
0x27c1   :  { %4949 = vmatprep.mubr.msk.f32.mxu0 %vm72_vm1, %v3191_v6  ;;  %v3302_v53 = vpop.permute.xlu1 %3301 }
0x27c2   :  { %4950 = vmatmul.mubr.msk.f32.vlgmr.msra.gmra.mxu0 %vm72_vm1, %v3192_v39 }
0x27c3   :  { %4964 = vmatpush3.msra.mxu0 %v6421_v40  ;;  %v3300_v26 = vpop.permute.xlu0 %3299 }
0x27c4   :  { %4965 = vmatprep.subr.mxu0 %v6427_v58 }
0x27c5   :  { %4966 = vmatpush3.msra.mxu0 %v6427_v58 }
0x27c6   :  { %4967 = vmatprep.subr.mxu0 %v6434_v20 }
0x27c7   :  { %4968 = vmatpush3.msra.mxu0 %v6434_v20 }
0x27c8   :  { %4969 = vmatprep.subr.mxu0 %v6441_v9 }
0x27c9   :  { %4970 = vmatpush3.msra.mxu0 %v6441_v9 }
0x27ca   :  { %4985 = vmatprep.subr.mxu0 %v6421_v40 }
0x2882   :  { %v4951_v52 = vpop.f32.mrf.mxu0 }
0x2883   :  { %v3275_v7 = vadd.f32 %v6449_v49, %v4951_v52 }
0x2884   :  { %v3265_v50 = vpop.f32.mrf.mxu0 }
0x2885   :  { %v3277_v21 = vmin.f32 %v3275_v7, -1e-06  ;;  %v3274_v37 = vadd.f32 %v6455_v24, %v3265_v50 }
0x2887   :  { %v3279_v46 = vmul.f32 -2.0, %v3277_v21  ;;  %v3276_v45 = vmin.f32 %v3274_v37, -1e-06 }
0x2889   :  { %5120 = vrsqrt.f32 %v3279_v46  ;;  %v3278_v44 = vmul.f32 -2.0, %v3276_v45 }
0x288b   :  { %5122 = vrsqrt.f32 %v3278_v44 }
0x2896   :  { %v5121_v32 = vpop.eup %5120 }
0x2897   :  { %v3283_v22 = vmul.f32 %v5121_v32, %v5121_v32  ;;  %v3306_v6 = vmul.f32 %v5121_v32, %v3302_v53 }
0x2898   :  { %v5123_v62 = vpop.eup %5122 }
0x2899   :  { %3288 = vrot.lane.b32.xlu1 %v3283_v22, %s5199_s19  ;;  %v3282_v3 = vmul.f32 %v5123_v62, %v5123_v62  ;;  %v3305_v39 = vmul.f32 %v5123_v62, %v3300_v26 }
0x289b   :  { %3286 = vrot.lane.b32.xlu0 %v3282_v3, %s5199_s19 }
0x289d   :  { %3311 = vrot.lane.b32.xlu1 %v3306_v6, %s5199_s19 }
0x289f   :  { %3309 = vrot.lane.b32.xlu0 %v3305_v39, %s5199_s19 }
0x290b   :  { %v3289_v52 = vpop.permute.xlu1 %3288 }
0x290c   :  { %v3293_v21 = vmul.f32 %v3289_v52, %v3275_v7 }
0x290d   :  { %v3287_v50 = vpop.permute.xlu0 %3286 }
0x290e   :  { %v3292_v45 = vmul.f32 %v3287_v50, %v3274_v37  ;;  %v4486_v37 = vld [vmem:[%s7010_s7 + $0xb8] sm:$0xff] }
0x290f   :  { %v3312_v46 = vpop.permute.xlu1 %3311 }
0x2910   :  { %v6590_v44 = vadd.f32 %v3312_v46, %v3293_v21 }
0x2911   :  { %v3310_v5 = vpop.permute.xlu0 %3309 }
0x2912   :  { %v3318_v22 = vmul.f32 %v6590_v44, %v6590_v44  ;;  %v6594_v55 = vadd.f32 %v3310_v5, %v3292_v45 }
0x2914   :  { %v6597_v32 = vadd.f32 %v3318_v22, %v6469_v35  ;;  %4487 = vst.msk [vmem:[%s7015_s12 + $0x58] sm:$0xff] %vm69_vm0, %v6594_v55  ;;  %3323 = vrot.lane.b32.xlu1 %v3318_v22, %s5198_s22  ;;  %v3317_v7 = vmul.f32 %v6594_v55, %v6594_v55  ;;  %v4485_v35 = vld [vmem:[%s7010_s7 + $0xb0] sm:$0xff] }
0x2916   :  { %3321 = vrot.lane.b32.xlu0 %v3317_v7, %s5198_s22  ;;  %v6612_v5 = vadd.f32 %v3317_v7, %v6484_v57 }
0x2918   :  { %3437 = vrot.lane.b32.xlu1 %v4486_v37, %s5198_s22 }
0x291a   :  { %3435 = vrot.lane.b32.xlu0 %v4485_v35, %s5198_s22 }
0x2986   :  { %v3324_v62 = vpop.permute.xlu1 %3323 }
0x2987   :  { %v3328_v26 = vsel %vm69_vm0, %v6590_v44, %v3324_v62 }
0x2988   :  { %v3322_v53 = vpop.permute.xlu0 %3321 }
0x2989   :  { %v3327_v3 = vsel %vm69_vm0, %v6594_v55, %v3322_v53 }
0x298a   :  { %4960 = vmatprep.mubr.msk.f32.mxu1 %vm72_vm1, %v3327_v3  ;;  %v3438_v35 = vpop.permute.xlu1 %3437 }
0x298b   :  { %4961 = vmatmul.mubr.msk.f32.vlgmr.msra.gmra.mxu1 %vm72_vm1, %v3328_v26 }
0x298c   :  { %4975 = vmatpush3.msra.mxu1 %v6500_v33  ;;  %v3436_v53 = vpop.permute.xlu0 %3435 }
0x298d   :  { %4976 = vmatprep.subr.mxu1 %v6506_v14 }
0x298e   :  { %4977 = vmatpush3.msra.mxu1 %v6506_v14 }
0x298f   :  { %4978 = vmatprep.subr.mxu1 %v6513_v12 }
0x2990   :  { %4979 = vmatpush3.msra.mxu1 %v6513_v12 }
0x2991   :  { %4980 = vmatprep.subr.mxu1 %v6520_v29 }
0x2992   :  { %4981 = vmatpush3.msra.mxu1 %v6520_v29 }
0x2993   :  { %4996 = vmatprep.subr.mxu1 %v6500_v33 }
0x2a4b   :  { %v4962_v57 = vpop.f32.mrf.mxu1 }
0x2a4c   :  { %v3411_v6 = vadd.f32 %v6528_v10, %v4962_v57 }
0x2a4d   :  { %v3401_v39 = vpop.f32.mrf.mxu1 }
0x2a4e   :  { %v3413_v52 = vmin.f32 %v3411_v6, -1e-06  ;;  %v3410_v50 = vadd.f32 %v6534_v28, %v3401_v39 }
0x2a50   :  { %v3415_v21 = vmul.f32 -2.0, %v3413_v52  ;;  %v3412_v46 = vmin.f32 %v3410_v50, -1e-06 }
0x2a52   :  { %5124 = vrsqrt.f32 %v3415_v21  ;;  %v3414_v45 = vmul.f32 -2.0, %v3412_v46 }
0x2a54   :  { %5126 = vrsqrt.f32 %v3414_v45 }
0x2a5f   :  { %v5125_v22 = vpop.eup %5124 }
0x2a60   :  { %v3419_v7 = vmul.f32 %v5125_v22, %v5125_v22  ;;  %v3442_v3 = vmul.f32 %v5125_v22, %v3438_v35 }
0x2a61   :  { %v5127_v37 = vpop.eup %5126 }
0x2a62   :  { %3424 = vrot.lane.b32.xlu1 %v3419_v7, %s5199_s19  ;;  %v3418_v62 = vmul.f32 %v5127_v37, %v5127_v37  ;;  %v3441_v26 = vmul.f32 %v5127_v37, %v3436_v53 }
0x2a64   :  { %3422 = vrot.lane.b32.xlu0 %v3418_v62, %s5199_s19 }
0x2a66   :  { %3447 = vrot.lane.b32.xlu1 %v3442_v3, %s5199_s19 }
0x2a68   :  { %3445 = vrot.lane.b32.xlu0 %v3441_v26, %s5199_s19 }
0x2ad4   :  { %v3425_v57 = vpop.permute.xlu1 %3424 }
0x2ad5   :  { %v3429_v52 = vmul.f32 %v3425_v57, %v3411_v6 }
0x2ad6   :  { %v3423_v39 = vpop.permute.xlu0 %3422 }
0x2ad7   :  { %v3428_v46 = vmul.f32 %v3423_v39, %v3410_v50  ;;  %v4492_v50 = vld [vmem:[%s7009_s6 + $0xc8] sm:$0xff] }
0x2ad8   :  { %v3448_v21 = vpop.permute.xlu1 %3447 }
0x2ad9   :  { %v6639_v45 = vadd.f32 %v3448_v21, %v3429_v52 }
0x2ada   :  { %v3446_v13 = vpop.permute.xlu0 %3445 }
0x2adb   :  { %7056 = vst [vmem:[#allocation23_spill] sm:$0xff] %v6639_v45  ;;  %v3464_v7 = vmul.f32 %v6639_v45, %v6639_v45  ;;  %v6643_v11 = vadd.f32 %v3446_v13, %v3428_v46 }
0x2add   :  { %7057 = vst [vmem:[#allocation24_spill] sm:$0xff] %v6643_v11  ;;  %v6646_v22 = vadd.f32 %v3464_v7, %v6548_v54  ;;  %4488 = vst.msk [vmem:[%s7016_s13 + $0x58] sm:$0xff] %vm69_vm0, %v6643_v11  ;;  %3471 = vrot.lane.b32.xlu1 %v3464_v7, %s5198_s22  ;;  %v3463_v6 = vmul.f32 %v6643_v11, %v6643_v11  ;;  %v4491_v54 = vld [vmem:[%s7009_s6 + $0xc0] sm:$0xff] }
0x2adf   :  { %3469 = vrot.lane.b32.xlu0 %v3463_v6, %s5198_s22  ;;  %v6661_v13 = vadd.f32 %v3463_v6, %v6563_v51 }
0x2ae1   :  { %3585 = vrot.lane.b32.xlu1 %v4492_v50, %s5198_s22 }
0x2ae3   :  { %3583 = vrot.lane.b32.xlu0 %v4491_v54, %s5198_s22 }
0x2b4f   :  { %v3472_v37 = vpop.permute.xlu1 %3471 }
0x2b50   :  { %v3476_v53 = vsel %vm69_vm0, %v6639_v45, %v3472_v37 }
0x2b51   :  { %v3470_v35 = vpop.permute.xlu0 %3469 }
0x2b52   :  { %v3475_v62 = vsel %vm69_vm0, %v6643_v11, %v3470_v35 }
0x2b53   :  { %4971 = vmatprep.mubr.msk.f32.mxu0 %vm72_vm1, %v3475_v62  ;;  %v3586_v54 = vpop.permute.xlu1 %3585 }
0x2b54   :  { %4972 = vmatmul.mubr.msk.f32.vlgmr.msra.gmra.mxu0 %vm72_vm1, %v3476_v53 }
0x2b55   :  { %4986 = vmatpush3.msra.mxu0 %v6421_v40  ;;  %v3584_v35 = vpop.permute.xlu0 %3583 }
0x2b56   :  { %4987 = vmatprep.subr.mxu0 %v6427_v58 }
0x2b57   :  { %4988 = vmatpush3.msra.mxu0 %v6427_v58 }
0x2b58   :  { %4989 = vmatprep.subr.mxu0 %v6434_v20 }
0x2b59   :  { %4990 = vmatpush3.msra.mxu0 %v6434_v20 }
0x2b5a   :  { %4991 = vmatprep.subr.mxu0 %v6441_v9 }
0x2b5b   :  { %4992 = vmatpush3.msra.mxu0 %v6441_v9 }
0x2b5c   :  { %5007 = vmatprep.subr.mxu0 %v6421_v40 }
0x2c14   :  { %v4973_v51 = vpop.f32.mrf.mxu0 }
0x2c15   :  { %v3559_v3 = vadd.f32 %v6449_v49, %v4973_v51 }
0x2c16   :  { %v3549_v26 = vpop.f32.mrf.mxu0 }
0x2c17   :  { %v3561_v57 = vmin.f32 %v3559_v3, -1e-06  ;;  %v3558_v39 = vadd.f32 %v6455_v24, %v3549_v26 }
0x2c19   :  { %v3563_v52 = vmul.f32 -2.0, %v3561_v57  ;;  %v3560_v21 = vmin.f32 %v3558_v39, -1e-06 }
0x2c1b   :  { %5128 = vrsqrt.f32 %v3563_v52  ;;  %v3562_v46 = vmul.f32 -2.0, %v3560_v21 }
0x2c1d   :  { %5130 = vrsqrt.f32 %v3562_v46 }
0x2c28   :  { %v5129_v7 = vpop.eup %5128 }
0x2c29   :  { %v3567_v6 = vmul.f32 %v5129_v7, %v5129_v7  ;;  %v3590_v62 = vmul.f32 %v5129_v7, %v3586_v54 }
0x2c2a   :  { %v5131_v50 = vpop.eup %5130 }
0x2c2b   :  { %3572 = vrot.lane.b32.xlu1 %v3567_v6, %s5199_s19  ;;  %v3566_v37 = vmul.f32 %v5131_v50, %v5131_v50  ;;  %v3589_v53 = vmul.f32 %v5131_v50, %v3584_v35 }
0x2c2d   :  { %3570 = vrot.lane.b32.xlu0 %v3566_v37, %s5199_s19 }
0x2c2f   :  { %3595 = vrot.lane.b32.xlu1 %v3590_v62, %s5199_s19 }
0x2c31   :  { %3593 = vrot.lane.b32.xlu0 %v3589_v53, %s5199_s19 }
0x2c9d   :  { %v3573_v51 = vpop.permute.xlu1 %3572 }
0x2c9e   :  { %v3577_v57 = vmul.f32 %v3573_v51, %v3559_v3 }
0x2c9f   :  { %v3571_v26 = vpop.permute.xlu0 %3570 }
0x2ca0   :  { %v3576_v21 = vmul.f32 %v3571_v26, %v3558_v39  ;;  %v4496_v39 = vld [vmem:[%s7010_s7 + $0xc8] sm:$0xff] }
0x2ca1   :  { %v3596_v52 = vpop.permute.xlu1 %3595 }
0x2ca2   :  { %v6688_v46 = vadd.f32 %v3596_v52, %v3577_v57 }
0x2ca3   :  { %v3594_v11 = vpop.permute.xlu0 %3593 }
0x2ca4   :  { %v3602_v6 = vmul.f32 %v6688_v46, %v6688_v46  ;;  %v6692_v45 = vadd.f32 %v3594_v11, %v3576_v21 }
0x2ca6   :  { %v6695_v7 = vadd.f32 %v3602_v6, %v6597_v32  ;;  %4497 = vst.msk [vmem:[%s7015_s12 + $0x60] sm:$0xff] %vm69_vm0, %v6692_v45  ;;  %3607 = vrot.lane.b32.xlu1 %v3602_v6, %s5198_s22  ;;  %v3601_v3 = vmul.f32 %v6692_v45, %v6692_v45  ;;  %v4495_v32 = vld [vmem:[%s7010_s7 + $0xc0] sm:$0xff] }
0x2ca8   :  { %3605 = vrot.lane.b32.xlu0 %v3601_v3, %s5198_s22  ;;  %v6710_v11 = vadd.f32 %v3601_v3, %v6612_v5 }
0x2caa   :  { %3721 = vrot.lane.b32.xlu1 %v4496_v39, %s5198_s22 }
0x2cac   :  { %3719 = vrot.lane.b32.xlu0 %v4495_v32, %s5198_s22 }
0x2d18   :  { %v3608_v50 = vpop.permute.xlu1 %3607 }
0x2d19   :  { %v3612_v35 = vsel %vm69_vm0, %v6688_v46, %v3608_v50 }
0x2d1a   :  { %v3606_v54 = vpop.permute.xlu0 %3605 }
0x2d1b   :  { %v3611_v37 = vsel %vm69_vm0, %v6692_v45, %v3606_v54 }
0x2d1c   :  { %4982 = vmatprep.mubr.msk.f32.mxu1 %vm72_vm1, %v3611_v37  ;;  %v3722_v32 = vpop.permute.xlu1 %3721 }
0x2d1d   :  { %4983 = vmatmul.mubr.msk.f32.vlgmr.msra.gmra.mxu1 %vm72_vm1, %v3612_v35 }
0x2d1e   :  { %4997 = vmatpush3.msra.mxu1 %v6500_v33  ;;  %v3720_v54 = vpop.permute.xlu0 %3719 }
0x2d1f   :  { %4998 = vmatprep.subr.mxu1 %v6506_v14 }
0x2d20   :  { %4999 = vmatpush3.msra.mxu1 %v6506_v14 }
0x2d21   :  { %5000 = vmatprep.subr.mxu1 %v6513_v12 }
0x2d22   :  { %5001 = vmatpush3.msra.mxu1 %v6513_v12 }
0x2d23   :  { %5002 = vmatprep.subr.mxu1 %v6520_v29 }
0x2d24   :  { %5003 = vmatpush3.msra.mxu1 %v6520_v29 }
0x2d25   :  { %5018 = vmatprep.subr.mxu1 %v6500_v33 }
0x2ddd   :  { %v4984_v5 = vpop.f32.mrf.mxu1 }
0x2dde   :  { %v3695_v62 = vadd.f32 %v6528_v10, %v4984_v5 }
0x2ddf   :  { %v3685_v53 = vpop.f32.mrf.mxu1 }
0x2de0   :  { %v3697_v51 = vmin.f32 %v3695_v62, -1e-06  ;;  %v3694_v26 = vadd.f32 %v6534_v28, %v3685_v53 }
0x2de2   :  { %v3699_v57 = vmul.f32 -2.0, %v3697_v51  ;;  %v3696_v52 = vmin.f32 %v3694_v26, -1e-06 }
0x2de4   :  { %5132 = vrsqrt.f32 %v3699_v57  ;;  %v3698_v21 = vmul.f32 -2.0, %v3696_v52 }
0x2de6   :  { %5134 = vrsqrt.f32 %v3698_v21 }
0x2df1   :  { %v5133_v6 = vpop.eup %5132 }
0x2df2   :  { %v3703_v3 = vmul.f32 %v5133_v6, %v5133_v6  ;;  %v3726_v37 = vmul.f32 %v5133_v6, %v3722_v32 }
0x2df3   :  { %v5135_v39 = vpop.eup %5134 }
0x2df4   :  { %3708 = vrot.lane.b32.xlu1 %v3703_v3, %s5199_s19  ;;  %v3702_v50 = vmul.f32 %v5135_v39, %v5135_v39  ;;  %v3725_v35 = vmul.f32 %v5135_v39, %v3720_v54 }
0x2df6   :  { %3706 = vrot.lane.b32.xlu0 %v3702_v50, %s5199_s19 }
0x2df8   :  { %3731 = vrot.lane.b32.xlu1 %v3726_v37, %s5199_s19 }
0x2dfa   :  { %3729 = vrot.lane.b32.xlu0 %v3725_v35, %s5199_s19 }
0x2e66   :  { %v3709_v5 = vpop.permute.xlu1 %3708 }
0x2e67   :  { %v3713_v51 = vmul.f32 %v3709_v5, %v3695_v62 }
0x2e68   :  { %v3707_v53 = vpop.permute.xlu0 %3706 }
0x2e69   :  { %v3712_v52 = vmul.f32 %v3707_v53, %v3694_v26  ;;  %v4502_v26 = vld [vmem:[%s7009_s6 + $0xd8] sm:$0xff] }
0x2e6a   :  { %v3732_v57 = vpop.permute.xlu1 %3731 }
0x2e6b   :  { %v6737_v21 = vadd.f32 %v3732_v57, %v3713_v51 }
0x2e6c   :  { %v3730_v30 = vpop.permute.xlu0 %3729 }
0x2e6d   :  { %v3748_v3 = vmul.f32 %v6737_v21, %v6737_v21  ;;  %v6741_v25 = vadd.f32 %v3730_v30, %v3712_v52 }
0x2e6f   :  { %v6744_v6 = vadd.f32 %v3748_v3, %v6646_v22  ;;  %4498 = vst.msk [vmem:[%s7016_s13 + $0x60] sm:$0xff] %vm69_vm0, %v6741_v25  ;;  %3755 = vrot.lane.b32.xlu1 %v3748_v3, %s5198_s22  ;;  %v3747_v62 = vmul.f32 %v6741_v25, %v6741_v25  ;;  %v4501_v22 = vld [vmem:[%s7009_s6 + $0xd0] sm:$0xff] }
0x2e71   :  { %3753 = vrot.lane.b32.xlu0 %v3747_v62, %s5198_s22  ;;  %v6759_v30 = vadd.f32 %v3747_v62, %v6661_v13 }
0x2e73   :  { %3869 = vrot.lane.b32.xlu1 %v4502_v26, %s5198_s22 }
0x2e75   :  { %3867 = vrot.lane.b32.xlu0 %v4501_v22, %s5198_s22 }
0x2ee1   :  { %v3756_v39 = vpop.permute.xlu1 %3755 }
0x2ee2   :  { %v3760_v54 = vsel %vm69_vm0, %v6737_v21, %v3756_v39 }
0x2ee3   :  { %v3754_v32 = vpop.permute.xlu0 %3753 }
0x2ee4   :  { %v3759_v50 = vsel %vm69_vm0, %v6741_v25, %v3754_v32 }
0x2ee5   :  { %4993 = vmatprep.mubr.msk.f32.mxu0 %vm72_vm1, %v3759_v50 }
0x2ee6   :  { %4994 = vmatmul.mubr.msk.f32.vlgmr.msra.gmra.mxu0 %vm72_vm1, %v3760_v54 }
0x2ee7   :  { %5008 = vmatpush3.msra.mxu0 %v6421_v40 }
0x2ee8   :  { %5009 = vmatprep.subr.mxu0 %v6427_v58 }
0x2ee9   :  { %5010 = vmatpush3.msra.mxu0 %v6427_v58 }
0x2eea   :  { %5011 = vmatprep.subr.mxu0 %v6434_v20 }
0x2eeb   :  { %5012 = vmatpush3.msra.mxu0 %v6434_v20  ;;  %v3870_v20 = vpop.permute.xlu1 %3869 }
0x2eec   :  { %5013 = vmatprep.subr.mxu0 %v6441_v9 }
0x2eed   :  { %5014 = vmatpush3.msra.mxu0 %v6441_v9  ;;  %v3868_v9 = vpop.permute.xlu0 %3867 }
0x2fa6   :  { %v4995_v13 = vpop.f32.mrf.mxu0 }
0x2fa7   :  { %v3843_v37 = vadd.f32 %v6449_v49, %v4995_v13 }
0x2fa8   :  { %v3833_v35 = vpop.f32.mrf.mxu0 }
0x2fa9   :  { %v3845_v5 = vmin.f32 %v3843_v37, -1e-06  ;;  %v3842_v53 = vadd.f32 %v6455_v24, %v3833_v35 }
0x2fab   :  { %v3847_v40 = vmul.f32 -2.0, %v3845_v5  ;;  %v3844_v51 = vmin.f32 %v3842_v53, -1e-06 }
0x2fad   :  { %5136 = vrsqrt.f32 %v3847_v40  ;;  %v3846_v57 = vmul.f32 -2.0, %v3844_v51 }
0x2faf   :  { %5138 = vrsqrt.f32 %v3846_v57 }
0x2fba   :  { %v5137_v58 = vpop.eup %5136 }
0x2fbb   :  { %v3851_v52 = vmul.f32 %v5137_v58, %v5137_v58  ;;  %v3874_v26 = vmul.f32 %v5137_v58, %v3870_v20  ;;  %v4505_v58 = vld [vmem:[%s7010_s7 + $0xd0] sm:$0xff] }
0x2fbc   :  { %v5139_v3 = vpop.eup %5138 }
0x2fbd   :  { %3856 = vrot.lane.b32.xlu1 %v3851_v52, %s5199_s19  ;;  %v3850_v62 = vmul.f32 %v5139_v3, %v5139_v3  ;;  %v3873_v22 = vmul.f32 %v5139_v3, %v3868_v9 }
0x2fbf   :  { %3854 = vrot.lane.b32.xlu0 %v3850_v62, %s5199_s19 }
0x2fc1   :  { %3879 = vrot.lane.b32.xlu1 %v3874_v26, %s5199_s19 }
0x2fc3   :  { %3877 = vrot.lane.b32.xlu0 %v3873_v22, %s5199_s19 }
0x302f   :  { %v3857_v39 = vpop.permute.xlu1 %3856 }
0x3030   :  { %v3861_v50 = vmul.f32 %v3857_v39, %v3843_v37 }
0x3031   :  { %v3855_v32 = vpop.permute.xlu0 %3854 }
0x3032   :  { %v3860_v13 = vmul.f32 %v3855_v32, %v3842_v53  ;;  %v4506_v53 = vld [vmem:[%s7010_s7 + $0xd8] sm:$0xff] }
0x3033   :  { %v3880_v54 = vpop.permute.xlu1 %3879 }
0x3034   :  { %v6785_v35 = vadd.f32 %v3880_v54, %v3861_v50 }
0x3035   :  { %v3878_v5 = vpop.permute.xlu0 %3877 }
0x3036   :  { %v3886_v40 = vmul.f32 %v6785_v35, %v6785_v35  ;;  %v6789_v51 = vadd.f32 %v3878_v5, %v3860_v13 }
0x3038   :  { %v6792_v57 = vadd.f32 %v3886_v40, %v6695_v7  ;;  %4507 = vst.msk [vmem:[%s7015_s12 + $0x68] sm:$0xff] %vm69_vm0, %v6789_v51  ;;  %3891 = vrot.lane.b32.xlu1 %v3886_v40, %s5198_s22  ;;  %v3885_v37 = vmul.f32 %v6789_v51, %v6789_v51 }
0x303a   :  { %3889 = vrot.lane.b32.xlu0 %v3885_v37, %s5198_s22  ;;  %v6807_v7 = vadd.f32 %v3885_v37, %v6710_v11 }
0x303c   :  { %4005 = vrot.lane.b32.xlu1 %v4506_v53, %s5198_s22 }
0x303e   :  { %4003 = vrot.lane.b32.xlu0 %v4505_v58, %s5198_s22 }
0x30aa   :  { %v3892_v52 = vpop.permute.xlu1 %3891 }
0x30ab   :  { %v3896_v62 = vsel %vm69_vm0, %v6785_v35, %v3892_v52 }
0x30ac   :  { %v3890_v3 = vpop.permute.xlu0 %3889 }
0x30ad   :  { %v3895_v20 = vsel %vm69_vm0, %v6789_v51, %v3890_v3 }
0x30ae   :  { %5004 = vmatprep.mubr.msk.f32.mxu1 %vm72_vm1, %v3895_v20 }
0x30af   :  { %5005 = vmatmul.mubr.msk.f32.vlgmr.msra.gmra.mxu1 %vm72_vm1, %v3896_v62 }
0x30b0   :  { %5019 = vmatpush3.msra.mxu1 %v6500_v33 }
0x30b1   :  { %5020 = vmatprep.subr.mxu1 %v6506_v14 }
0x30b2   :  { %5021 = vmatpush3.msra.mxu1 %v6506_v14 }
0x30b3   :  { %5022 = vmatprep.subr.mxu1 %v6513_v12 }
0x30b4   :  { %5023 = vmatpush3.msra.mxu1 %v6513_v12  ;;  %v4006_v12 = vpop.permute.xlu1 %4005 }
0x30b5   :  { %5024 = vmatprep.subr.mxu1 %v6520_v29 }
0x30b6   :  { %5025 = vmatpush3.msra.mxu1 %v6520_v29  ;;  %v4004_v29 = vpop.permute.xlu0 %4003 }
0x316f   :  { %v5006_v11 = vpop.f32.mrf.mxu1 }
0x3170   :  { %v3979_v9 = vadd.f32 %v6528_v10, %v5006_v11 }
0x3171   :  { %v3969_v26 = vpop.f32.mrf.mxu1 }
0x3172   :  { %v3981_v22 = vmin.f32 %v3979_v9, -1e-06  ;;  %v3978_v39 = vadd.f32 %v6534_v28, %v3969_v26 }
0x3174   :  { %v3983_v33 = vmul.f32 -2.0, %v3981_v22  ;;  %v3980_v32 = vmin.f32 %v3978_v39, -1e-06 }
0x3176   :  { %5140 = vrsqrt.f32 %v3983_v33  ;;  %v3982_v50 = vmul.f32 -2.0, %v3980_v32  ;;  %v4512_v33 = vld [vmem:[%s7009_s6 + $0xe8] sm:$0xff] }
0x3178   :  { %5142 = vrsqrt.f32 %v3982_v50  ;;  %v4511_v50 = vld [vmem:[%s7009_s6 + $0xe0] sm:$0xff] }
0x3183   :  { %v5141_v14 = vpop.eup %5140 }
0x3184   :  { %v3987_v54 = vmul.f32 %v5141_v14, %v5141_v14  ;;  %v4010_v40 = vmul.f32 %v5141_v14, %v4006_v12 }
0x3185   :  { %v5143_v13 = vpop.eup %5142 }
0x3186   :  { %3992 = vrot.lane.b32.xlu1 %v3987_v54, %s5199_s19  ;;  %v3986_v5 = vmul.f32 %v5143_v13, %v5143_v13  ;;  %v4009_v37 = vmul.f32 %v5143_v13, %v4004_v29 }
0x3188   :  { %3990 = vrot.lane.b32.xlu0 %v3986_v5, %s5199_s19 }
0x318a   :  { %4015 = vrot.lane.b32.xlu1 %v4010_v40, %s5199_s19 }
0x318c   :  { %4013 = vrot.lane.b32.xlu0 %v4009_v37, %s5199_s19 }
0x31f8   :  { %v3993_v53 = vpop.permute.xlu1 %3992 }
0x31f9   :  { %v3997_v52 = vmul.f32 %v3993_v53, %v3979_v9 }
0x31fa   :  { %v3991_v58 = vpop.permute.xlu0 %3990 }
0x31fb   :  { %v3996_v20 = vmul.f32 %v3991_v58, %v3978_v39 }
0x31fc   :  { %v4016_v3 = vpop.permute.xlu1 %4015 }
0x31fd   :  { %v6833_v62 = vadd.f32 %v4016_v3, %v3997_v52 }
0x31fe   :  { %v4014_v11 = vpop.permute.xlu0 %4013 }
0x31ff   :  { %v4032_v26 = vmul.f32 %v6833_v62, %v6833_v62  ;;  %v6837_v22 = vadd.f32 %v4014_v11, %v3996_v20 }
0x3201   :  { %4508 = vst.msk [vmem:[%s7016_s13 + $0x68] sm:$0xff] %vm69_vm0, %v6837_v22  ;;  %4039 = vrot.lane.b32.xlu1 %v4032_v26, %s5198_s22  ;;  %v4031_v9 = vmul.f32 %v6837_v22, %v6837_v22  ;;  %v6848_v39 = vadd.f32 %v4032_v26, %v6744_v6 }
0x3203   :  { %4037 = vrot.lane.b32.xlu0 %v4031_v9, %s5198_s22  ;;  %v6855_v32 = vadd.f32 %v4031_v9, %v6759_v30 }
0x3205   :  { %4153 = vrot.lane.b32.xlu1 %v4512_v33, %s5198_s22 }
0x3207   :  { %4151 = vrot.lane.b32.xlu0 %v4511_v50, %s5198_s22 }
0x3273   :  { %v4040_v14 = vpop.permute.xlu1 %4039 }
0x3274   :  { %v4044_v13 = vsel %vm69_vm0, %v6833_v62, %v4040_v14 }
0x3275   :  { %v4038_v6 = vpop.permute.xlu0 %4037 }
0x3276   :  { %v4043_v54 = vsel %vm69_vm0, %v6837_v22, %v4038_v6 }
0x3277   :  { %5015 = vmatprep.mubr.msk.f32.mxu0 %vm72_vm1, %v4043_v54  ;;  %v4154_v11 = vpop.permute.xlu1 %4153 }
0x3278   :  { %5016 = vmatmul.mubr.msk.f32.vlgmr.msra.gmra.mxu0 %vm72_vm1, %v4044_v13 }
0x3279   :  { %v4152_v9 = vpop.permute.xlu0 %4151 }
0x3338   :  { %v5017_v30 = vpop.f32.mrf.mxu0 }
0x3339   :  { %v4127_v12 = vadd.f32 %v6449_v49, %v5017_v30 }
0x333a   :  { %v4117_v5 = vpop.f32.mrf.mxu0 }
0x333b   :  { %v4129_v29 = vmin.f32 %v4127_v12, -1e-06  ;;  %v4126_v40 = vadd.f32 %v6455_v24, %v4117_v5 }
0x333d   :  { %v4131_v37 = vmul.f32 -2.0, %v4129_v29  ;;  %v4128_v53 = vmin.f32 %v4126_v40, -1e-06 }
0x333f   :  { %5144 = vrsqrt.f32 %v4131_v37  ;;  %v4130_v58 = vmul.f32 -2.0, %v4128_v53  ;;  %v4515_v53 = vld [vmem:[%s7010_s7 + $0xe0] sm:$0xff] }
0x3341   :  { %5146 = vrsqrt.f32 %v4130_v58 }
0x334c   :  { %v5145_v52 = vpop.eup %5144 }
0x334d   :  { %v4135_v3 = vmul.f32 %v5145_v52, %v5145_v52  ;;  %v4158_v33 = vmul.f32 %v5145_v52, %v4154_v11 }
0x334e   :  { %v5147_v20 = vpop.eup %5146 }
0x334f   :  { %4140 = vrot.lane.b32.xlu1 %v4135_v3, %s5199_s19  ;;  %v4134_v26 = vmul.f32 %v5147_v20, %v5147_v20  ;;  %v4157_v49 = vmul.f32 %v5147_v20, %v4152_v9 }
0x3351   :  { %4138 = vrot.lane.b32.xlu0 %v4134_v26, %s5199_s19 }
0x3353   :  { %4163 = vrot.lane.b32.xlu1 %v4158_v33, %s5199_s19 }
0x3355   :  { %4161 = vrot.lane.b32.xlu0 %v4157_v49, %s5199_s19 }
0x33c1   :  { %v4141_v24 = vpop.permute.xlu1 %4140 }
0x33c2   :  { %v4145_v14 = vmul.f32 %v4141_v24, %v4127_v12 }
0x33c3   :  { %v4139_v50 = vpop.permute.xlu0 %4138 }
0x33c4   :  { %v4144_v54 = vmul.f32 %v4139_v50, %v4126_v40  ;;  %v4516_v40 = vld [vmem:[%s7010_s7 + $0xe8] sm:$0xff] }
0x33c5   :  { %v4164_v6 = vpop.permute.xlu1 %4163 }
0x33c6   :  { %v6874_v13 = vadd.f32 %v4164_v6, %v4145_v14  ;;  %v617_v6 = vadd.f32 %v5488_v61, %v5380_v43 }
0x33c7   :  { %v4162_v30 = vpop.permute.xlu0 %4161 }
0x33c8   :  { %v4170_v5 = vmul.f32 %v6874_v13, %v6874_v13  ;;  %v6878_v29 = vadd.f32 %v4162_v30, %v4144_v54  ;;  %v618_v54 = vadd.f32 %v5486_v59, %v5378_v41 }
0x33ca   :  { %v6881_v37 = vadd.f32 %v4170_v5, %v6792_v57  ;;  %4517 = vst.msk [vmem:[%s7015_s12 + $0x70] sm:$0xff] %vm69_vm0, %v6878_v29  ;;  %4175 = vrot.lane.b32.xlu1 %v4170_v5, %s5198_s22  ;;  %v4169_v12 = vmul.f32 %v6878_v29, %v6878_v29  ;;  %v902_v30 = vadd.f32 %v5584_v31, %v618_v54  ;;  %v7061_v54 = vld [vmem:[#allocation8_spill] sm:$0xff] }
0x33cc   :  { %4173 = vrot.lane.b32.xlu0 %v4169_v12, %s5198_s22  ;;  %v4311_v57 = vadd.f32 %v4169_v12, %v6807_v7 }
0x33ce   :  { %4289 = vrot.lane.b32.xlu1 %v4516_v40, %s5198_s22  ;;  %v4321_v58 = vsub.f32 %v4311_v57, %v6881_v37  ;;  %v1186_v37 = vadd.f32 %v5686_v18, %v902_v30  ;;  %v7062_v30 = vld [vmem:[#allocation9_spill] sm:$0xff] }
0x33d0   :  { %4287 = vrot.lane.b32.xlu0 %v4515_v53, %s5198_s22 }
0x343c   :  { %v4176_v52 = vpop.permute.xlu1 %4175 }
0x343d   :  { %v4180_v11 = vsel %vm69_vm0, %v6874_v13, %v4176_v52  ;;  %v1470_v52 = vadd.f32 %v5784_v60, %v1186_v37 }
0x343e   :  { %v4174_v3 = vpop.permute.xlu0 %4173 }
0x343f   :  { %v4179_v20 = vsel %vm69_vm0, %v6878_v29, %v4174_v3  ;;  %v1754_v61 = vadd.f32 %v5912_v63, %v1470_v52  ;;  %v7067_v52 = vld [vmem:[#allocation14_spill] sm:$0xff] }
0x3440   :  { %5026 = vmatprep.mubr.msk.f32.mxu1 %vm72_vm1, %v4179_v20  ;;  %v4290_v53 = vpop.permute.xlu1 %4289 }
0x3441   :  { %5027 = vmatmul.mubr.msk.f32.vlgmr.msra.gmra.mxu1 %vm72_vm1, %v4180_v11  ;;  %v2038_v18 = vadd.f32 %v6040_v48, %v1754_v61  ;;  %v7070_v61 = vld [vmem:[#allocation17_spill] sm:$0xff] }
0x3442   :  { %v4288_v59 = vpop.permute.xlu0 %4287 }
0x3443   :  { %v2322_v60 = vadd.f32 %v6138_v2, %v2038_v18 }
0x3445   :  { %v2606_v63 = vadd.f32 %v6236_v15, %v2322_v60  ;;  %v7073_v60 = vld [vmem:[#allocation20_spill] sm:$0xff] }
0x3447   :  { %v2890_v3 = vadd.f32 %v6334_v27, %v2606_v63 }
0x3449   :  { %v3174_v48 = vadd.f32 %v6462_v8, %v2890_v3 }
0x344b   :  { %v3458_v11 = vadd.f32 %v6590_v44, %v3174_v48  ;;  %v4327_v44 = vld [vmem:[%s7011_s8] sm:$0xff] }
0x3501   :  { %v5028_v7 = vpop.f32.mrf.mxu1 }
0x3502   :  { %v6909_v26 = vadd.f32 %v6528_v10, %v5028_v7  ;;  %v901_v10 = vadd.f32 %v5588_v36, %v617_v6 }
0x3503   :  { %v4253_v9 = vpop.f32.mrf.mxu1 }
0x3504   :  { %v4265_v33 = vmin.f32 %v6909_v26, -1e-06  ;;  %v6913_v49 = vadd.f32 %v6534_v28, %v4253_v9  ;;  %v1185_v5 = vadd.f32 %v5688_v23, %v901_v10 }
0x3506   :  { %v4267_v24 = vmul.f32 -2.0, %v4265_v33  ;;  %v4264_v50 = vmin.f32 %v6913_v49, -1e-06  ;;  %v1469_v12 = vadd.f32 %v5786_v1, %v1185_v5 }
0x3508   :  { %5148 = vrsqrt.f32 %v4267_v24  ;;  %v4266_v14 = vmul.f32 -2.0, %v4264_v50  ;;  %v1753_v43 = vadd.f32 %v5914_v4, %v1469_v12  ;;  %v7059_v24 = vld [vmem:[#allocation6_spill] sm:$0xff]  ;;  %v7064_v12 = vld [vmem:[#allocation11_spill] sm:$0xff] }
0x350a   :  { %5150 = vrsqrt.f32 %v4266_v14  ;;  %v2037_v31 = vadd.f32 %v6044_v16, %v1753_v43  ;;  %v7060_v14 = vld [vmem:[#allocation7_spill] sm:$0xff] }
0x350c   :  { %v2321_v23 = vadd.f32 %v6142_v34, %v2037_v31 }
0x350e   :  { %v2605_v4 = vadd.f32 %v6240_v56, %v2321_v23  ;;  %v3742_v56 = vadd.f32 %v6688_v46, %v3458_v11  ;;  %v7072_v23 = vld [vmem:[#allocation19_spill] sm:$0xff] }
0x350f   :  { %v7076_v11 = vld [vmem:[#allocation23_spill] sm:$0xff] }
0x3510   :  { %v2889_v16 = vadd.f32 %v6338_v38, %v2605_v4  ;;  %v4026_v15 = vadd.f32 %v6785_v35, %v3742_v56  ;;  %v7077_v56 = vld [vmem:[#allocation24_spill] sm:$0xff] }
0x3512   :  { %v3173_v20 = vadd.f32 %v6466_v0, %v2889_v16  ;;  %v4310_v27 = vadd.f32 %v6874_v13, %v4026_v15  ;;  %v4322_v0 = vmul.f32 0.06666667, %v4321_v58  ;;  %v622_v13 = vadd.f32 %v5535_v42, %v5437_v17  ;;  %v7058_v58 = vld [vmem:[#allocation5_spill] sm:$0xff] }
0x3513   :  { %v7066_v17 = vld [vmem:[#allocation13_spill] sm:$0xff] }
0x3514   :  { %v3457_v34 = vadd.f32 %v6594_v55, %v3173_v20  ;;  %v4329_v55 = vld [vmem:[%s7012_s9] sm:$0xff]  ;;  %v906_v33 = vadd.f32 %v7058_v58, %v622_v13  ;;  %v7075_v20 = vld [vmem:[#allocation22_spill] sm:$0xff] }
0x3515   :  { %v5149_v28 = vpop.eup %5148  ;;  %v7074_v16 = vld [vmem:[#allocation21_spill] sm:$0xff] }
0x3516   :  { %v4271_v40 = vmul.f32 %v5149_v28, %v5149_v28  ;;  %v4294_v36 = vmul.f32 %v5149_v28, %v4290_v53  ;;  %v3741_v2 = vadd.f32 %v6692_v45, %v3457_v34  ;;  %v4330_v45 = vmul.f32 %v4329_v55, %v4322_v0  ;;  %v7063_v28 = vld [vmem:[#allocation10_spill] sm:$0xff] }
0x3517   :  { %v5151_v57 = vpop.eup %5150  ;;  %v1190_v6 = vadd.f32 %v7060_v14, %v906_v33 }
0x3518   :  { %4276 = vrot.lane.b32.xlu1 %v4271_v40, %s5199_s19  ;;  %v4270_v41 = vmul.f32 %v5151_v57, %v5151_v57  ;;  %v4293_v1 = vmul.f32 %v5151_v57, %v4288_v59  ;;  %v4025_v7 = vadd.f32 %v6789_v51, %v3741_v2  ;;  %v7065_v57 = vld [vmem:[#allocation12_spill] sm:$0xff] }
0x3519   :  { %v1474_v5 = vadd.f32 %v7062_v30, %v1190_v6 }
0x351a   :  { %4274 = vrot.lane.b32.xlu0 %v4270_v41, %s5199_s19  ;;  %v4309_v38 = vadd.f32 %v6878_v29, %v4025_v7  ;;  %v621_v29 = vadd.f32 %v5537_v47, %v5439_v19  ;;  %v7068_v47 = vld [vmem:[#allocation15_spill] sm:$0xff]  ;;  %v7069_v41 = vld [vmem:[#allocation16_spill] sm:$0xff] }
0x351b   :  { %v1758_v40 = vadd.f32 %v7064_v12, %v1474_v5 }
0x351c   :  { %4299 = vrot.lane.b32.xlu1 %v4294_v36, %s5199_s19  ;;  %v4319_v9 = vsub.f32 %v4309_v38, %v4310_v27  ;;  %v905_v50 = vadd.f32 %v7059_v24, %v621_v29  ;;  %v7071_v36 = vld [vmem:[#allocation18_spill] sm:$0xff] }
0x351d   :  { %v2042_v42 = vadd.f32 %v7066_v17, %v1758_v40 }
0x351e   :  { %4297 = vrot.lane.b32.xlu0 %v4293_v1, %s5199_s19  ;;  %v4320_v8 = vmul.f32 0.06666667, %v4319_v9  ;;  %v1189_v10 = vadd.f32 %v7061_v54, %v905_v50 }
0x351f   :  { %v2326_v43 = vadd.f32 %v7068_v47, %v2042_v42 }
0x3520   :  { %v4328_v46 = vmul.f32 %v4327_v44, %v4320_v8  ;;  %v1473_v37 = vadd.f32 %v7063_v28, %v1189_v10 }
0x3521   :  { %v2610_v31 = vadd.f32 %v7070_v61, %v2326_v43 }
0x3522   :  { %v4331_v51 = vadd.f32 %v4330_v45, %v4328_v46  ;;  %v1757_v53 = vadd.f32 %v7065_v57, %v1473_v37 }
0x3523   :  { %v2894_v1 = vadd.f32 %v7072_v23, %v2610_v31 }
0x3524   :  { %v4332_v35 = vsel %vm69_vm0, %v4331_v51, 0.0  ;;  %v2041_v19 = vadd.f32 %v7067_v52, %v1757_v53 }
0x3525   :  { %v3178_v3 = vadd.f32 %v7074_v16, %v2894_v1 }
0x3526   :  { %v2325_v59 = vadd.f32 %v7069_v41, %v2041_v19 }
0x3527   :  { %v3462_v2 = vadd.f32 %v7076_v11, %v3178_v3 }
0x3528   :  { %v2609_v18 = vadd.f32 %v7071_v36, %v2325_v59 }
0x3529   :  { %v3746_v27 = vadd.f32 %v6737_v21, %v3462_v2 }
0x352a   :  { %v2893_v4 = vadd.f32 %v7073_v60, %v2609_v18 }
0x352b   :  { %v4030_v44 = vadd.f32 %v6833_v62, %v3746_v27  ;;  %v4335_v62 = vld [vmem:[%s7013_s10] sm:$0xff]  ;;  %s5200_s10 = smov [#allocation2]  }
0x352c   :  { %v3177_v48 = vadd.f32 %v7075_v20, %v2893_v4 }
0x352e   :  { %v3461_v7 = vadd.f32 %v7077_v56, %v3177_v48 }
0x3530   :  { %v3745_v9 = vadd.f32 %v6741_v25, %v3461_v7 }
0x3532   :  { %v4029_v46 = vadd.f32 %v6837_v22, %v3745_v9  ;;  %v4337_v22 = vld [vmem:[%s7014_s11] sm:$0xff] }
0x353d   :  { %4333 = vadd.xlane.f32.xlu0 %v4332_v35 }
0x358a   :  { %v4277_v63 = vpop.permute.xlu1 %4276 }
0x358b   :  { %v4281_v15 = vmul.f32 %v4277_v63, %v6909_v26 }
0x358c   :  { %v4275_v34 = vpop.permute.xlu0 %4274 }
0x358d   :  { %v4280_v0 = vmul.f32 %v4275_v34, %v6913_v49 }
0x358e   :  { %v4300_v38 = vpop.permute.xlu1 %4299 }
0x358f   :  { %v4304_v55 = vadd.f32 %v4300_v38, %v4281_v15 }
0x3590   :  { %v4298_v8 = vpop.permute.xlu0 %4297 }
0x3591   :  { %v4316_v45 = vmul.f32 %v4304_v55, %v4304_v55  ;;  %v4303_v51 = vadd.f32 %v4298_v8, %v4280_v0  ;;  %v4314_v35 = vadd.f32 %v4304_v55, %v4030_v44 }
0x3593   :  { %4518 = vst.msk [vmem:[%s7016_s13 + $0x70] sm:$0xff] %vm69_vm0, %v4303_v51  ;;  %v4313_v26 = vadd.f32 %v4303_v51, %v4029_v46  ;;  %v4315_v21 = vmul.f32 %v4303_v51, %v4303_v51  ;;  %v4318_v25 = vadd.f32 %v4316_v45, %v6848_v39  ;;  %s4363_s13 = sshll.u32 %s5200_s10, 4  ;;  %s4364_s13 = int_to_ptr.vmem [resolvable:$true] %s4363_s13 }
0x3594   :  { %s5176_s11 = scalar_lea.vmem %s4364_s13, 16  ;;  %s5180_s30 = scalar_lea.vmem %s4364_s13, 32 }
0x3595   :  { %v4317_v49 = vadd.f32 %v4315_v21, %v6855_v32  ;;  %v4323_v13 = vsub.f32 %v4313_v26, %v4314_v35  ;;  %p5177_p0 = scmp.ne.s32.totalorder %s4364_s13, %s5176_s11  ;;  %p5181_p1 = scmp.lt.s32.totalorder %s4364_s13, %s4364_s13 }
0x3596   :  { %p5182_p2 = scmp.lt.s32.totalorder %s5180_s30, %s5176_s11 }
0x3597   :  { %v4324_v29 = vmul.f32 0.06666667, %v4323_v13  ;;  %v4325_v58 = vsub.f32 %v4317_v49, %v4318_v25 }
0x3598   :  { %p5183_p3 = por %p5182_p2, %p5181_p1 }
0x3599   :  { %v4326_v33 = vmul.f32 0.06666667, %v4325_v58  ;;  %v4336_v24 = vmul.f32 %v4335_v62, %v4324_v29 }
0x359a   :  { %p5184_p4 = pnand %p5183_p3, %p5177_p0 }
0x359b   :  { %v4338_v50 = vmul.f32 %v4337_v22, %v4326_v33 }
0x359d   :  { %v4339_v14 = vadd.f32 %v4338_v50, %v4336_v24 }
0x359f   :  { %v4340_v6 = vsel %vm69_vm0, %v4339_v14, 0.0 }
0x35a0   :  { %4341 = vadd.xlane.f32.xlu1 %v4340_v6 }
0x35c6   :  { %v4334_v39 = vpop.xlane.xlu0 %4333 }
0x3629   :  { %v4342_v32 = vpop.xlane.xlu1 %4341 }
0x362a   :  { %v4343_v54 = vadd.f32 %v4342_v32, %v4334_v39 }
0x362c   :  { %v4344_v10 = vrot.slane %v4343_v54, 4 }
0x362e   :  { %v4345_v30 = vadd.f32 %v4344_v10, %v4343_v54 }
0x3630   :  { %v4346_v5 = vrot.slane %v4345_v30, 2 }
0x3632   :  { %v4347_v28 = vadd.f32 %v4346_v5, %v4345_v30 }
0x3634   :  { %v4348_v37 = vrot.slane %v4347_v28, 1 }
0x3636   :  { %v4349_v12 = vadd.f32 %v4348_v37, %v4347_v28 }
0x3638   :  { %v4350_v40 = vmul.f32 0.125, %v4349_v12 }
0x363a   :  { %4352 = vst.msk [vmem:[#allocation2] sm:$0x1] %vm4351_vm2, %v4350_v40 }
0x363b   :  { %5187 = shalt.err (!%p5184_p4)
}
0x363c   :  { %4366 = dma.vmem_to_hbm [thread:$0]  %s4364_s13, 16, %s7017_s14, [#allocation3]  }
0x363d   :  { %5196 = dma.done.wait [#allocation3], 16  }
0x363e   :  { %5197 = vsyncadd [#allocation3], 4294967280 }
0x363f   :  { %4374 = vsyncpa [#allocation3], 1 }

</bundles_post_ra>
